<compile_context>
chip_gen: v7x
topology: tpu7x:2x2x1
jax: 0.10.0
libtpu: 0.0.40
codegen_flags: <defaults>
</compile_context>

<pallas_src>
import functools

import jax
import jax.numpy as jnp
from jax import lax
from jax.experimental import pallas as pl
from jax.experimental.pallas import tpu as pltpu


def _causal_conv_kernel(x_ref, wT_ref, wL_ref, b_ref, o_ref, xs_ref, *,
                        H, W, R, KH, KW, KL, ci, co, Nb, Wp):
    # x_ref : (Nb, ci, H, W)         raw unpadded input block (VMEM)
    # wT_ref: (co*ci*KH*KW,)         conv00T weights, flattened, SMEM
    # wL_ref: (co*ci*KL,)            conv00L weights, flattened, SMEM
    # b_ref : (co,)                  conv00T bias, SMEM
    # o_ref : (co, H, Nb*Wp)         lane-dense output slab (VMEM)
    # xs_ref: (ci, H+R, Nb*Wp+2R)    causally padded, lane-folded scratch (VMEM)
    LW = Nb * Wp                                   # output slab lane width

    # --- build padded, lane-folded input plane in VMEM (no wrapper-side pad) ---
    # Zero the slab (halo rows/cols + inter-image separators + trailing 2R cols),
    # then drop each image's interior at lane offset n*Wp+R / sublane offset R.
    xs_ref[...] = jnp.zeros_like(xs_ref)
    for n in range(Nb):
        c0 = n * Wp + R
        xs_ref[:, R:R + H, c0:c0 + W] = x_ref[n].astype(jnp.float32)

    # --- tap FMAs (pure VPU; MXU would be <2% utilized at ci=co=4) ---
    accs = [None] * co                             # start from first tap (no bias bcast)

    def fma(acc, w, plane):
        term = w * plane
        return term if acc is None else acc + term

    # conv00T taps: rows strictly above (ky in [0,R)), kx in [0, 2R]
    for ky in range(KH):
        for kx in range(KW):
            for i in range(ci):
                plane = xs_ref[i, ky:ky + H, kx:kx + LW]      # (H, LW) ref-sliced load
                for o in range(co):
                    w = wT_ref[((o * ci + i) * KH + ky) * KW + kx]
                    accs[o] = fma(accs[o], w, plane)

    # conv00L taps: current row, left context (includes current pixel iff curr=1)
    for kx in range(KL):
        for i in range(ci):
            plane = xs_ref[i, R:R + H, kx:kx + LW]            # (H, LW)
            for o in range(co):
                w = wL_ref[(o * ci + i) * KL + kx]
                accs[o] = fma(accs[o], w, plane)

    # --- lane-dense writeback: one (H, LW) slab store per output channel ---
    for o in range(co):
        o_ref[o, :, :] = (accs[o] + b_ref[o]).astype(o_ref.dtype)


def _pick_nb(N, ci, co, H, W, R, budget_bytes=8 << 20):
    """Images folded per grid step: aim for a lane-dense slab (Nb*(W+2R) >= 128)
    while keeping double-buffered in/out blocks + scratch within a few MiB."""
    Wp = W + 2 * R
    per_img = 2 * 4 * (ci * H * W + co * H * Wp)      # double-buffered in + out blocks
    per_img += 4 * ci * (H + R) * Wp                  # scratch share
    max_nb = max(1, budget_bytes // per_img)
    divs = [d for d in range(1, N + 1) if N % d == 0 and d <= max_nb]
    if not divs:
        return 1
    lane_dense = [d for d in divs if d * Wp >= 128]
    return min(lane_dense) if lane_dense else max(divs)


def causal_conv(x, wT, wL, bias, *, reach, curr):
    """x: (N, ci, H, W) NCHW float32.  Returns (N, co, H, W) NCHW."""
    N, ci, H, W = x.shape
    co = wT.shape[0]
    R = reach
    KH, KW, KL = R, 2 * R + 1, R + curr
    assert wT.shape == (co, ci, KH, KW)
    assert wL.shape == (co, ci, 1, KL)

    Wp = W + 2 * R                    # per-image lane stride (content + 2R halo)
    Nb = _pick_nb(N, ci, co, H, W, R)
    G = N // Nb
    LW = Nb * Wp

    wT_flat = wT.reshape(-1)          # ((o*ci+i)*KH+ky)*KW+kx
    wL_flat = wL[:, :, 0, :].reshape(-1)  # (o*ci+i)*KL+kx
    b_flat = bias.reshape(co)

    kernel = functools.partial(_causal_conv_kernel, H=H, W=W, R=R,
                               KH=KH, KW=KW, KL=KL, ci=ci, co=co,
                               Nb=Nb, Wp=Wp)

    out_slab = pl.pallas_call(
        kernel,
        out_shape=jax.ShapeDtypeStruct((G, co, H, LW), x.dtype),
        grid=(G,),
        in_specs=[
            pl.BlockSpec((Nb, ci, H, W), lambda g: (g, 0, 0, 0)),
            pl.BlockSpec(memory_space=pltpu.MemorySpace.SMEM),
            pl.BlockSpec(memory_space=pltpu.MemorySpace.SMEM),
            pl.BlockSpec(memory_space=pltpu.MemorySpace.SMEM),
        ],
        out_specs=pl.BlockSpec((None, co, H, LW), lambda g: (g, 0, 0, 0)),
        scratch_shapes=[pltpu.VMEM((ci, H + R, LW + 2 * R), jnp.float32)],
        compiler_params=pltpu.CompilerParams(
            dimension_semantics=("parallel",),
            vmem_limit_bytes=48 * 1024 * 1024),
    )(x, wT_flat, wL_flat, b_flat)

    # Un-plumb the lane-dense slab: (G, co, H, Nb*Wp) -> (N, co, H, W).
    # Image n (within a group) lives at slab columns [n*Wp, n*Wp + W).
    out = out_slab.reshape(G, co, H, Nb, Wp)[..., :W]
    out = out.transpose(0, 3, 1, 2, 4).reshape(N, co, H, W)
    return out


if __name__ == "__main__":
    reach, curr, ci, co = 2, 1, 4, 4
    N, H, W = 2, 16, 16

    key = jax.random.PRNGKey(0)
    k1, k2, k3, k4 = jax.random.split(key, 4)
    x = jax.random.normal(k1, (N, ci, H, W), jnp.float32)
    wT = jax.random.normal(k2, (co, ci, reach, 2 * reach + 1), jnp.float32) * 0.1
    wL = jax.random.normal(k3, (co, ci, 1, reach + curr), jnp.float32) * 0.1
    bias = jax.random.normal(k4, (co,), jnp.float32) * 0.1

    out = jax.block_until_ready(causal_conv(x, wT, wL, bias, reach=reach, curr=curr))

    # Pure-JAX reference with the exact PyTorch forward semantics.
    xt_pad = jnp.pad(x[:, :, :-1, :], ((0, 0), (0, 0), (reach, 0), (reach, reach)))
    xl_pad = jnp.pad(x if curr else x[:, :, :, :-1],
                     ((0, 0), (0, 0), (0, 0), (reach, 0)))
    dn = ('NCHW', 'OIHW', 'NCHW')
    ref = (lax.conv_general_dilated(xt_pad, wT, (1, 1), 'VALID', dimension_numbers=dn)
           + bias[None, :, None, None]
           + lax.conv_general_dilated(xl_pad, wL, (1, 1), 'VALID', dimension_numbers=dn))

    assert out.shape == (N, co, H, W), out.shape
    err = float(jnp.max(jnp.abs(out - ref)))
    assert jnp.allclose(out, ref, atol=1e-4, rtol=1e-4), err
    print("KERNEL_OK")
</pallas_src>

<mosaic_0001>
module attributes {stable_mosaic.version = 11 : i64} {
  func.func @_causal_conv_kernel(%arg0: i32, %arg1: memref<2x4x16x16xf32, #tpu.memory_space<vmem>>, %arg2: memref<160xf32, #tpu.memory_space<smem>>, %arg3: memref<48xf32, #tpu.memory_space<smem>>, %arg4: memref<4xf32, #tpu.memory_space<smem>>, %arg5: memref<1x4x16x40xf32, #tpu.memory_space<vmem>>, %arg6: memref<4x18x44xf32, #tpu.memory_space<vmem>>) attributes {dimension_semantics = [#tpu.dimension_semantics<parallel>], iteration_bounds = array<i64: 1>, scalar_prefetch = 0 : i64, scratch_operands = 1 : i64, tpu.core_type = #tpu.core_type<tc>, window_params = [{transform_indices = @transform_0, window_bounds = array<i64: 2, 4, 16, 16>}, {transform_indices = @transform_1, window_bounds = array<i64: 160>}, {transform_indices = @transform_2, window_bounds = array<i64: 48>}, {transform_indices = @transform_3, window_bounds = array<i64: 4>}, {transform_indices = @transform_4, window_bounds = array<i64: 1, 4, 16, 40>}]} {
    %cst = arith.constant 0.000000e+00 : f32
    %0 = vector.broadcast %cst : f32 to vector<4x18x44xf32>
    %c0 = arith.constant 0 : index
    %c0_0 = arith.constant 0 : index
    %c0_1 = arith.constant 0 : index
    %1 = vector.load %arg6[%c0, %c0_0, %c0_1] : memref<4x18x44xf32, #tpu.memory_space<vmem>>, vector<4x18x44xf32>
    tpu.vector_store %arg6[%c0, %c0_0, %c0_1], %0 {strides = array<i32>} : memref<4x18x44xf32, #tpu.memory_space<vmem>>, vector<4x18x44xf32>,
    %c0_2 = arith.constant 0 : index
    %c0_3 = arith.constant 0 : index
    %c0_4 = arith.constant 0 : index
    %c0_5 = arith.constant 0 : index
    %2 = vector.load %arg1[%c0_2, %c0_3, %c0_4, %c0_5] : memref<2x4x16x16xf32, #tpu.memory_space<vmem>>, vector<1x4x16x16xf32>
    %3 = vector.shape_cast %2 : vector<1x4x16x16xf32> to vector<4x16x16xf32>
    %c0_6 = arith.constant 0 : index
    %c2 = arith.constant 2 : index
    %c2_7 = arith.constant 2 : index
    %4 = vector.load %arg6[%c0_6, %c2, %c2_7] : memref<4x18x44xf32, #tpu.memory_space<vmem>>, vector<4x16x16xf32>
    tpu.vector_store %arg6[%c0_6, %c2, %c2_7], %3 {strides = array<i32>} : memref<4x18x44xf32, #tpu.memory_space<vmem>>, vector<4x16x16xf32>,
    %c1 = arith.constant 1 : index
    %c0_8 = arith.constant 0 : index
    %c0_9 = arith.constant 0 : index
    %c0_10 = arith.constant 0 : index
    %5 = vector.load %arg1[%c1, %c0_8, %c0_9, %c0_10] : memref<2x4x16x16xf32, #tpu.memory_space<vmem>>, vector<1x4x16x16xf32>
    %6 = vector.shape_cast %5 : vector<1x4x16x16xf32> to vector<4x16x16xf32>
    %c0_11 = arith.constant 0 : index
    %c2_12 = arith.constant 2 : index
    %c22 = arith.constant 22 : index
    %7 = vector.load %arg6[%c0_11, %c2_12, %c22] : memref<4x18x44xf32, #tpu.memory_space<vmem>>, vector<4x16x16xf32>
    tpu.vector_store %arg6[%c0_11, %c2_12, %c22], %6 {strides = array<i32>} : memref<4x18x44xf32, #tpu.memory_space<vmem>>, vector<4x16x16xf32>,
    %c0_13 = arith.constant 0 : index
    %c0_14 = arith.constant 0 : index
    %c0_15 = arith.constant 0 : index
    %8 = vector.load %arg6[%c0_13, %c0_14, %c0_15] : memref<4x18x44xf32, #tpu.memory_space<vmem>>, vector<1x16x40xf32>
    %9 = vector.shape_cast %8 : vector<1x16x40xf32> to vector<16x40xf32>
    %c0_16 = arith.constant 0 : index
    %10 = memref.load %arg2[%c0_16] : memref<160xf32, #tpu.memory_space<smem>>
    %11 = vector.broadcast %10 : f32 to vector<16x40xf32>
    %12 = arith.mulf %11, %9 : vector<16x40xf32>
    %c40 = arith.constant 40 : index
    %13 = memref.load %arg2[%c40] : memref<160xf32, #tpu.memory_space<smem>>
    %14 = vector.broadcast %13 : f32 to vector<16x40xf32>
    %15 = arith.mulf %14, %9 : vector<16x40xf32>
    %c80 = arith.constant 80 : index
    %16 = memref.load %arg2[%c80] : memref<160xf32, #tpu.memory_space<smem>>
    %17 = vector.broadcast %16 : f32 to vector<16x40xf32>
    %18 = arith.mulf %17, %9 : vector<16x40xf32>
    %c120 = arith.constant 120 : index
    %19 = memref.load %arg2[%c120] : memref<160xf32, #tpu.memory_space<smem>>
    %20 = vector.broadcast %19 : f32 to vector<16x40xf32>
    %21 = arith.mulf %20, %9 : vector<16x40xf32>
    %c1_17 = arith.constant 1 : index
    %c0_18 = arith.constant 0 : index
    %c0_19 = arith.constant 0 : index
    %22 = vector.load %arg6[%c1_17, %c0_18, %c0_19] : memref<4x18x44xf32, #tpu.memory_space<vmem>>, vector<1x16x40xf32>
    %23 = vector.shape_cast %22 : vector<1x16x40xf32> to vector<16x40xf32>
    %c10 = arith.constant 10 : index
    %24 = memref.load %arg2[%c10] : memref<160xf32, #tpu.memory_space<smem>>
    %25 = vector.broadcast %24 : f32 to vector<16x40xf32>
    %26 = arith.mulf %25, %23 : vector<16x40xf32>
    %27 = arith.addf %12, %26 : vector<16x40xf32>
    %c50 = arith.constant 50 : index
    %28 = memref.load %arg2[%c50] : memref<160xf32, #tpu.memory_space<smem>>
    %29 = vector.broadcast %28 : f32 to vector<16x40xf32>
    %30 = arith.mulf %29, %23 : vector<16x40xf32>
    %31 = arith.addf %15, %30 : vector<16x40xf32>
    %c90 = arith.constant 90 : index
    %32 = memref.load %arg2[%c90] : memref<160xf32, #tpu.memory_space<smem>>
    %33 = vector.broadcast %32 : f32 to vector<16x40xf32>
    %34 = arith.mulf %33, %23 : vector<16x40xf32>
    %35 = arith.addf %18, %34 : vector<16x40xf32>
    %c130 = arith.constant 130 : index
    %36 = memref.load %arg2[%c130] : memref<160xf32, #tpu.memory_space<smem>>
    %37 = vector.broadcast %36 : f32 to vector<16x40xf32>
    %38 = arith.mulf %37, %23 : vector<16x40xf32>
    %39 = arith.addf %21, %38 : vector<16x40xf32>
    %c2_20 = arith.constant 2 : index
    %c0_21 = arith.constant 0 : index
    %c0_22 = arith.constant 0 : index
    %40 = vector.load %arg6[%c2_20, %c0_21, %c0_22] : memref<4x18x44xf32, #tpu.memory_space<vmem>>, vector<1x16x40xf32>
    %41 = vector.shape_cast %40 : vector<1x16x40xf32> to vector<16x40xf32>
    %c20 = arith.constant 20 : index
    %42 = memref.load %arg2[%c20] : memref<160xf32, #tpu.memory_space<smem>>
    %43 = vector.broadcast %42 : f32 to vector<16x40xf32>
    %44 = arith.mulf %43, %41 : vector<16x40xf32>
    %45 = arith.addf %27, %44 : vector<16x40xf32>
    %c60 = arith.constant 60 : index
    %46 = memref.load %arg2[%c60] : memref<160xf32, #tpu.memory_space<smem>>
    %47 = vector.broadcast %46 : f32 to vector<16x40xf32>
    %48 = arith.mulf %47, %41 : vector<16x40xf32>
    %49 = arith.addf %31, %48 : vector<16x40xf32>
    %c100 = arith.constant 100 : index
    %50 = memref.load %arg2[%c100] : memref<160xf32, #tpu.memory_space<smem>>
    %51 = vector.broadcast %50 : f32 to vector<16x40xf32>
    %52 = arith.mulf %51, %41 : vector<16x40xf32>
    %53 = arith.addf %35, %52 : vector<16x40xf32>
    %c140 = arith.constant 140 : index
    %54 = memref.load %arg2[%c140] : memref<160xf32, #tpu.memory_space<smem>>
    %55 = vector.broadcast %54 : f32 to vector<16x40xf32>
    %56 = arith.mulf %55, %41 : vector<16x40xf32>
    %57 = arith.addf %39, %56 : vector<16x40xf32>
    %c3 = arith.constant 3 : index
    %c0_23 = arith.constant 0 : index
    %c0_24 = arith.constant 0 : index
    %58 = vector.load %arg6[%c3, %c0_23, %c0_24] : memref<4x18x44xf32, #tpu.memory_space<vmem>>, vector<1x16x40xf32>
    %59 = vector.shape_cast %58 : vector<1x16x40xf32> to vector<16x40xf32>
    %c30 = arith.constant 30 : index
    %60 = memref.load %arg2[%c30] : memref<160xf32, #tpu.memory_space<smem>>
    %61 = vector.broadcast %60 : f32 to vector<16x40xf32>
    %62 = arith.mulf %61, %59 : vector<16x40xf32>
    %63 = arith.addf %45, %62 : vector<16x40xf32>
    %c70 = arith.constant 70 : index
    %64 = memref.load %arg2[%c70] : memref<160xf32, #tpu.memory_space<smem>>
    %65 = vector.broadcast %64 : f32 to vector<16x40xf32>
    %66 = arith.mulf %65, %59 : vector<16x40xf32>
    %67 = arith.addf %49, %66 : vector<16x40xf32>
    %c110 = arith.constant 110 : index
    %68 = memref.load %arg2[%c110] : memref<160xf32, #tpu.memory_space<smem>>
    %69 = vector.broadcast %68 : f32 to vector<16x40xf32>
    %70 = arith.mulf %69, %59 : vector<16x40xf32>
    %71 = arith.addf %53, %70 : vector<16x40xf32>
    %c150 = arith.constant 150 : index
    %72 = memref.load %arg2[%c150] : memref<160xf32, #tpu.memory_space<smem>>
    %73 = vector.broadcast %72 : f32 to vector<16x40xf32>
    %74 = arith.mulf %73, %59 : vector<16x40xf32>
    %75 = arith.addf %57, %74 : vector<16x40xf32>
    %c0_25 = arith.constant 0 : index
    %c0_26 = arith.constant 0 : index
    %c1_27 = arith.constant 1 : index
    %76 = vector.load %arg6[%c0_25, %c0_26, %c1_27] : memref<4x18x44xf32, #tpu.memory_space<vmem>>, vector<1x16x40xf32>
    %77 = vector.shape_cast %76 : vector<1x16x40xf32> to vector<16x40xf32>
    %c1_28 = arith.constant 1 : index
    %78 = memref.load %arg2[%c1_28] : memref<160xf32, #tpu.memory_space<smem>>
    %79 = vector.broadcast %78 : f32 to vector<16x40xf32>
    %80 = arith.mulf %79, %77 : vector<16x40xf32>
    %81 = arith.addf %63, %80 : vector<16x40xf32>
    %c41 = arith.constant 41 : index
    %82 = memref.load %arg2[%c41] : memref<160xf32, #tpu.memory_space<smem>>
    %83 = vector.broadcast %82 : f32 to vector<16x40xf32>
    %84 = arith.mulf %83, %77 : vector<16x40xf32>
    %85 = arith.addf %67, %84 : vector<16x40xf32>
    %c81 = arith.constant 81 : index
    %86 = memref.load %arg2[%c81] : memref<160xf32, #tpu.memory_space<smem>>
    %87 = vector.broadcast %86 : f32 to vector<16x40xf32>
    %88 = arith.mulf %87, %77 : vector<16x40xf32>
    %89 = arith.addf %71, %88 : vector<16x40xf32>
    %c121 = arith.constant 121 : index
    %90 = memref.load %arg2[%c121] : memref<160xf32, #tpu.memory_space<smem>>
    %91 = vector.broadcast %90 : f32 to vector<16x40xf32>
    %92 = arith.mulf %91, %77 : vector<16x40xf32>
    %93 = arith.addf %75, %92 : vector<16x40xf32>
    %c1_29 = arith.constant 1 : index
    %c0_30 = arith.constant 0 : index
    %c1_31 = arith.constant 1 : index
    %94 = vector.load %arg6[%c1_29, %c0_30, %c1_31] : memref<4x18x44xf32, #tpu.memory_space<vmem>>, vector<1x16x40xf32>
    %95 = vector.shape_cast %94 : vector<1x16x40xf32> to vector<16x40xf32>
    %c11 = arith.constant 11 : index
    %96 = memref.load %arg2[%c11] : memref<160xf32, #tpu.memory_space<smem>>
    %97 = vector.broadcast %96 : f32 to vector<16x40xf32>
    %98 = arith.mulf %97, %95 : vector<16x40xf32>
    %99 = arith.addf %81, %98 : vector<16x40xf32>
    %c51 = arith.constant 51 : index
    %100 = memref.load %arg2[%c51] : memref<160xf32, #tpu.memory_space<smem>>
    %101 = vector.broadcast %100 : f32 to vector<16x40xf32>
    %102 = arith.mulf %101, %95 : vector<16x40xf32>
    %103 = arith.addf %85, %102 : vector<16x40xf32>
    %c91 = arith.constant 91 : index
    %104 = memref.load %arg2[%c91] : memref<160xf32, #tpu.memory_space<smem>>
    %105 = vector.broadcast %104 : f32 to vector<16x40xf32>
    %106 = arith.mulf %105, %95 : vector<16x40xf32>
    %107 = arith.addf %89, %106 : vector<16x40xf32>
    %c131 = arith.constant 131 : index
    %108 = memref.load %arg2[%c131] : memref<160xf32, #tpu.memory_space<smem>>
    %109 = vector.broadcast %108 : f32 to vector<16x40xf32>
    %110 = arith.mulf %109, %95 : vector<16x40xf32>
    %111 = arith.addf %93, %110 : vector<16x40xf32>
    %c2_32 = arith.constant 2 : index
    %c0_33 = arith.constant 0 : index
    %c1_34 = arith.constant 1 : index
    %112 = vector.load %arg6[%c2_32, %c0_33, %c1_34] : memref<4x18x44xf32, #tpu.memory_space<vmem>>, vector<1x16x40xf32>
    %113 = vector.shape_cast %112 : vector<1x16x40xf32> to vector<16x40xf32>
    %c21 = arith.constant 21 : index
    %114 = memref.load %arg2[%c21] : memref<160xf32, #tpu.memory_space<smem>>
    %115 = vector.broadcast %114 : f32 to vector<16x40xf32>
    %116 = arith.mulf %115, %113 : vector<16x40xf32>
    %117 = arith.addf %99, %116 : vector<16x40xf32>
    %c61 = arith.constant 61 : index
    %118 = memref.load %arg2[%c61] : memref<160xf32, #tpu.memory_space<smem>>
    %119 = vector.broadcast %118 : f32 to vector<16x40xf32>
    %120 = arith.mulf %119, %113 : vector<16x40xf32>
    %121 = arith.addf %103, %120 : vector<16x40xf32>
    %c101 = arith.constant 101 : index
    %122 = memref.load %arg2[%c101] : memref<160xf32, #tpu.memory_space<smem>>
    %123 = vector.broadcast %122 : f32 to vector<16x40xf32>
    %124 = arith.mulf %123, %113 : vector<16x40xf32>
    %125 = arith.addf %107, %124 : vector<16x40xf32>
    %c141 = arith.constant 141 : index
    %126 = memref.load %arg2[%c141] : memref<160xf32, #tpu.memory_space<smem>>
    %127 = vector.broadcast %126 : f32 to vector<16x40xf32>
    %128 = arith.mulf %127, %113 : vector<16x40xf32>
    %129 = arith.addf %111, %128 : vector<16x40xf32>
    %c3_35 = arith.constant 3 : index
    %c0_36 = arith.constant 0 : index
    %c1_37 = arith.constant 1 : index
    %130 = vector.load %arg6[%c3_35, %c0_36, %c1_37] : memref<4x18x44xf32, #tpu.memory_space<vmem>>, vector<1x16x40xf32>
    %131 = vector.shape_cast %130 : vector<1x16x40xf32> to vector<16x40xf32>
    %c31 = arith.constant 31 : index
    %132 = memref.load %arg2[%c31] : memref<160xf32, #tpu.memory_space<smem>>
    %133 = vector.broadcast %132 : f32 to vector<16x40xf32>
    %134 = arith.mulf %133, %131 : vector<16x40xf32>
    %135 = arith.addf %117, %134 : vector<16x40xf32>
    %c71 = arith.constant 71 : index
    %136 = memref.load %arg2[%c71] : memref<160xf32, #tpu.memory_space<smem>>
    %137 = vector.broadcast %136 : f32 to vector<16x40xf32>
    %138 = arith.mulf %137, %131 : vector<16x40xf32>
    %139 = arith.addf %121, %138 : vector<16x40xf32>
    %c111 = arith.constant 111 : index
    %140 = memref.load %arg2[%c111] : memref<160xf32, #tpu.memory_space<smem>>
    %141 = vector.broadcast %140 : f32 to vector<16x40xf32>
    %142 = arith.mulf %141, %131 : vector<16x40xf32>
    %143 = arith.addf %125, %142 : vector<16x40xf32>
    %c151 = arith.constant 151 : index
    %144 = memref.load %arg2[%c151] : memref<160xf32, #tpu.memory_space<smem>>
    %145 = vector.broadcast %144 : f32 to vector<16x40xf32>
    %146 = arith.mulf %145, %131 : vector<16x40xf32>
    %147 = arith.addf %129, %146 : vector<16x40xf32>
    %c0_38 = arith.constant 0 : index
    %c0_39 = arith.constant 0 : index
    %c2_40 = arith.constant 2 : index
    %148 = vector.load %arg6[%c0_38, %c0_39, %c2_40] : memref<4x18x44xf32, #tpu.memory_space<vmem>>, vector<1x16x40xf32>
    %149 = vector.shape_cast %148 : vector<1x16x40xf32> to vector<16x40xf32>
    %c2_41 = arith.constant 2 : index
    %150 = memref.load %arg2[%c2_41] : memref<160xf32, #tpu.memory_space<smem>>
    %151 = vector.broadcast %150 : f32 to vector<16x40xf32>
    %152 = arith.mulf %151, %149 : vector<16x40xf32>
    %153 = arith.addf %135, %152 : vector<16x40xf32>
    %c42 = arith.constant 42 : index
    %154 = memref.load %arg2[%c42] : memref<160xf32, #tpu.memory_space<smem>>
    %155 = vector.broadcast %154 : f32 to vector<16x40xf32>
    %156 = arith.mulf %155, %149 : vector<16x40xf32>
    %157 = arith.addf %139, %156 : vector<16x40xf32>
    %c82 = arith.constant 82 : index
    %158 = memref.load %arg2[%c82] : memref<160xf32, #tpu.memory_space<smem>>
    %159 = vector.broadcast %158 : f32 to vector<16x40xf32>
    %160 = arith.mulf %159, %149 : vector<16x40xf32>
    %161 = arith.addf %143, %160 : vector<16x40xf32>
    %c122 = arith.constant 122 : index
    %162 = memref.load %arg2[%c122] : memref<160xf32, #tpu.memory_space<smem>>
    %163 = vector.broadcast %162 : f32 to vector<16x40xf32>
    %164 = arith.mulf %163, %149 : vector<16x40xf32>
    %165 = arith.addf %147, %164 : vector<16x40xf32>
    %c1_42 = arith.constant 1 : index
    %c0_43 = arith.constant 0 : index
    %c2_44 = arith.constant 2 : index
    %166 = vector.load %arg6[%c1_42, %c0_43, %c2_44] : memref<4x18x44xf32, #tpu.memory_space<vmem>>, vector<1x16x40xf32>
    %167 = vector.shape_cast %166 : vector<1x16x40xf32> to vector<16x40xf32>
    %c12 = arith.constant 12 : index
    %168 = memref.load %arg2[%c12] : memref<160xf32, #tpu.memory_space<smem>>
    %169 = vector.broadcast %168 : f32 to vector<16x40xf32>
    %170 = arith.mulf %169, %167 : vector<16x40xf32>
    %171 = arith.addf %153, %170 : vector<16x40xf32>
    %c52 = arith.constant 52 : index
    %172 = memref.load %arg2[%c52] : memref<160xf32, #tpu.memory_space<smem>>
    %173 = vector.broadcast %172 : f32 to vector<16x40xf32>
    %174 = arith.mulf %173, %167 : vector<16x40xf32>
    %175 = arith.addf %157, %174 : vector<16x40xf32>
    %c92 = arith.constant 92 : index
    %176 = memref.load %arg2[%c92] : memref<160xf32, #tpu.memory_space<smem>>
    %177 = vector.broadcast %176 : f32 to vector<16x40xf32>
    %178 = arith.mulf %177, %167 : vector<16x40xf32>
    %179 = arith.addf %161, %178 : vector<16x40xf32>
    %c132 = arith.constant 132 : index
    %180 = memref.load %arg2[%c132] : memref<160xf32, #tpu.memory_space<smem>>
    %181 = vector.broadcast %180 : f32 to vector<16x40xf32>
    %182 = arith.mulf %181, %167 : vector<16x40xf32>
    %183 = arith.addf %165, %182 : vector<16x40xf32>
    %c2_45 = arith.constant 2 : index
    %c0_46 = arith.constant 0 : index
    %c2_47 = arith.constant 2 : index
    %184 = vector.load %arg6[%c2_45, %c0_46, %c2_47] : memref<4x18x44xf32, #tpu.memory_space<vmem>>, vector<1x16x40xf32>
    %185 = vector.shape_cast %184 : vector<1x16x40xf32> to vector<16x40xf32>
    %c22_48 = arith.constant 22 : index
    %186 = memref.load %arg2[%c22_48] : memref<160xf32, #tpu.memory_space<smem>>
    %187 = vector.broadcast %186 : f32 to vector<16x40xf32>
    %188 = arith.mulf %187, %185 : vector<16x40xf32>
    %189 = arith.addf %171, %188 : vector<16x40xf32>
    %c62 = arith.constant 62 : index
    %190 = memref.load %arg2[%c62] : memref<160xf32, #tpu.memory_space<smem>>
    %191 = vector.broadcast %190 : f32 to vector<16x40xf32>
    %192 = arith.mulf %191, %185 : vector<16x40xf32>
    %193 = arith.addf %175, %192 : vector<16x40xf32>
    %c102 = arith.constant 102 : index
    %194 = memref.load %arg2[%c102] : memref<160xf32, #tpu.memory_space<smem>>
    %195 = vector.broadcast %194 : f32 to vector<16x40xf32>
    %196 = arith.mulf %195, %185 : vector<16x40xf32>
    %197 = arith.addf %179, %196 : vector<16x40xf32>
    %c142 = arith.constant 142 : index
    %198 = memref.load %arg2[%c142] : memref<160xf32, #tpu.memory_space<smem>>
    %199 = vector.broadcast %198 : f32 to vector<16x40xf32>
    %200 = arith.mulf %199, %185 : vector<16x40xf32>
    %201 = arith.addf %183, %200 : vector<16x40xf32>
    %c3_49 = arith.constant 3 : index
    %c0_50 = arith.constant 0 : index
    %c2_51 = arith.constant 2 : index
    %202 = vector.load %arg6[%c3_49, %c0_50, %c2_51] : memref<4x18x44xf32, #tpu.memory_space<vmem>>, vector<1x16x40xf32>
    %203 = vector.shape_cast %202 : vector<1x16x40xf32> to vector<16x40xf32>
    %c32 = arith.constant 32 : index
    %204 = memref.load %arg2[%c32] : memref<160xf32, #tpu.memory_space<smem>>
    %205 = vector.broadcast %204 : f32 to vector<16x40xf32>
    %206 = arith.mulf %205, %203 : vector<16x40xf32>
    %207 = arith.addf %189, %206 : vector<16x40xf32>
    %c72 = arith.constant 72 : index
    %208 = memref.load %arg2[%c72] : memref<160xf32, #tpu.memory_space<smem>>
    %209 = vector.broadcast %208 : f32 to vector<16x40xf32>
    %210 = arith.mulf %209, %203 : vector<16x40xf32>
    %211 = arith.addf %193, %210 : vector<16x40xf32>
    %c112 = arith.constant 112 : index
    %212 = memref.load %arg2[%c112] : memref<160xf32, #tpu.memory_space<smem>>
    %213 = vector.broadcast %212 : f32 to vector<16x40xf32>
    %214 = arith.mulf %213, %203 : vector<16x40xf32>
    %215 = arith.addf %197, %214 : vector<16x40xf32>
    %c152 = arith.constant 152 : index
    %216 = memref.load %arg2[%c152] : memref<160xf32, #tpu.memory_space<smem>>
    %217 = vector.broadcast %216 : f32 to vector<16x40xf32>
    %218 = arith.mulf %217, %203 : vector<16x40xf32>
    %219 = arith.addf %201, %218 : vector<16x40xf32>
    %c0_52 = arith.constant 0 : index
    %c0_53 = arith.constant 0 : index
    %c3_54 = arith.constant 3 : index
    %220 = vector.load %arg6[%c0_52, %c0_53, %c3_54] : memref<4x18x44xf32, #tpu.memory_space<vmem>>, vector<1x16x40xf32>
    %221 = vector.shape_cast %220 : vector<1x16x40xf32> to vector<16x40xf32>
    %c3_55 = arith.constant 3 : index
    %222 = memref.load %arg2[%c3_55] : memref<160xf32, #tpu.memory_space<smem>>
    %223 = vector.broadcast %222 : f32 to vector<16x40xf32>
    %224 = arith.mulf %223, %221 : vector<16x40xf32>
    %225 = arith.addf %207, %224 : vector<16x40xf32>
    %c43 = arith.constant 43 : index
    %226 = memref.load %arg2[%c43] : memref<160xf32, #tpu.memory_space<smem>>
    %227 = vector.broadcast %226 : f32 to vector<16x40xf32>
    %228 = arith.mulf %227, %221 : vector<16x40xf32>
    %229 = arith.addf %211, %228 : vector<16x40xf32>
    %c83 = arith.constant 83 : index
    %230 = memref.load %arg2[%c83] : memref<160xf32, #tpu.memory_space<smem>>
    %231 = vector.broadcast %230 : f32 to vector<16x40xf32>
    %232 = arith.mulf %231, %221 : vector<16x40xf32>
    %233 = arith.addf %215, %232 : vector<16x40xf32>
    %c123 = arith.constant 123 : index
    %234 = memref.load %arg2[%c123] : memref<160xf32, #tpu.memory_space<smem>>
    %235 = vector.broadcast %234 : f32 to vector<16x40xf32>
    %236 = arith.mulf %235, %221 : vector<16x40xf32>
    %237 = arith.addf %219, %236 : vector<16x40xf32>
    %c1_56 = arith.constant 1 : index
    %c0_57 = arith.constant 0 : index
    %c3_58 = arith.constant 3 : index
    %238 = vector.load %arg6[%c1_56, %c0_57, %c3_58] : memref<4x18x44xf32, #tpu.memory_space<vmem>>, vector<1x16x40xf32>
    %239 = vector.shape_cast %238 : vector<1x16x40xf32> to vector<16x40xf32>
    %c13 = arith.constant 13 : index
    %240 = memref.load %arg2[%c13] : memref<160xf32, #tpu.memory_space<smem>>
    %241 = vector.broadcast %240 : f32 to vector<16x40xf32>
    %242 = arith.mulf %241, %239 : vector<16x40xf32>
    %243 = arith.addf %225, %242 : vector<16x40xf32>
    %c53 = arith.constant 53 : index
    %244 = memref.load %arg2[%c53] : memref<160xf32, #tpu.memory_space<smem>>
    %245 = vector.broadcast %244 : f32 to vector<16x40xf32>
    %246 = arith.mulf %245, %239 : vector<16x40xf32>
    %247 = arith.addf %229, %246 : vector<16x40xf32>
    %c93 = arith.constant 93 : index
    %248 = memref.load %arg2[%c93] : memref<160xf32, #tpu.memory_space<smem>>
    %249 = vector.broadcast %248 : f32 to vector<16x40xf32>
    %250 = arith.mulf %249, %239 : vector<16x40xf32>
    %251 = arith.addf %233, %250 : vector<16x40xf32>
    %c133 = arith.constant 133 : index
    %252 = memref.load %arg2[%c133] : memref<160xf32, #tpu.memory_space<smem>>
    %253 = vector.broadcast %252 : f32 to vector<16x40xf32>
    %254 = arith.mulf %253, %239 : vector<16x40xf32>
    %255 = arith.addf %237, %254 : vector<16x40xf32>
    %c2_59 = arith.constant 2 : index
    %c0_60 = arith.constant 0 : index
    %c3_61 = arith.constant 3 : index
    %256 = vector.load %arg6[%c2_59, %c0_60, %c3_61] : memref<4x18x44xf32, #tpu.memory_space<vmem>>, vector<1x16x40xf32>
    %257 = vector.shape_cast %256 : vector<1x16x40xf32> to vector<16x40xf32>
    %c23 = arith.constant 23 : index
    %258 = memref.load %arg2[%c23] : memref<160xf32, #tpu.memory_space<smem>>
    %259 = vector.broadcast %258 : f32 to vector<16x40xf32>
    %260 = arith.mulf %259, %257 : vector<16x40xf32>
    %261 = arith.addf %243, %260 : vector<16x40xf32>
    %c63 = arith.constant 63 : index
    %262 = memref.load %arg2[%c63] : memref<160xf32, #tpu.memory_space<smem>>
    %263 = vector.broadcast %262 : f32 to vector<16x40xf32>
    %264 = arith.mulf %263, %257 : vector<16x40xf32>
    %265 = arith.addf %247, %264 : vector<16x40xf32>
    %c103 = arith.constant 103 : index
    %266 = memref.load %arg2[%c103] : memref<160xf32, #tpu.memory_space<smem>>
    %267 = vector.broadcast %266 : f32 to vector<16x40xf32>
    %268 = arith.mulf %267, %257 : vector<16x40xf32>
    %269 = arith.addf %251, %268 : vector<16x40xf32>
    %c143 = arith.constant 143 : index
    %270 = memref.load %arg2[%c143] : memref<160xf32, #tpu.memory_space<smem>>
    %271 = vector.broadcast %270 : f32 to vector<16x40xf32>
    %272 = arith.mulf %271, %257 : vector<16x40xf32>
    %273 = arith.addf %255, %272 : vector<16x40xf32>
    %c3_62 = arith.constant 3 : index
    %c0_63 = arith.constant 0 : index
    %c3_64 = arith.constant 3 : index
    %274 = vector.load %arg6[%c3_62, %c0_63, %c3_64] : memref<4x18x44xf32, #tpu.memory_space<vmem>>, vector<1x16x40xf32>
    %275 = vector.shape_cast %274 : vector<1x16x40xf32> to vector<16x40xf32>
    %c33 = arith.constant 33 : index
    %276 = memref.load %arg2[%c33] : memref<160xf32, #tpu.memory_space<smem>>
    %277 = vector.broadcast %276 : f32 to vector<16x40xf32>
    %278 = arith.mulf %277, %275 : vector<16x40xf32>
    %279 = arith.addf %261, %278 : vector<16x40xf32>
    %c73 = arith.constant 73 : index
    %280 = memref.load %arg2[%c73] : memref<160xf32, #tpu.memory_space<smem>>
    %281 = vector.broadcast %280 : f32 to vector<16x40xf32>
    %282 = arith.mulf %281, %275 : vector<16x40xf32>
    %283 = arith.addf %265, %282 : vector<16x40xf32>
    %c113 = arith.constant 113 : index
    %284 = memref.load %arg2[%c113] : memref<160xf32, #tpu.memory_space<smem>>
    %285 = vector.broadcast %284 : f32 to vector<16x40xf32>
    %286 = arith.mulf %285, %275 : vector<16x40xf32>
    %287 = arith.addf %269, %286 : vector<16x40xf32>
    %c153 = arith.constant 153 : index
    %288 = memref.load %arg2[%c153] : memref<160xf32, #tpu.memory_space<smem>>
    %289 = vector.broadcast %288 : f32 to vector<16x40xf32>
    %290 = arith.mulf %289, %275 : vector<16x40xf32>
    %291 = arith.addf %273, %290 : vector<16x40xf32>
    %c0_65 = arith.constant 0 : index
    %c0_66 = arith.constant 0 : index
    %c4 = arith.constant 4 : index
    %292 = vector.load %arg6[%c0_65, %c0_66, %c4] : memref<4x18x44xf32, #tpu.memory_space<vmem>>, vector<1x16x40xf32>
    %293 = vector.shape_cast %292 : vector<1x16x40xf32> to vector<16x40xf32>
    %c4_67 = arith.constant 4 : index
    %294 = memref.load %arg2[%c4_67] : memref<160xf32, #tpu.memory_space<smem>>
    %295 = vector.broadcast %294 : f32 to vector<16x40xf32>
    %296 = arith.mulf %295, %293 : vector<16x40xf32>
    %297 = arith.addf %279, %296 : vector<16x40xf32>
    %c44 = arith.constant 44 : index
    %298 = memref.load %arg2[%c44] : memref<160xf32, #tpu.memory_space<smem>>
    %299 = vector.broadcast %298 : f32 to vector<16x40xf32>
    %300 = arith.mulf %299, %293 : vector<16x40xf32>
    %301 = arith.addf %283, %300 : vector<16x40xf32>
    %c84 = arith.constant 84 : index
    %302 = memref.load %arg2[%c84] : memref<160xf32, #tpu.memory_space<smem>>
    %303 = vector.broadcast %302 : f32 to vector<16x40xf32>
    %304 = arith.mulf %303, %293 : vector<16x40xf32>
    %305 = arith.addf %287, %304 : vector<16x40xf32>
    %c124 = arith.constant 124 : index
    %306 = memref.load %arg2[%c124] : memref<160xf32, #tpu.memory_space<smem>>
    %307 = vector.broadcast %306 : f32 to vector<16x40xf32>
    %308 = arith.mulf %307, %293 : vector<16x40xf32>
    %309 = arith.addf %291, %308 : vector<16x40xf32>
    %c1_68 = arith.constant 1 : index
    %c0_69 = arith.constant 0 : index
    %c4_70 = arith.constant 4 : index
    %310 = vector.load %arg6[%c1_68, %c0_69, %c4_70] : memref<4x18x44xf32, #tpu.memory_space<vmem>>, vector<1x16x40xf32>
    %311 = vector.shape_cast %310 : vector<1x16x40xf32> to vector<16x40xf32>
    %c14 = arith.constant 14 : index
    %312 = memref.load %arg2[%c14] : memref<160xf32, #tpu.memory_space<smem>>
    %313 = vector.broadcast %312 : f32 to vector<16x40xf32>
    %314 = arith.mulf %313, %311 : vector<16x40xf32>
    %315 = arith.addf %297, %314 : vector<16x40xf32>
    %c54 = arith.constant 54 : index
    %316 = memref.load %arg2[%c54] : memref<160xf32, #tpu.memory_space<smem>>
    %317 = vector.broadcast %316 : f32 to vector<16x40xf32>
    %318 = arith.mulf %317, %311 : vector<16x40xf32>
    %319 = arith.addf %301, %318 : vector<16x40xf32>
    %c94 = arith.constant 94 : index
    %320 = memref.load %arg2[%c94] : memref<160xf32, #tpu.memory_space<smem>>
    %321 = vector.broadcast %320 : f32 to vector<16x40xf32>
    %322 = arith.mulf %321, %311 : vector<16x40xf32>
    %323 = arith.addf %305, %322 : vector<16x40xf32>
    %c134 = arith.constant 134 : index
    %324 = memref.load %arg2[%c134] : memref<160xf32, #tpu.memory_space<smem>>
    %325 = vector.broadcast %324 : f32 to vector<16x40xf32>
    %326 = arith.mulf %325, %311 : vector<16x40xf32>
    %327 = arith.addf %309, %326 : vector<16x40xf32>
    %c2_71 = arith.constant 2 : index
    %c0_72 = arith.constant 0 : index
    %c4_73 = arith.constant 4 : index
    %328 = vector.load %arg6[%c2_71, %c0_72, %c4_73] : memref<4x18x44xf32, #tpu.memory_space<vmem>>, vector<1x16x40xf32>
    %329 = vector.shape_cast %328 : vector<1x16x40xf32> to vector<16x40xf32>
    %c24 = arith.constant 24 : index
    %330 = memref.load %arg2[%c24] : memref<160xf32, #tpu.memory_space<smem>>
    %331 = vector.broadcast %330 : f32 to vector<16x40xf32>
    %332 = arith.mulf %331, %329 : vector<16x40xf32>
    %333 = arith.addf %315, %332 : vector<16x40xf32>
    %c64 = arith.constant 64 : index
    %334 = memref.load %arg2[%c64] : memref<160xf32, #tpu.memory_space<smem>>
    %335 = vector.broadcast %334 : f32 to vector<16x40xf32>
    %336 = arith.mulf %335, %329 : vector<16x40xf32>
    %337 = arith.addf %319, %336 : vector<16x40xf32>
    %c104 = arith.constant 104 : index
    %338 = memref.load %arg2[%c104] : memref<160xf32, #tpu.memory_space<smem>>
    %339 = vector.broadcast %338 : f32 to vector<16x40xf32>
    %340 = arith.mulf %339, %329 : vector<16x40xf32>
    %341 = arith.addf %323, %340 : vector<16x40xf32>
    %c144 = arith.constant 144 : index
    %342 = memref.load %arg2[%c144] : memref<160xf32, #tpu.memory_space<smem>>
    %343 = vector.broadcast %342 : f32 to vector<16x40xf32>
    %344 = arith.mulf %343, %329 : vector<16x40xf32>
    %345 = arith.addf %327, %344 : vector<16x40xf32>
    %c3_74 = arith.constant 3 : index
    %c0_75 = arith.constant 0 : index
    %c4_76 = arith.constant 4 : index
    %346 = vector.load %arg6[%c3_74, %c0_75, %c4_76] : memref<4x18x44xf32, #tpu.memory_space<vmem>>, vector<1x16x40xf32>
    %347 = vector.shape_cast %346 : vector<1x16x40xf32> to vector<16x40xf32>
    %c34 = arith.constant 34 : index
    %348 = memref.load %arg2[%c34] : memref<160xf32, #tpu.memory_space<smem>>
    %349 = vector.broadcast %348 : f32 to vector<16x40xf32>
    %350 = arith.mulf %349, %347 : vector<16x40xf32>
    %351 = arith.addf %333, %350 : vector<16x40xf32>
    %c74 = arith.constant 74 : index
    %352 = memref.load %arg2[%c74] : memref<160xf32, #tpu.memory_space<smem>>
    %353 = vector.broadcast %352 : f32 to vector<16x40xf32>
    %354 = arith.mulf %353, %347 : vector<16x40xf32>
    %355 = arith.addf %337, %354 : vector<16x40xf32>
    %c114 = arith.constant 114 : index
    %356 = memref.load %arg2[%c114] : memref<160xf32, #tpu.memory_space<smem>>
    %357 = vector.broadcast %356 : f32 to vector<16x40xf32>
    %358 = arith.mulf %357, %347 : vector<16x40xf32>
    %359 = arith.addf %341, %358 : vector<16x40xf32>
    %c154 = arith.constant 154 : index
    %360 = memref.load %arg2[%c154] : memref<160xf32, #tpu.memory_space<smem>>
    %361 = vector.broadcast %360 : f32 to vector<16x40xf32>
    %362 = arith.mulf %361, %347 : vector<16x40xf32>
    %363 = arith.addf %345, %362 : vector<16x40xf32>
    %c0_77 = arith.constant 0 : index
    %c1_78 = arith.constant 1 : index
    %c0_79 = arith.constant 0 : index
    %364 = vector.load %arg6[%c0_77, %c1_78, %c0_79] : memref<4x18x44xf32, #tpu.memory_space<vmem>>, vector<1x16x40xf32>
    %365 = vector.shape_cast %364 : vector<1x16x40xf32> to vector<16x40xf32>
    %c5 = arith.constant 5 : index
    %366 = memref.load %arg2[%c5] : memref<160xf32, #tpu.memory_space<smem>>
    %367 = vector.broadcast %366 : f32 to vector<16x40xf32>
    %368 = arith.mulf %367, %365 : vector<16x40xf32>
    %369 = arith.addf %351, %368 : vector<16x40xf32>
    %c45 = arith.constant 45 : index
    %370 = memref.load %arg2[%c45] : memref<160xf32, #tpu.memory_space<smem>>
    %371 = vector.broadcast %370 : f32 to vector<16x40xf32>
    %372 = arith.mulf %371, %365 : vector<16x40xf32>
    %373 = arith.addf %355, %372 : vector<16x40xf32>
    %c85 = arith.constant 85 : index
    %374 = memref.load %arg2[%c85] : memref<160xf32, #tpu.memory_space<smem>>
    %375 = vector.broadcast %374 : f32 to vector<16x40xf32>
    %376 = arith.mulf %375, %365 : vector<16x40xf32>
    %377 = arith.addf %359, %376 : vector<16x40xf32>
    %c125 = arith.constant 125 : index
    %378 = memref.load %arg2[%c125] : memref<160xf32, #tpu.memory_space<smem>>
    %379 = vector.broadcast %378 : f32 to vector<16x40xf32>
    %380 = arith.mulf %379, %365 : vector<16x40xf32>
    %381 = arith.addf %363, %380 : vector<16x40xf32>
    %c1_80 = arith.constant 1 : index
    %c1_81 = arith.constant 1 : index
    %c0_82 = arith.constant 0 : index
    %382 = vector.load %arg6[%c1_80, %c1_81, %c0_82] : memref<4x18x44xf32, #tpu.memory_space<vmem>>, vector<1x16x40xf32>
    %383 = vector.shape_cast %382 : vector<1x16x40xf32> to vector<16x40xf32>
    %c15 = arith.constant 15 : index
    %384 = memref.load %arg2[%c15] : memref<160xf32, #tpu.memory_space<smem>>
    %385 = vector.broadcast %384 : f32 to vector<16x40xf32>
    %386 = arith.mulf %385, %383 : vector<16x40xf32>
    %387 = arith.addf %369, %386 : vector<16x40xf32>
    %c55 = arith.constant 55 : index
    %388 = memref.load %arg2[%c55] : memref<160xf32, #tpu.memory_space<smem>>
    %389 = vector.broadcast %388 : f32 to vector<16x40xf32>
    %390 = arith.mulf %389, %383 : vector<16x40xf32>
    %391 = arith.addf %373, %390 : vector<16x40xf32>
    %c95 = arith.constant 95 : index
    %392 = memref.load %arg2[%c95] : memref<160xf32, #tpu.memory_space<smem>>
    %393 = vector.broadcast %392 : f32 to vector<16x40xf32>
    %394 = arith.mulf %393, %383 : vector<16x40xf32>
    %395 = arith.addf %377, %394 : vector<16x40xf32>
    %c135 = arith.constant 135 : index
    %396 = memref.load %arg2[%c135] : memref<160xf32, #tpu.memory_space<smem>>
    %397 = vector.broadcast %396 : f32 to vector<16x40xf32>
    %398 = arith.mulf %397, %383 : vector<16x40xf32>
    %399 = arith.addf %381, %398 : vector<16x40xf32>
    %c2_83 = arith.constant 2 : index
    %c1_84 = arith.constant 1 : index
    %c0_85 = arith.constant 0 : index
    %400 = vector.load %arg6[%c2_83, %c1_84, %c0_85] : memref<4x18x44xf32, #tpu.memory_space<vmem>>, vector<1x16x40xf32>
    %401 = vector.shape_cast %400 : vector<1x16x40xf32> to vector<16x40xf32>
    %c25 = arith.constant 25 : index
    %402 = memref.load %arg2[%c25] : memref<160xf32, #tpu.memory_space<smem>>
    %403 = vector.broadcast %402 : f32 to vector<16x40xf32>
    %404 = arith.mulf %403, %401 : vector<16x40xf32>
    %405 = arith.addf %387, %404 : vector<16x40xf32>
    %c65 = arith.constant 65 : index
    %406 = memref.load %arg2[%c65] : memref<160xf32, #tpu.memory_space<smem>>
    %407 = vector.broadcast %406 : f32 to vector<16x40xf32>
    %408 = arith.mulf %407, %401 : vector<16x40xf32>
    %409 = arith.addf %391, %408 : vector<16x40xf32>
    %c105 = arith.constant 105 : index
    %410 = memref.load %arg2[%c105] : memref<160xf32, #tpu.memory_space<smem>>
    %411 = vector.broadcast %410 : f32 to vector<16x40xf32>
    %412 = arith.mulf %411, %401 : vector<16x40xf32>
    %413 = arith.addf %395, %412 : vector<16x40xf32>
    %c145 = arith.constant 145 : index
    %414 = memref.load %arg2[%c145] : memref<160xf32, #tpu.memory_space<smem>>
    %415 = vector.broadcast %414 : f32 to vector<16x40xf32>
    %416 = arith.mulf %415, %401 : vector<16x40xf32>
    %417 = arith.addf %399, %416 : vector<16x40xf32>
    %c3_86 = arith.constant 3 : index
    %c1_87 = arith.constant 1 : index
    %c0_88 = arith.constant 0 : index
    %418 = vector.load %arg6[%c3_86, %c1_87, %c0_88] : memref<4x18x44xf32, #tpu.memory_space<vmem>>, vector<1x16x40xf32>
    %419 = vector.shape_cast %418 : vector<1x16x40xf32> to vector<16x40xf32>
    %c35 = arith.constant 35 : index
    %420 = memref.load %arg2[%c35] : memref<160xf32, #tpu.memory_space<smem>>
    %421 = vector.broadcast %420 : f32 to vector<16x40xf32>
    %422 = arith.mulf %421, %419 : vector<16x40xf32>
    %423 = arith.addf %405, %422 : vector<16x40xf32>
    %c75 = arith.constant 75 : index
    %424 = memref.load %arg2[%c75] : memref<160xf32, #tpu.memory_space<smem>>
    %425 = vector.broadcast %424 : f32 to vector<16x40xf32>
    %426 = arith.mulf %425, %419 : vector<16x40xf32>
    %427 = arith.addf %409, %426 : vector<16x40xf32>
    %c115 = arith.constant 115 : index
    %428 = memref.load %arg2[%c115] : memref<160xf32, #tpu.memory_space<smem>>
    %429 = vector.broadcast %428 : f32 to vector<16x40xf32>
    %430 = arith.mulf %429, %419 : vector<16x40xf32>
    %431 = arith.addf %413, %430 : vector<16x40xf32>
    %c155 = arith.constant 155 : index
    %432 = memref.load %arg2[%c155] : memref<160xf32, #tpu.memory_space<smem>>
    %433 = vector.broadcast %432 : f32 to vector<16x40xf32>
    %434 = arith.mulf %433, %419 : vector<16x40xf32>
    %435 = arith.addf %417, %434 : vector<16x40xf32>
    %c0_89 = arith.constant 0 : index
    %c1_90 = arith.constant 1 : index
    %c1_91 = arith.constant 1 : index
    %436 = vector.load %arg6[%c0_89, %c1_90, %c1_91] : memref<4x18x44xf32, #tpu.memory_space<vmem>>, vector<1x16x40xf32>
    %437 = vector.shape_cast %436 : vector<1x16x40xf32> to vector<16x40xf32>
    %c6 = arith.constant 6 : index
    %438 = memref.load %arg2[%c6] : memref<160xf32, #tpu.memory_space<smem>>
    %439 = vector.broadcast %438 : f32 to vector<16x40xf32>
    %440 = arith.mulf %439, %437 : vector<16x40xf32>
    %441 = arith.addf %423, %440 : vector<16x40xf32>
    %c46 = arith.constant 46 : index
    %442 = memref.load %arg2[%c46] : memref<160xf32, #tpu.memory_space<smem>>
    %443 = vector.broadcast %442 : f32 to vector<16x40xf32>
    %444 = arith.mulf %443, %437 : vector<16x40xf32>
    %445 = arith.addf %427, %444 : vector<16x40xf32>
    %c86 = arith.constant 86 : index
    %446 = memref.load %arg2[%c86] : memref<160xf32, #tpu.memory_space<smem>>
    %447 = vector.broadcast %446 : f32 to vector<16x40xf32>
    %448 = arith.mulf %447, %437 : vector<16x40xf32>
    %449 = arith.addf %431, %448 : vector<16x40xf32>
    %c126 = arith.constant 126 : index
    %450 = memref.load %arg2[%c126] : memref<160xf32, #tpu.memory_space<smem>>
    %451 = vector.broadcast %450 : f32 to vector<16x40xf32>
    %452 = arith.mulf %451, %437 : vector<16x40xf32>
    %453 = arith.addf %435, %452 : vector<16x40xf32>
    %c1_92 = arith.constant 1 : index
    %c1_93 = arith.constant 1 : index
    %c1_94 = arith.constant 1 : index
    %454 = vector.load %arg6[%c1_92, %c1_93, %c1_94] : memref<4x18x44xf32, #tpu.memory_space<vmem>>, vector<1x16x40xf32>
    %455 = vector.shape_cast %454 : vector<1x16x40xf32> to vector<16x40xf32>
    %c16 = arith.constant 16 : index
    %456 = memref.load %arg2[%c16] : memref<160xf32, #tpu.memory_space<smem>>
    %457 = vector.broadcast %456 : f32 to vector<16x40xf32>
    %458 = arith.mulf %457, %455 : vector<16x40xf32>
    %459 = arith.addf %441, %458 : vector<16x40xf32>
    %c56 = arith.constant 56 : index
    %460 = memref.load %arg2[%c56] : memref<160xf32, #tpu.memory_space<smem>>
    %461 = vector.broadcast %460 : f32 to vector<16x40xf32>
    %462 = arith.mulf %461, %455 : vector<16x40xf32>
    %463 = arith.addf %445, %462 : vector<16x40xf32>
    %c96 = arith.constant 96 : index
    %464 = memref.load %arg2[%c96] : memref<160xf32, #tpu.memory_space<smem>>
    %465 = vector.broadcast %464 : f32 to vector<16x40xf32>
    %466 = arith.mulf %465, %455 : vector<16x40xf32>
    %467 = arith.addf %449, %466 : vector<16x40xf32>
    %c136 = arith.constant 136 : index
    %468 = memref.load %arg2[%c136] : memref<160xf32, #tpu.memory_space<smem>>
    %469 = vector.broadcast %468 : f32 to vector<16x40xf32>
    %470 = arith.mulf %469, %455 : vector<16x40xf32>
    %471 = arith.addf %453, %470 : vector<16x40xf32>
    %c2_95 = arith.constant 2 : index
    %c1_96 = arith.constant 1 : index
    %c1_97 = arith.constant 1 : index
    %472 = vector.load %arg6[%c2_95, %c1_96, %c1_97] : memref<4x18x44xf32, #tpu.memory_space<vmem>>, vector<1x16x40xf32>
    %473 = vector.shape_cast %472 : vector<1x16x40xf32> to vector<16x40xf32>
    %c26 = arith.constant 26 : index
    %474 = memref.load %arg2[%c26] : memref<160xf32, #tpu.memory_space<smem>>
    %475 = vector.broadcast %474 : f32 to vector<16x40xf32>
    %476 = arith.mulf %475, %473 : vector<16x40xf32>
    %477 = arith.addf %459, %476 : vector<16x40xf32>
    %c66 = arith.constant 66 : index
    %478 = memref.load %arg2[%c66] : memref<160xf32, #tpu.memory_space<smem>>
    %479 = vector.broadcast %478 : f32 to vector<16x40xf32>
    %480 = arith.mulf %479, %473 : vector<16x40xf32>
    %481 = arith.addf %463, %480 : vector<16x40xf32>
    %c106 = arith.constant 106 : index
    %482 = memref.load %arg2[%c106] : memref<160xf32, #tpu.memory_space<smem>>
    %483 = vector.broadcast %482 : f32 to vector<16x40xf32>
    %484 = arith.mulf %483, %473 : vector<16x40xf32>
    %485 = arith.addf %467, %484 : vector<16x40xf32>
    %c146 = arith.constant 146 : index
    %486 = memref.load %arg2[%c146] : memref<160xf32, #tpu.memory_space<smem>>
    %487 = vector.broadcast %486 : f32 to vector<16x40xf32>
    %488 = arith.mulf %487, %473 : vector<16x40xf32>
    %489 = arith.addf %471, %488 : vector<16x40xf32>
    %c3_98 = arith.constant 3 : index
    %c1_99 = arith.constant 1 : index
    %c1_100 = arith.constant 1 : index
    %490 = vector.load %arg6[%c3_98, %c1_99, %c1_100] : memref<4x18x44xf32, #tpu.memory_space<vmem>>, vector<1x16x40xf32>
    %491 = vector.shape_cast %490 : vector<1x16x40xf32> to vector<16x40xf32>
    %c36 = arith.constant 36 : index
    %492 = memref.load %arg2[%c36] : memref<160xf32, #tpu.memory_space<smem>>
    %493 = vector.broadcast %492 : f32 to vector<16x40xf32>
    %494 = arith.mulf %493, %491 : vector<16x40xf32>
    %495 = arith.addf %477, %494 : vector<16x40xf32>
    %c76 = arith.constant 76 : index
    %496 = memref.load %arg2[%c76] : memref<160xf32, #tpu.memory_space<smem>>
    %497 = vector.broadcast %496 : f32 to vector<16x40xf32>
    %498 = arith.mulf %497, %491 : vector<16x40xf32>
    %499 = arith.addf %481, %498 : vector<16x40xf32>
    %c116 = arith.constant 116 : index
    %500 = memref.load %arg2[%c116] : memref<160xf32, #tpu.memory_space<smem>>
    %501 = vector.broadcast %500 : f32 to vector<16x40xf32>
    %502 = arith.mulf %501, %491 : vector<16x40xf32>
    %503 = arith.addf %485, %502 : vector<16x40xf32>
    %c156 = arith.constant 156 : index
    %504 = memref.load %arg2[%c156] : memref<160xf32, #tpu.memory_space<smem>>
    %505 = vector.broadcast %504 : f32 to vector<16x40xf32>
    %506 = arith.mulf %505, %491 : vector<16x40xf32>
    %507 = arith.addf %489, %506 : vector<16x40xf32>
    %c0_101 = arith.constant 0 : index
    %c1_102 = arith.constant 1 : index
    %c2_103 = arith.constant 2 : index
    %508 = vector.load %arg6[%c0_101, %c1_102, %c2_103] : memref<4x18x44xf32, #tpu.memory_space<vmem>>, vector<1x16x40xf32>
    %509 = vector.shape_cast %508 : vector<1x16x40xf32> to vector<16x40xf32>
    %c7 = arith.constant 7 : index
    %510 = memref.load %arg2[%c7] : memref<160xf32, #tpu.memory_space<smem>>
    %511 = vector.broadcast %510 : f32 to vector<16x40xf32>
    %512 = arith.mulf %511, %509 : vector<16x40xf32>
    %513 = arith.addf %495, %512 : vector<16x40xf32>
    %c47 = arith.constant 47 : index
    %514 = memref.load %arg2[%c47] : memref<160xf32, #tpu.memory_space<smem>>
    %515 = vector.broadcast %514 : f32 to vector<16x40xf32>
    %516 = arith.mulf %515, %509 : vector<16x40xf32>
    %517 = arith.addf %499, %516 : vector<16x40xf32>
    %c87 = arith.constant 87 : index
    %518 = memref.load %arg2[%c87] : memref<160xf32, #tpu.memory_space<smem>>
    %519 = vector.broadcast %518 : f32 to vector<16x40xf32>
    %520 = arith.mulf %519, %509 : vector<16x40xf32>
    %521 = arith.addf %503, %520 : vector<16x40xf32>
    %c127 = arith.constant 127 : index
    %522 = memref.load %arg2[%c127] : memref<160xf32, #tpu.memory_space<smem>>
    %523 = vector.broadcast %522 : f32 to vector<16x40xf32>
    %524 = arith.mulf %523, %509 : vector<16x40xf32>
    %525 = arith.addf %507, %524 : vector<16x40xf32>
    %c1_104 = arith.constant 1 : index
    %c1_105 = arith.constant 1 : index
    %c2_106 = arith.constant 2 : index
    %526 = vector.load %arg6[%c1_104, %c1_105, %c2_106] : memref<4x18x44xf32, #tpu.memory_space<vmem>>, vector<1x16x40xf32>
    %527 = vector.shape_cast %526 : vector<1x16x40xf32> to vector<16x40xf32>
    %c17 = arith.constant 17 : index
    %528 = memref.load %arg2[%c17] : memref<160xf32, #tpu.memory_space<smem>>
    %529 = vector.broadcast %528 : f32 to vector<16x40xf32>
    %530 = arith.mulf %529, %527 : vector<16x40xf32>
    %531 = arith.addf %513, %530 : vector<16x40xf32>
    %c57 = arith.constant 57 : index
    %532 = memref.load %arg2[%c57] : memref<160xf32, #tpu.memory_space<smem>>
    %533 = vector.broadcast %532 : f32 to vector<16x40xf32>
    %534 = arith.mulf %533, %527 : vector<16x40xf32>
    %535 = arith.addf %517, %534 : vector<16x40xf32>
    %c97 = arith.constant 97 : index
    %536 = memref.load %arg2[%c97] : memref<160xf32, #tpu.memory_space<smem>>
    %537 = vector.broadcast %536 : f32 to vector<16x40xf32>
    %538 = arith.mulf %537, %527 : vector<16x40xf32>
    %539 = arith.addf %521, %538 : vector<16x40xf32>
    %c137 = arith.constant 137 : index
    %540 = memref.load %arg2[%c137] : memref<160xf32, #tpu.memory_space<smem>>
    %541 = vector.broadcast %540 : f32 to vector<16x40xf32>
    %542 = arith.mulf %541, %527 : vector<16x40xf32>
    %543 = arith.addf %525, %542 : vector<16x40xf32>
    %c2_107 = arith.constant 2 : index
    %c1_108 = arith.constant 1 : index
    %c2_109 = arith.constant 2 : index
    %544 = vector.load %arg6[%c2_107, %c1_108, %c2_109] : memref<4x18x44xf32, #tpu.memory_space<vmem>>, vector<1x16x40xf32>
    %545 = vector.shape_cast %544 : vector<1x16x40xf32> to vector<16x40xf32>
    %c27 = arith.constant 27 : index
    %546 = memref.load %arg2[%c27] : memref<160xf32, #tpu.memory_space<smem>>
    %547 = vector.broadcast %546 : f32 to vector<16x40xf32>
    %548 = arith.mulf %547, %545 : vector<16x40xf32>
    %549 = arith.addf %531, %548 : vector<16x40xf32>
    %c67 = arith.constant 67 : index
    %550 = memref.load %arg2[%c67] : memref<160xf32, #tpu.memory_space<smem>>
    %551 = vector.broadcast %550 : f32 to vector<16x40xf32>
    %552 = arith.mulf %551, %545 : vector<16x40xf32>
    %553 = arith.addf %535, %552 : vector<16x40xf32>
    %c107 = arith.constant 107 : index
    %554 = memref.load %arg2[%c107] : memref<160xf32, #tpu.memory_space<smem>>
    %555 = vector.broadcast %554 : f32 to vector<16x40xf32>
    %556 = arith.mulf %555, %545 : vector<16x40xf32>
    %557 = arith.addf %539, %556 : vector<16x40xf32>
    %c147 = arith.constant 147 : index
    %558 = memref.load %arg2[%c147] : memref<160xf32, #tpu.memory_space<smem>>
    %559 = vector.broadcast %558 : f32 to vector<16x40xf32>
    %560 = arith.mulf %559, %545 : vector<16x40xf32>
    %561 = arith.addf %543, %560 : vector<16x40xf32>
    %c3_110 = arith.constant 3 : index
    %c1_111 = arith.constant 1 : index
    %c2_112 = arith.constant 2 : index
    %562 = vector.load %arg6[%c3_110, %c1_111, %c2_112] : memref<4x18x44xf32, #tpu.memory_space<vmem>>, vector<1x16x40xf32>
    %563 = vector.shape_cast %562 : vector<1x16x40xf32> to vector<16x40xf32>
    %c37 = arith.constant 37 : index
    %564 = memref.load %arg2[%c37] : memref<160xf32, #tpu.memory_space<smem>>
    %565 = vector.broadcast %564 : f32 to vector<16x40xf32>
    %566 = arith.mulf %565, %563 : vector<16x40xf32>
    %567 = arith.addf %549, %566 : vector<16x40xf32>
    %c77 = arith.constant 77 : index
    %568 = memref.load %arg2[%c77] : memref<160xf32, #tpu.memory_space<smem>>
    %569 = vector.broadcast %568 : f32 to vector<16x40xf32>
    %570 = arith.mulf %569, %563 : vector<16x40xf32>
    %571 = arith.addf %553, %570 : vector<16x40xf32>
    %c117 = arith.constant 117 : index
    %572 = memref.load %arg2[%c117] : memref<160xf32, #tpu.memory_space<smem>>
    %573 = vector.broadcast %572 : f32 to vector<16x40xf32>
    %574 = arith.mulf %573, %563 : vector<16x40xf32>
    %575 = arith.addf %557, %574 : vector<16x40xf32>
    %c157 = arith.constant 157 : index
    %576 = memref.load %arg2[%c157] : memref<160xf32, #tpu.memory_space<smem>>
    %577 = vector.broadcast %576 : f32 to vector<16x40xf32>
    %578 = arith.mulf %577, %563 : vector<16x40xf32>
    %579 = arith.addf %561, %578 : vector<16x40xf32>
    %c0_113 = arith.constant 0 : index
    %c1_114 = arith.constant 1 : index
    %c3_115 = arith.constant 3 : index
    %580 = vector.load %arg6[%c0_113, %c1_114, %c3_115] : memref<4x18x44xf32, #tpu.memory_space<vmem>>, vector<1x16x40xf32>
    %581 = vector.shape_cast %580 : vector<1x16x40xf32> to vector<16x40xf32>
    %c8 = arith.constant 8 : index
    %582 = memref.load %arg2[%c8] : memref<160xf32, #tpu.memory_space<smem>>
    %583 = vector.broadcast %582 : f32 to vector<16x40xf32>
    %584 = arith.mulf %583, %581 : vector<16x40xf32>
    %585 = arith.addf %567, %584 : vector<16x40xf32>
    %c48 = arith.constant 48 : index
    %586 = memref.load %arg2[%c48] : memref<160xf32, #tpu.memory_space<smem>>
    %587 = vector.broadcast %586 : f32 to vector<16x40xf32>
    %588 = arith.mulf %587, %581 : vector<16x40xf32>
    %589 = arith.addf %571, %588 : vector<16x40xf32>
    %c88 = arith.constant 88 : index
    %590 = memref.load %arg2[%c88] : memref<160xf32, #tpu.memory_space<smem>>
    %591 = vector.broadcast %590 : f32 to vector<16x40xf32>
    %592 = arith.mulf %591, %581 : vector<16x40xf32>
    %593 = arith.addf %575, %592 : vector<16x40xf32>
    %c128 = arith.constant 128 : index
    %594 = memref.load %arg2[%c128] : memref<160xf32, #tpu.memory_space<smem>>
    %595 = vector.broadcast %594 : f32 to vector<16x40xf32>
    %596 = arith.mulf %595, %581 : vector<16x40xf32>
    %597 = arith.addf %579, %596 : vector<16x40xf32>
    %c1_116 = arith.constant 1 : index
    %c1_117 = arith.constant 1 : index
    %c3_118 = arith.constant 3 : index
    %598 = vector.load %arg6[%c1_116, %c1_117, %c3_118] : memref<4x18x44xf32, #tpu.memory_space<vmem>>, vector<1x16x40xf32>
    %599 = vector.shape_cast %598 : vector<1x16x40xf32> to vector<16x40xf32>
    %c18 = arith.constant 18 : index
    %600 = memref.load %arg2[%c18] : memref<160xf32, #tpu.memory_space<smem>>
    %601 = vector.broadcast %600 : f32 to vector<16x40xf32>
    %602 = arith.mulf %601, %599 : vector<16x40xf32>
    %603 = arith.addf %585, %602 : vector<16x40xf32>
    %c58 = arith.constant 58 : index
    %604 = memref.load %arg2[%c58] : memref<160xf32, #tpu.memory_space<smem>>
    %605 = vector.broadcast %604 : f32 to vector<16x40xf32>
    %606 = arith.mulf %605, %599 : vector<16x40xf32>
    %607 = arith.addf %589, %606 : vector<16x40xf32>
    %c98 = arith.constant 98 : index
    %608 = memref.load %arg2[%c98] : memref<160xf32, #tpu.memory_space<smem>>
    %609 = vector.broadcast %608 : f32 to vector<16x40xf32>
    %610 = arith.mulf %609, %599 : vector<16x40xf32>
    %611 = arith.addf %593, %610 : vector<16x40xf32>
    %c138 = arith.constant 138 : index
    %612 = memref.load %arg2[%c138] : memref<160xf32, #tpu.memory_space<smem>>
    %613 = vector.broadcast %612 : f32 to vector<16x40xf32>
    %614 = arith.mulf %613, %599 : vector<16x40xf32>
    %615 = arith.addf %597, %614 : vector<16x40xf32>
    %c2_119 = arith.constant 2 : index
    %c1_120 = arith.constant 1 : index
    %c3_121 = arith.constant 3 : index
    %616 = vector.load %arg6[%c2_119, %c1_120, %c3_121] : memref<4x18x44xf32, #tpu.memory_space<vmem>>, vector<1x16x40xf32>
    %617 = vector.shape_cast %616 : vector<1x16x40xf32> to vector<16x40xf32>
    %c28 = arith.constant 28 : index
    %618 = memref.load %arg2[%c28] : memref<160xf32, #tpu.memory_space<smem>>
    %619 = vector.broadcast %618 : f32 to vector<16x40xf32>
    %620 = arith.mulf %619, %617 : vector<16x40xf32>
    %621 = arith.addf %603, %620 : vector<16x40xf32>
    %c68 = arith.constant 68 : index
    %622 = memref.load %arg2[%c68] : memref<160xf32, #tpu.memory_space<smem>>
    %623 = vector.broadcast %622 : f32 to vector<16x40xf32>
    %624 = arith.mulf %623, %617 : vector<16x40xf32>
    %625 = arith.addf %607, %624 : vector<16x40xf32>
    %c108 = arith.constant 108 : index
    %626 = memref.load %arg2[%c108] : memref<160xf32, #tpu.memory_space<smem>>
    %627 = vector.broadcast %626 : f32 to vector<16x40xf32>
    %628 = arith.mulf %627, %617 : vector<16x40xf32>
    %629 = arith.addf %611, %628 : vector<16x40xf32>
    %c148 = arith.constant 148 : index
    %630 = memref.load %arg2[%c148] : memref<160xf32, #tpu.memory_space<smem>>
    %631 = vector.broadcast %630 : f32 to vector<16x40xf32>
    %632 = arith.mulf %631, %617 : vector<16x40xf32>
    %633 = arith.addf %615, %632 : vector<16x40xf32>
    %c3_122 = arith.constant 3 : index
    %c1_123 = arith.constant 1 : index
    %c3_124 = arith.constant 3 : index
    %634 = vector.load %arg6[%c3_122, %c1_123, %c3_124] : memref<4x18x44xf32, #tpu.memory_space<vmem>>, vector<1x16x40xf32>
    %635 = vector.shape_cast %634 : vector<1x16x40xf32> to vector<16x40xf32>
    %c38 = arith.constant 38 : index
    %636 = memref.load %arg2[%c38] : memref<160xf32, #tpu.memory_space<smem>>
    %637 = vector.broadcast %636 : f32 to vector<16x40xf32>
    %638 = arith.mulf %637, %635 : vector<16x40xf32>
    %639 = arith.addf %621, %638 : vector<16x40xf32>
    %c78 = arith.constant 78 : index
    %640 = memref.load %arg2[%c78] : memref<160xf32, #tpu.memory_space<smem>>
    %641 = vector.broadcast %640 : f32 to vector<16x40xf32>
    %642 = arith.mulf %641, %635 : vector<16x40xf32>
    %643 = arith.addf %625, %642 : vector<16x40xf32>
    %c118 = arith.constant 118 : index
    %644 = memref.load %arg2[%c118] : memref<160xf32, #tpu.memory_space<smem>>
    %645 = vector.broadcast %644 : f32 to vector<16x40xf32>
    %646 = arith.mulf %645, %635 : vector<16x40xf32>
    %647 = arith.addf %629, %646 : vector<16x40xf32>
    %c158 = arith.constant 158 : index
    %648 = memref.load %arg2[%c158] : memref<160xf32, #tpu.memory_space<smem>>
    %649 = vector.broadcast %648 : f32 to vector<16x40xf32>
    %650 = arith.mulf %649, %635 : vector<16x40xf32>
    %651 = arith.addf %633, %650 : vector<16x40xf32>
    %c0_125 = arith.constant 0 : index
    %c1_126 = arith.constant 1 : index
    %c4_127 = arith.constant 4 : index
    %652 = vector.load %arg6[%c0_125, %c1_126, %c4_127] : memref<4x18x44xf32, #tpu.memory_space<vmem>>, vector<1x16x40xf32>
    %653 = vector.shape_cast %652 : vector<1x16x40xf32> to vector<16x40xf32>
    %c9 = arith.constant 9 : index
    %654 = memref.load %arg2[%c9] : memref<160xf32, #tpu.memory_space<smem>>
    %655 = vector.broadcast %654 : f32 to vector<16x40xf32>
    %656 = arith.mulf %655, %653 : vector<16x40xf32>
    %657 = arith.addf %639, %656 : vector<16x40xf32>
    %c49 = arith.constant 49 : index
    %658 = memref.load %arg2[%c49] : memref<160xf32, #tpu.memory_space<smem>>
    %659 = vector.broadcast %658 : f32 to vector<16x40xf32>
    %660 = arith.mulf %659, %653 : vector<16x40xf32>
    %661 = arith.addf %643, %660 : vector<16x40xf32>
    %c89 = arith.constant 89 : index
    %662 = memref.load %arg2[%c89] : memref<160xf32, #tpu.memory_space<smem>>
    %663 = vector.broadcast %662 : f32 to vector<16x40xf32>
    %664 = arith.mulf %663, %653 : vector<16x40xf32>
    %665 = arith.addf %647, %664 : vector<16x40xf32>
    %c129 = arith.constant 129 : index
    %666 = memref.load %arg2[%c129] : memref<160xf32, #tpu.memory_space<smem>>
    %667 = vector.broadcast %666 : f32 to vector<16x40xf32>
    %668 = arith.mulf %667, %653 : vector<16x40xf32>
    %669 = arith.addf %651, %668 : vector<16x40xf32>
    %c1_128 = arith.constant 1 : index
    %c1_129 = arith.constant 1 : index
    %c4_130 = arith.constant 4 : index
    %670 = vector.load %arg6[%c1_128, %c1_129, %c4_130] : memref<4x18x44xf32, #tpu.memory_space<vmem>>, vector<1x16x40xf32>
    %671 = vector.shape_cast %670 : vector<1x16x40xf32> to vector<16x40xf32>
    %c19 = arith.constant 19 : index
    %672 = memref.load %arg2[%c19] : memref<160xf32, #tpu.memory_space<smem>>
    %673 = vector.broadcast %672 : f32 to vector<16x40xf32>
    %674 = arith.mulf %673, %671 : vector<16x40xf32>
    %675 = arith.addf %657, %674 : vector<16x40xf32>
    %c59 = arith.constant 59 : index
    %676 = memref.load %arg2[%c59] : memref<160xf32, #tpu.memory_space<smem>>
    %677 = vector.broadcast %676 : f32 to vector<16x40xf32>
    %678 = arith.mulf %677, %671 : vector<16x40xf32>
    %679 = arith.addf %661, %678 : vector<16x40xf32>
    %c99 = arith.constant 99 : index
    %680 = memref.load %arg2[%c99] : memref<160xf32, #tpu.memory_space<smem>>
    %681 = vector.broadcast %680 : f32 to vector<16x40xf32>
    %682 = arith.mulf %681, %671 : vector<16x40xf32>
    %683 = arith.addf %665, %682 : vector<16x40xf32>
    %c139 = arith.constant 139 : index
    %684 = memref.load %arg2[%c139] : memref<160xf32, #tpu.memory_space<smem>>
    %685 = vector.broadcast %684 : f32 to vector<16x40xf32>
    %686 = arith.mulf %685, %671 : vector<16x40xf32>
    %687 = arith.addf %669, %686 : vector<16x40xf32>
    %c2_131 = arith.constant 2 : index
    %c1_132 = arith.constant 1 : index
    %c4_133 = arith.constant 4 : index
    %688 = vector.load %arg6[%c2_131, %c1_132, %c4_133] : memref<4x18x44xf32, #tpu.memory_space<vmem>>, vector<1x16x40xf32>
    %689 = vector.shape_cast %688 : vector<1x16x40xf32> to vector<16x40xf32>
    %c29 = arith.constant 29 : index
    %690 = memref.load %arg2[%c29] : memref<160xf32, #tpu.memory_space<smem>>
    %691 = vector.broadcast %690 : f32 to vector<16x40xf32>
    %692 = arith.mulf %691, %689 : vector<16x40xf32>
    %693 = arith.addf %675, %692 : vector<16x40xf32>
    %c69 = arith.constant 69 : index
    %694 = memref.load %arg2[%c69] : memref<160xf32, #tpu.memory_space<smem>>
    %695 = vector.broadcast %694 : f32 to vector<16x40xf32>
    %696 = arith.mulf %695, %689 : vector<16x40xf32>
    %697 = arith.addf %679, %696 : vector<16x40xf32>
    %c109 = arith.constant 109 : index
    %698 = memref.load %arg2[%c109] : memref<160xf32, #tpu.memory_space<smem>>
    %699 = vector.broadcast %698 : f32 to vector<16x40xf32>
    %700 = arith.mulf %699, %689 : vector<16x40xf32>
    %701 = arith.addf %683, %700 : vector<16x40xf32>
    %c149 = arith.constant 149 : index
    %702 = memref.load %arg2[%c149] : memref<160xf32, #tpu.memory_space<smem>>
    %703 = vector.broadcast %702 : f32 to vector<16x40xf32>
    %704 = arith.mulf %703, %689 : vector<16x40xf32>
    %705 = arith.addf %687, %704 : vector<16x40xf32>
    %c3_134 = arith.constant 3 : index
    %c1_135 = arith.constant 1 : index
    %c4_136 = arith.constant 4 : index
    %706 = vector.load %arg6[%c3_134, %c1_135, %c4_136] : memref<4x18x44xf32, #tpu.memory_space<vmem>>, vector<1x16x40xf32>
    %707 = vector.shape_cast %706 : vector<1x16x40xf32> to vector<16x40xf32>
    %c39 = arith.constant 39 : index
    %708 = memref.load %arg2[%c39] : memref<160xf32, #tpu.memory_space<smem>>
    %709 = vector.broadcast %708 : f32 to vector<16x40xf32>
    %710 = arith.mulf %709, %707 : vector<16x40xf32>
    %711 = arith.addf %693, %710 : vector<16x40xf32>
    %c79 = arith.constant 79 : index
    %712 = memref.load %arg2[%c79] : memref<160xf32, #tpu.memory_space<smem>>
    %713 = vector.broadcast %712 : f32 to vector<16x40xf32>
    %714 = arith.mulf %713, %707 : vector<16x40xf32>
    %715 = arith.addf %697, %714 : vector<16x40xf32>
    %c119 = arith.constant 119 : index
    %716 = memref.load %arg2[%c119] : memref<160xf32, #tpu.memory_space<smem>>
    %717 = vector.broadcast %716 : f32 to vector<16x40xf32>
    %718 = arith.mulf %717, %707 : vector<16x40xf32>
    %719 = arith.addf %701, %718 : vector<16x40xf32>
    %c159 = arith.constant 159 : index
    %720 = memref.load %arg2[%c159] : memref<160xf32, #tpu.memory_space<smem>>
    %721 = vector.broadcast %720 : f32 to vector<16x40xf32>
    %722 = arith.mulf %721, %707 : vector<16x40xf32>
    %723 = arith.addf %705, %722 : vector<16x40xf32>
    %c0_137 = arith.constant 0 : index
    %c2_138 = arith.constant 2 : index
    %c0_139 = arith.constant 0 : index
    %724 = vector.load %arg6[%c0_137, %c2_138, %c0_139] : memref<4x18x44xf32, #tpu.memory_space<vmem>>, vector<1x16x40xf32>
    %725 = vector.shape_cast %724 : vector<1x16x40xf32> to vector<16x40xf32>
    %c0_140 = arith.constant 0 : index
    %726 = memref.load %arg3[%c0_140] : memref<48xf32, #tpu.memory_space<smem>>
    %727 = vector.broadcast %726 : f32 to vector<16x40xf32>
    %728 = arith.mulf %727, %725 : vector<16x40xf32>
    %729 = arith.addf %711, %728 : vector<16x40xf32>
    %c12_141 = arith.constant 12 : index
    %730 = memref.load %arg3[%c12_141] : memref<48xf32, #tpu.memory_space<smem>>
    %731 = vector.broadcast %730 : f32 to vector<16x40xf32>
    %732 = arith.mulf %731, %725 : vector<16x40xf32>
    %733 = arith.addf %715, %732 : vector<16x40xf32>
    %c24_142 = arith.constant 24 : index
    %734 = memref.load %arg3[%c24_142] : memref<48xf32, #tpu.memory_space<smem>>
    %735 = vector.broadcast %734 : f32 to vector<16x40xf32>
    %736 = arith.mulf %735, %725 : vector<16x40xf32>
    %737 = arith.addf %719, %736 : vector<16x40xf32>
    %c36_143 = arith.constant 36 : index
    %738 = memref.load %arg3[%c36_143] : memref<48xf32, #tpu.memory_space<smem>>
    %739 = vector.broadcast %738 : f32 to vector<16x40xf32>
    %740 = arith.mulf %739, %725 : vector<16x40xf32>
    %741 = arith.addf %723, %740 : vector<16x40xf32>
    %c1_144 = arith.constant 1 : index
    %c2_145 = arith.constant 2 : index
    %c0_146 = arith.constant 0 : index
    %742 = vector.load %arg6[%c1_144, %c2_145, %c0_146] : memref<4x18x44xf32, #tpu.memory_space<vmem>>, vector<1x16x40xf32>
    %743 = vector.shape_cast %742 : vector<1x16x40xf32> to vector<16x40xf32>
    %c3_147 = arith.constant 3 : index
    %744 = memref.load %arg3[%c3_147] : memref<48xf32, #tpu.memory_space<smem>>
    %745 = vector.broadcast %744 : f32 to vector<16x40xf32>
    %746 = arith.mulf %745, %743 : vector<16x40xf32>
    %747 = arith.addf %729, %746 : vector<16x40xf32>
    %c15_148 = arith.constant 15 : index
    %748 = memref.load %arg3[%c15_148] : memref<48xf32, #tpu.memory_space<smem>>
    %749 = vector.broadcast %748 : f32 to vector<16x40xf32>
    %750 = arith.mulf %749, %743 : vector<16x40xf32>
    %751 = arith.addf %733, %750 : vector<16x40xf32>
    %c27_149 = arith.constant 27 : index
    %752 = memref.load %arg3[%c27_149] : memref<48xf32, #tpu.memory_space<smem>>
    %753 = vector.broadcast %752 : f32 to vector<16x40xf32>
    %754 = arith.mulf %753, %743 : vector<16x40xf32>
    %755 = arith.addf %737, %754 : vector<16x40xf32>
    %c39_150 = arith.constant 39 : index
    %756 = memref.load %arg3[%c39_150] : memref<48xf32, #tpu.memory_space<smem>>
    %757 = vector.broadcast %756 : f32 to vector<16x40xf32>
    %758 = arith.mulf %757, %743 : vector<16x40xf32>
    %759 = arith.addf %741, %758 : vector<16x40xf32>
    %c2_151 = arith.constant 2 : index
    %c2_152 = arith.constant 2 : index
    %c0_153 = arith.constant 0 : index
    %760 = vector.load %arg6[%c2_151, %c2_152, %c0_153] : memref<4x18x44xf32, #tpu.memory_space<vmem>>, vector<1x16x40xf32>
    %761 = vector.shape_cast %760 : vector<1x16x40xf32> to vector<16x40xf32>
    %c6_154 = arith.constant 6 : index
    %762 = memref.load %arg3[%c6_154] : memref<48xf32, #tpu.memory_space<smem>>
    %763 = vector.broadcast %762 : f32 to vector<16x40xf32>
    %764 = arith.mulf %763, %761 : vector<16x40xf32>
    %765 = arith.addf %747, %764 : vector<16x40xf32>
    %c18_155 = arith.constant 18 : index
    %766 = memref.load %arg3[%c18_155] : memref<48xf32, #tpu.memory_space<smem>>
    %767 = vector.broadcast %766 : f32 to vector<16x40xf32>
    %768 = arith.mulf %767, %761 : vector<16x40xf32>
    %769 = arith.addf %751, %768 : vector<16x40xf32>
    %c30_156 = arith.constant 30 : index
    %770 = memref.load %arg3[%c30_156] : memref<48xf32, #tpu.memory_space<smem>>
    %771 = vector.broadcast %770 : f32 to vector<16x40xf32>
    %772 = arith.mulf %771, %761 : vector<16x40xf32>
    %773 = arith.addf %755, %772 : vector<16x40xf32>
    %c42_157 = arith.constant 42 : index
    %774 = memref.load %arg3[%c42_157] : memref<48xf32, #tpu.memory_space<smem>>
    %775 = vector.broadcast %774 : f32 to vector<16x40xf32>
    %776 = arith.mulf %775, %761 : vector<16x40xf32>
    %777 = arith.addf %759, %776 : vector<16x40xf32>
    %c3_158 = arith.constant 3 : index
    %c2_159 = arith.constant 2 : index
    %c0_160 = arith.constant 0 : index
    %778 = vector.load %arg6[%c3_158, %c2_159, %c0_160] : memref<4x18x44xf32, #tpu.memory_space<vmem>>, vector<1x16x40xf32>
    %779 = vector.shape_cast %778 : vector<1x16x40xf32> to vector<16x40xf32>
    %c9_161 = arith.constant 9 : index
    %780 = memref.load %arg3[%c9_161] : memref<48xf32, #tpu.memory_space<smem>>
    %781 = vector.broadcast %780 : f32 to vector<16x40xf32>
    %782 = arith.mulf %781, %779 : vector<16x40xf32>
    %783 = arith.addf %765, %782 : vector<16x40xf32>
    %c21_162 = arith.constant 21 : index
    %784 = memref.load %arg3[%c21_162] : memref<48xf32, #tpu.memory_space<smem>>
    %785 = vector.broadcast %784 : f32 to vector<16x40xf32>
    %786 = arith.mulf %785, %779 : vector<16x40xf32>
    %787 = arith.addf %769, %786 : vector<16x40xf32>
    %c33_163 = arith.constant 33 : index
    %788 = memref.load %arg3[%c33_163] : memref<48xf32, #tpu.memory_space<smem>>
    %789 = vector.broadcast %788 : f32 to vector<16x40xf32>
    %790 = arith.mulf %789, %779 : vector<16x40xf32>
    %791 = arith.addf %773, %790 : vector<16x40xf32>
    %c45_164 = arith.constant 45 : index
    %792 = memref.load %arg3[%c45_164] : memref<48xf32, #tpu.memory_space<smem>>
    %793 = vector.broadcast %792 : f32 to vector<16x40xf32>
    %794 = arith.mulf %793, %779 : vector<16x40xf32>
    %795 = arith.addf %777, %794 : vector<16x40xf32>
    %c0_165 = arith.constant 0 : index
    %c2_166 = arith.constant 2 : index
    %c1_167 = arith.constant 1 : index
    %796 = vector.load %arg6[%c0_165, %c2_166, %c1_167] : memref<4x18x44xf32, #tpu.memory_space<vmem>>, vector<1x16x40xf32>
    %797 = vector.shape_cast %796 : vector<1x16x40xf32> to vector<16x40xf32>
    %c1_168 = arith.constant 1 : index
    %798 = memref.load %arg3[%c1_168] : memref<48xf32, #tpu.memory_space<smem>>
    %799 = vector.broadcast %798 : f32 to vector<16x40xf32>
    %800 = arith.mulf %799, %797 : vector<16x40xf32>
    %801 = arith.addf %783, %800 : vector<16x40xf32>
    %c13_169 = arith.constant 13 : index
    %802 = memref.load %arg3[%c13_169] : memref<48xf32, #tpu.memory_space<smem>>
    %803 = vector.broadcast %802 : f32 to vector<16x40xf32>
    %804 = arith.mulf %803, %797 : vector<16x40xf32>
    %805 = arith.addf %787, %804 : vector<16x40xf32>
    %c25_170 = arith.constant 25 : index
    %806 = memref.load %arg3[%c25_170] : memref<48xf32, #tpu.memory_space<smem>>
    %807 = vector.broadcast %806 : f32 to vector<16x40xf32>
    %808 = arith.mulf %807, %797 : vector<16x40xf32>
    %809 = arith.addf %791, %808 : vector<16x40xf32>
    %c37_171 = arith.constant 37 : index
    %810 = memref.load %arg3[%c37_171] : memref<48xf32, #tpu.memory_space<smem>>
    %811 = vector.broadcast %810 : f32 to vector<16x40xf32>
    %812 = arith.mulf %811, %797 : vector<16x40xf32>
    %813 = arith.addf %795, %812 : vector<16x40xf32>
    %c1_172 = arith.constant 1 : index
    %c2_173 = arith.constant 2 : index
    %c1_174 = arith.constant 1 : index
    %814 = vector.load %arg6[%c1_172, %c2_173, %c1_174] : memref<4x18x44xf32, #tpu.memory_space<vmem>>, vector<1x16x40xf32>
    %815 = vector.shape_cast %814 : vector<1x16x40xf32> to vector<16x40xf32>
    %c4_175 = arith.constant 4 : index
    %816 = memref.load %arg3[%c4_175] : memref<48xf32, #tpu.memory_space<smem>>
    %817 = vector.broadcast %816 : f32 to vector<16x40xf32>
    %818 = arith.mulf %817, %815 : vector<16x40xf32>
    %819 = arith.addf %801, %818 : vector<16x40xf32>
    %c16_176 = arith.constant 16 : index
    %820 = memref.load %arg3[%c16_176] : memref<48xf32, #tpu.memory_space<smem>>
    %821 = vector.broadcast %820 : f32 to vector<16x40xf32>
    %822 = arith.mulf %821, %815 : vector<16x40xf32>
    %823 = arith.addf %805, %822 : vector<16x40xf32>
    %c28_177 = arith.constant 28 : index
    %824 = memref.load %arg3[%c28_177] : memref<48xf32, #tpu.memory_space<smem>>
    %825 = vector.broadcast %824 : f32 to vector<16x40xf32>
    %826 = arith.mulf %825, %815 : vector<16x40xf32>
    %827 = arith.addf %809, %826 : vector<16x40xf32>
    %c40_178 = arith.constant 40 : index
    %828 = memref.load %arg3[%c40_178] : memref<48xf32, #tpu.memory_space<smem>>
    %829 = vector.broadcast %828 : f32 to vector<16x40xf32>
    %830 = arith.mulf %829, %815 : vector<16x40xf32>
    %831 = arith.addf %813, %830 : vector<16x40xf32>
    %c2_179 = arith.constant 2 : index
    %c2_180 = arith.constant 2 : index
    %c1_181 = arith.constant 1 : index
    %832 = vector.load %arg6[%c2_179, %c2_180, %c1_181] : memref<4x18x44xf32, #tpu.memory_space<vmem>>, vector<1x16x40xf32>
    %833 = vector.shape_cast %832 : vector<1x16x40xf32> to vector<16x40xf32>
    %c7_182 = arith.constant 7 : index
    %834 = memref.load %arg3[%c7_182] : memref<48xf32, #tpu.memory_space<smem>>
    %835 = vector.broadcast %834 : f32 to vector<16x40xf32>
    %836 = arith.mulf %835, %833 : vector<16x40xf32>
    %837 = arith.addf %819, %836 : vector<16x40xf32>
    %c19_183 = arith.constant 19 : index
    %838 = memref.load %arg3[%c19_183] : memref<48xf32, #tpu.memory_space<smem>>
    %839 = vector.broadcast %838 : f32 to vector<16x40xf32>
    %840 = arith.mulf %839, %833 : vector<16x40xf32>
    %841 = arith.addf %823, %840 : vector<16x40xf32>
    %c31_184 = arith.constant 31 : index
    %842 = memref.load %arg3[%c31_184] : memref<48xf32, #tpu.memory_space<smem>>
    %843 = vector.broadcast %842 : f32 to vector<16x40xf32>
    %844 = arith.mulf %843, %833 : vector<16x40xf32>
    %845 = arith.addf %827, %844 : vector<16x40xf32>
    %c43_185 = arith.constant 43 : index
    %846 = memref.load %arg3[%c43_185] : memref<48xf32, #tpu.memory_space<smem>>
    %847 = vector.broadcast %846 : f32 to vector<16x40xf32>
    %848 = arith.mulf %847, %833 : vector<16x40xf32>
    %849 = arith.addf %831, %848 : vector<16x40xf32>
    %c3_186 = arith.constant 3 : index
    %c2_187 = arith.constant 2 : index
    %c1_188 = arith.constant 1 : index
    %850 = vector.load %arg6[%c3_186, %c2_187, %c1_188] : memref<4x18x44xf32, #tpu.memory_space<vmem>>, vector<1x16x40xf32>
    %851 = vector.shape_cast %850 : vector<1x16x40xf32> to vector<16x40xf32>
    %c10_189 = arith.constant 10 : index
    %852 = memref.load %arg3[%c10_189] : memref<48xf32, #tpu.memory_space<smem>>
    %853 = vector.broadcast %852 : f32 to vector<16x40xf32>
    %854 = arith.mulf %853, %851 : vector<16x40xf32>
    %855 = arith.addf %837, %854 : vector<16x40xf32>
    %c22_190 = arith.constant 22 : index
    %856 = memref.load %arg3[%c22_190] : memref<48xf32, #tpu.memory_space<smem>>
    %857 = vector.broadcast %856 : f32 to vector<16x40xf32>
    %858 = arith.mulf %857, %851 : vector<16x40xf32>
    %859 = arith.addf %841, %858 : vector<16x40xf32>
    %c34_191 = arith.constant 34 : index
    %860 = memref.load %arg3[%c34_191] : memref<48xf32, #tpu.memory_space<smem>>
    %861 = vector.broadcast %860 : f32 to vector<16x40xf32>
    %862 = arith.mulf %861, %851 : vector<16x40xf32>
    %863 = arith.addf %845, %862 : vector<16x40xf32>
    %c46_192 = arith.constant 46 : index
    %864 = memref.load %arg3[%c46_192] : memref<48xf32, #tpu.memory_space<smem>>
    %865 = vector.broadcast %864 : f32 to vector<16x40xf32>
    %866 = arith.mulf %865, %851 : vector<16x40xf32>
    %867 = arith.addf %849, %866 : vector<16x40xf32>
    %c0_193 = arith.constant 0 : index
    %c2_194 = arith.constant 2 : index
    %c2_195 = arith.constant 2 : index
    %868 = vector.load %arg6[%c0_193, %c2_194, %c2_195] : memref<4x18x44xf32, #tpu.memory_space<vmem>>, vector<1x16x40xf32>
    %869 = vector.shape_cast %868 : vector<1x16x40xf32> to vector<16x40xf32>
    %c2_196 = arith.constant 2 : index
    %870 = memref.load %arg3[%c2_196] : memref<48xf32, #tpu.memory_space<smem>>
    %871 = vector.broadcast %870 : f32 to vector<16x40xf32>
    %872 = arith.mulf %871, %869 : vector<16x40xf32>
    %873 = arith.addf %855, %872 : vector<16x40xf32>
    %c14_197 = arith.constant 14 : index
    %874 = memref.load %arg3[%c14_197] : memref<48xf32, #tpu.memory_space<smem>>
    %875 = vector.broadcast %874 : f32 to vector<16x40xf32>
    %876 = arith.mulf %875, %869 : vector<16x40xf32>
    %877 = arith.addf %859, %876 : vector<16x40xf32>
    %c26_198 = arith.constant 26 : index
    %878 = memref.load %arg3[%c26_198] : memref<48xf32, #tpu.memory_space<smem>>
    %879 = vector.broadcast %878 : f32 to vector<16x40xf32>
    %880 = arith.mulf %879, %869 : vector<16x40xf32>
    %881 = arith.addf %863, %880 : vector<16x40xf32>
    %c38_199 = arith.constant 38 : index
    %882 = memref.load %arg3[%c38_199] : memref<48xf32, #tpu.memory_space<smem>>
    %883 = vector.broadcast %882 : f32 to vector<16x40xf32>
    %884 = arith.mulf %883, %869 : vector<16x40xf32>
    %885 = arith.addf %867, %884 : vector<16x40xf32>
    %c1_200 = arith.constant 1 : index
    %c2_201 = arith.constant 2 : index
    %c2_202 = arith.constant 2 : index
    %886 = vector.load %arg6[%c1_200, %c2_201, %c2_202] : memref<4x18x44xf32, #tpu.memory_space<vmem>>, vector<1x16x40xf32>
    %887 = vector.shape_cast %886 : vector<1x16x40xf32> to vector<16x40xf32>
    %c5_203 = arith.constant 5 : index
    %888 = memref.load %arg3[%c5_203] : memref<48xf32, #tpu.memory_space<smem>>
    %889 = vector.broadcast %888 : f32 to vector<16x40xf32>
    %890 = arith.mulf %889, %887 : vector<16x40xf32>
    %891 = arith.addf %873, %890 : vector<16x40xf32>
    %c17_204 = arith.constant 17 : index
    %892 = memref.load %arg3[%c17_204] : memref<48xf32, #tpu.memory_space<smem>>
    %893 = vector.broadcast %892 : f32 to vector<16x40xf32>
    %894 = arith.mulf %893, %887 : vector<16x40xf32>
    %895 = arith.addf %877, %894 : vector<16x40xf32>
    %c29_205 = arith.constant 29 : index
    %896 = memref.load %arg3[%c29_205] : memref<48xf32, #tpu.memory_space<smem>>
    %897 = vector.broadcast %896 : f32 to vector<16x40xf32>
    %898 = arith.mulf %897, %887 : vector<16x40xf32>
    %899 = arith.addf %881, %898 : vector<16x40xf32>
    %c41_206 = arith.constant 41 : index
    %900 = memref.load %arg3[%c41_206] : memref<48xf32, #tpu.memory_space<smem>>
    %901 = vector.broadcast %900 : f32 to vector<16x40xf32>
    %902 = arith.mulf %901, %887 : vector<16x40xf32>
    %903 = arith.addf %885, %902 : vector<16x40xf32>
    %c2_207 = arith.constant 2 : index
    %c2_208 = arith.constant 2 : index
    %c2_209 = arith.constant 2 : index
    %904 = vector.load %arg6[%c2_207, %c2_208, %c2_209] : memref<4x18x44xf32, #tpu.memory_space<vmem>>, vector<1x16x40xf32>
    %905 = vector.shape_cast %904 : vector<1x16x40xf32> to vector<16x40xf32>
    %c8_210 = arith.constant 8 : index
    %906 = memref.load %arg3[%c8_210] : memref<48xf32, #tpu.memory_space<smem>>
    %907 = vector.broadcast %906 : f32 to vector<16x40xf32>
    %908 = arith.mulf %907, %905 : vector<16x40xf32>
    %909 = arith.addf %891, %908 : vector<16x40xf32>
    %c20_211 = arith.constant 20 : index
    %910 = memref.load %arg3[%c20_211] : memref<48xf32, #tpu.memory_space<smem>>
    %911 = vector.broadcast %910 : f32 to vector<16x40xf32>
    %912 = arith.mulf %911, %905 : vector<16x40xf32>
    %913 = arith.addf %895, %912 : vector<16x40xf32>
    %c32_212 = arith.constant 32 : index
    %914 = memref.load %arg3[%c32_212] : memref<48xf32, #tpu.memory_space<smem>>
    %915 = vector.broadcast %914 : f32 to vector<16x40xf32>
    %916 = arith.mulf %915, %905 : vector<16x40xf32>
    %917 = arith.addf %899, %916 : vector<16x40xf32>
    %c44_213 = arith.constant 44 : index
    %918 = memref.load %arg3[%c44_213] : memref<48xf32, #tpu.memory_space<smem>>
    %919 = vector.broadcast %918 : f32 to vector<16x40xf32>
    %920 = arith.mulf %919, %905 : vector<16x40xf32>
    %921 = arith.addf %903, %920 : vector<16x40xf32>
    %c3_214 = arith.constant 3 : index
    %c2_215 = arith.constant 2 : index
    %c2_216 = arith.constant 2 : index
    %922 = vector.load %arg6[%c3_214, %c2_215, %c2_216] : memref<4x18x44xf32, #tpu.memory_space<vmem>>, vector<1x16x40xf32>
    %923 = vector.shape_cast %922 : vector<1x16x40xf32> to vector<16x40xf32>
    %c11_217 = arith.constant 11 : index
    %924 = memref.load %arg3[%c11_217] : memref<48xf32, #tpu.memory_space<smem>>
    %925 = vector.broadcast %924 : f32 to vector<16x40xf32>
    %926 = arith.mulf %925, %923 : vector<16x40xf32>
    %927 = arith.addf %909, %926 : vector<16x40xf32>
    %c23_218 = arith.constant 23 : index
    %928 = memref.load %arg3[%c23_218] : memref<48xf32, #tpu.memory_space<smem>>
    %929 = vector.broadcast %928 : f32 to vector<16x40xf32>
    %930 = arith.mulf %929, %923 : vector<16x40xf32>
    %931 = arith.addf %913, %930 : vector<16x40xf32>
    %c35_219 = arith.constant 35 : index
    %932 = memref.load %arg3[%c35_219] : memref<48xf32, #tpu.memory_space<smem>>
    %933 = vector.broadcast %932 : f32 to vector<16x40xf32>
    %934 = arith.mulf %933, %923 : vector<16x40xf32>
    %935 = arith.addf %917, %934 : vector<16x40xf32>
    %c47_220 = arith.constant 47 : index
    %936 = memref.load %arg3[%c47_220] : memref<48xf32, #tpu.memory_space<smem>>
    %937 = vector.broadcast %936 : f32 to vector<16x40xf32>
    %938 = arith.mulf %937, %923 : vector<16x40xf32>
    %939 = arith.addf %921, %938 : vector<16x40xf32>
    %c0_221 = arith.constant 0 : index
    %940 = memref.load %arg4[%c0_221] : memref<4xf32, #tpu.memory_space<smem>>
    %941 = vector.broadcast %940 : f32 to vector<16x40xf32>
    %942 = arith.addf %927, %941 : vector<16x40xf32>
    %c0_222 = arith.constant 0 : index
    %c0_223 = arith.constant 0 : index
    %c0_224 = arith.constant 0 : index
    %c0_225 = arith.constant 0 : index
    %943 = vector.load %arg5[%c0_222, %c0_223, %c0_224, %c0_225] : memref<1x4x16x40xf32, #tpu.memory_space<vmem>>, vector<1x1x16x40xf32>
    %944 = vector.shape_cast %943 : vector<1x1x16x40xf32> to vector<16x40xf32>
    %945 = vector.shape_cast %942 : vector<16x40xf32> to vector<1x1x16x40xf32>
    tpu.vector_store %arg5[%c0_222, %c0_223, %c0_224, %c0_225], %945 {strides = array<i32>} : memref<1x4x16x40xf32, #tpu.memory_space<vmem>>, vector<1x1x16x40xf32>,
    %c1_226 = arith.constant 1 : index
    %946 = memref.load %arg4[%c1_226] : memref<4xf32, #tpu.memory_space<smem>>
    %947 = vector.broadcast %946 : f32 to vector<16x40xf32>
    %948 = arith.addf %931, %947 : vector<16x40xf32>
    %c0_227 = arith.constant 0 : index
    %c1_228 = arith.constant 1 : index
    %c0_229 = arith.constant 0 : index
    %c0_230 = arith.constant 0 : index
    %949 = vector.load %arg5[%c0_227, %c1_228, %c0_229, %c0_230] : memref<1x4x16x40xf32, #tpu.memory_space<vmem>>, vector<1x1x16x40xf32>
    %950 = vector.shape_cast %949 : vector<1x1x16x40xf32> to vector<16x40xf32>
    %951 = vector.shape_cast %948 : vector<16x40xf32> to vector<1x1x16x40xf32>
    tpu.vector_store %arg5[%c0_227, %c1_228, %c0_229, %c0_230], %951 {strides = array<i32>} : memref<1x4x16x40xf32, #tpu.memory_space<vmem>>, vector<1x1x16x40xf32>,
    %c2_231 = arith.constant 2 : index
    %952 = memref.load %arg4[%c2_231] : memref<4xf32, #tpu.memory_space<smem>>
    %953 = vector.broadcast %952 : f32 to vector<16x40xf32>
    %954 = arith.addf %935, %953 : vector<16x40xf32>
    %c0_232 = arith.constant 0 : index
    %c2_233 = arith.constant 2 : index
    %c0_234 = arith.constant 0 : index
    %c0_235 = arith.constant 0 : index
    %955 = vector.load %arg5[%c0_232, %c2_233, %c0_234, %c0_235] : memref<1x4x16x40xf32, #tpu.memory_space<vmem>>, vector<1x1x16x40xf32>
    %956 = vector.shape_cast %955 : vector<1x1x16x40xf32> to vector<16x40xf32>
    %957 = vector.shape_cast %954 : vector<16x40xf32> to vector<1x1x16x40xf32>
    tpu.vector_store %arg5[%c0_232, %c2_233, %c0_234, %c0_235], %957 {strides = array<i32>} : memref<1x4x16x40xf32, #tpu.memory_space<vmem>>, vector<1x1x16x40xf32>,
    %c3_236 = arith.constant 3 : index
    %958 = memref.load %arg4[%c3_236] : memref<4xf32, #tpu.memory_space<smem>>
    %959 = vector.broadcast %958 : f32 to vector<16x40xf32>
    %960 = arith.addf %939, %959 : vector<16x40xf32>
    %c0_237 = arith.constant 0 : index
    %c3_238 = arith.constant 3 : index
    %c0_239 = arith.constant 0 : index
    %c0_240 = arith.constant 0 : index
    %961 = vector.load %arg5[%c0_237, %c3_238, %c0_239, %c0_240] : memref<1x4x16x40xf32, #tpu.memory_space<vmem>>, vector<1x1x16x40xf32>
    %962 = vector.shape_cast %961 : vector<1x1x16x40xf32> to vector<16x40xf32>
    %963 = vector.shape_cast %960 : vector<16x40xf32> to vector<1x1x16x40xf32>
    tpu.vector_store %arg5[%c0_237, %c3_238, %c0_239, %c0_240], %963 {strides = array<i32>} : memref<1x4x16x40xf32, #tpu.memory_space<vmem>>, vector<1x1x16x40xf32>,
    return
  }
  func.func @transform_0(%arg0: i32) -> (i32, i32, i32, i32) {
    %c0_i32 = arith.constant 0 : i32
    %c0_i32_0 = arith.constant 0 : i32
    %c0_i32_1 = arith.constant 0 : i32
    %c0_i32_2 = arith.constant 0 : i32
    return %arg0, %c0_i32, %c0_i32_0, %c0_i32_1 : i32, i32, i32, i32
  }
  func.func @transform_1(%arg0: i32) -> i32 {
    %c0_i32 = arith.constant 0 : i32
    %c0_i32_0 = arith.constant 0 : i32
    return %c0_i32 : i32
  }
  func.func @transform_2(%arg0: i32) -> i32 {
    %c0_i32 = arith.constant 0 : i32
    %c0_i32_0 = arith.constant 0 : i32
    return %c0_i32 : i32
  }
  func.func @transform_3(%arg0: i32) -> i32 {
    %c0_i32 = arith.constant 0 : i32
    %c0_i32_0 = arith.constant 0 : i32
    return %c0_i32 : i32
  }
  func.func @transform_4(%arg0: i32) -> (i32, i32, i32, i32) {
    %c0_i32 = arith.constant 0 : i32
    %c0_i32_0 = arith.constant 0 : i32
    %c0_i32_1 = arith.constant 0 : i32
    %c0_i32_2 = arith.constant 0 : i32
    return %arg0, %c0_i32, %c0_i32_0, %c0_i32_1 : i32, i32, i32, i32
  }
}

</mosaic_0001>

<bundles_post_ra>
// kernel: tpu_custom_call.1
= control target key start
LH: loop header
LB: loop body
LE: loop exit
PB: predicated region body
PF: predicated region fallthrough
CT: control target
= control target key end

     0   :  { %9 = vsyncpa [#allocation4], 0  ;;  %s5229_s0 = inlined_call_operand.hbm [shape: f32[2,4,16,16], index: 0, kind: input, shape index: {}]   ;;  %s5230_s1 = inlined_call_operand.vmem [shape: f32[160], index: 1, kind: input, shape index: {}]   ;;  %s5231_s2 = inlined_call_operand.vmem [shape: f32[48], index: 2, kind: input, shape index: {}]   ;;  %s5232_s3 = inlined_call_operand.vmem [shape: f32[4], index: 3, kind: input, shape index: {}]   ;;  %s5233_s4 = inlined_call_operand.hbm [shape: f32[1,4,16,40], index: 4, kind: output, shape index: {}]  }
   0x1   :  { %10 = vsyncpa [#allocation6], 0 }
   0x2   :  { %11 = vsyncpa [#allocation9], 0  ;;  %s41_s17 = sshll.u32 %s5231_s2, 4  ;;  %s42_s17 = int_to_ptr.vmem [resolvable:$true] %s41_s17 }
   0x3   :  { %12 = vsyncpa [#allocation5], 0  ;;  %s3006_s18 = scalar_lea.vmem %s42_s17, 16  ;;  %p3011_p1 = scmp.lt.s32.totalorder %s42_s17, %s42_s17 }
   0x4   :  { %p3007_p0 = scmp.ne.s32.totalorder %s42_s17, %s3006_s18  ;;  %p3012_p2 = scmp.lt.s32.totalorder %s3006_s18, %s3006_s18 }
   0x6   :  { %p3013_p3 = por %p3012_p2, %p3011_p1 }
   0x8   :  { %p3014_p4 = pnand %p3013_p3, %p3007_p0 }
   0xa   :  { %3017 = shalt.err (!%p3014_p4)
}
   0xb   :  { %s3094_s19 = smov [#allocation8]   ;;  %s3095_s20 = smov [#allocation3]  }
   0xc   :  { %44 = dma.vmem_to_smem %s42_s17, 16, %s3094_s19, [#allocation9]  }
   0xd   :  { %s18_s21 = sshll.u32 %s3095_s20, 4  ;;  %s3018_s24 = scalar_lea.hbm %s5229_s0, 2048  ;;  %s19_s21 = int_to_ptr.vmem [resolvable:$true] %s18_s21 }
   0xe   :  { %p3019_p5 = scmp.ne.s32.totalorder %s5229_s0, %s3018_s24  ;;  %p3022_p6 = scmp.lt.u32.totalorder %s3018_s24, %s5229_s0 }
  0x10   :  { %p3024_p7 = pnand %p3022_p6, %p3019_p5 }
  0x12   :  { %3027 = shalt.err (!%p3024_p7)
}
  0x13   :  { %s3028_s28 = scalar_lea.vmem %s19_s21, 2048  ;;  %p3033_p9 = scmp.lt.s32.totalorder %s19_s21, %s19_s21 }
  0x14   :  { %p3029_p8 = scmp.ne.s32.totalorder %s19_s21, %s3028_s28  ;;  %p3034_p10 = scmp.lt.s32.totalorder %s3028_s28, %s3028_s28 }
  0x16   :  { %p3035_p11 = por %p3034_p10, %p3033_p9 }
  0x18   :  { %p3036_p12 = pnand %p3035_p11, %p3029_p8 }
  0x1a   :  { %3039 = shalt.err (!%p3036_p12)
}
  0x1b   :  { %s3096_s29 = smov 128   ;;  %s3097_s30 = smov 8  }
  0x1c   :  { %24 = dma.hbm_to_vmem [thread:$0]  %s5229_s0, 2048, %s19_s21, [#allocation4], %s3096_s29, %s3096_s29, %s3097_s30  }
  0x1d   :  { %s31_s9 = sshll.u32 %s5230_s1, 4  ;;  %s51_s12 = sshll.u32 %s5232_s3, 4  ;;  %s32_s9 = int_to_ptr.vmem [resolvable:$true] %s31_s9  ;;  %s52_s12 = int_to_ptr.vmem [resolvable:$true] %s51_s12 }
  0x1e   :  { %s3040_s13 = scalar_lea.vmem %s32_s9, 32  ;;  %p3045_p0 = scmp.lt.s32.totalorder %s32_s9, %s32_s9 }
  0x1f   :  { %p3041_p13 = scmp.ne.s32.totalorder %s32_s9, %s3040_s13  ;;  %p3046_p1 = scmp.lt.s32.totalorder %s3040_s13, %s3040_s13 }
  0x21   :  { %p3047_p2 = por %p3046_p1, %p3045_p0 }
  0x23   :  { %p3048_p3 = pnand %p3047_p2, %p3041_p13 }
  0x25   :  { %3051 = shalt.err (!%p3048_p3)
}
  0x26   :  { %s3098_s14 = smov [#allocation7]   ;;  %s3052_s0 = scalar_lea.vmem %s52_s12, 16 }
  0x27   :  { %34 = dma.vmem_to_smem %s32_s9, 32, %s3098_s14, [#allocation6]  }
  0x28   :  { %p3053_p4 = scmp.ne.s32.totalorder %s52_s12, %s3052_s0  ;;  %p3057_p5 = scmp.lt.s32.totalorder %s52_s12, %s52_s12 }
  0x29   :  { %p3058_p6 = scmp.lt.s32.totalorder %s3052_s0, %s3052_s0 }
  0x2b   :  { %p3059_p7 = por %p3058_p6, %p3057_p5 }
  0x2d   :  { %p3060_p8 = pnand %p3059_p7, %p3053_p4 }
  0x2f   :  { %3063 = shalt.err (!%p3060_p8)
}
  0x30   :  { %s3099_s1 = smov [#allocation10]  }
  0x31   :  { %54 = dma.vmem_to_smem %s52_s12, 16, %s3099_s1, [#allocation9]  }
  0x32   :  { %3086 = dma.done.wait [#allocation4], 2048  }
  0x33   :  { %3087 = vsyncadd [#allocation4], 4294965248 }
  0x34   :  { %3088 = dma.done.wait [#allocation6], 32  }
  0x35   :  { %3089 = vsyncadd [#allocation6], 4294967264 }
  0x36   :  { %3090 = dma.done.wait [#allocation9], 32  }
  0x37   :  { %3091 = vsyncadd [#allocation9], 4294967264 }
  0x38   :  { %67 = sfence }
  0x39   :  { %v84_v0 = vld [vmem:[#allocation3 + $0x10] sm:$0xff]  ;;  %v82_v1 = vld [vmem:[#allocation3] sm:$0xff]  ;;  %s3100_s3 = smov 2   ;;  %vm68_vm0 = vcmask 359424   ;;  %vm71_vm1 = vcmask 353280   ;;  %v85_v2 = vld [vmem:[#allocation3 + $0x18] sm:$0xff] }
  0x3a   :  { %102 = vrot.lane.b32.xlu1 %v84_v0, %s3100_s3  ;;  %98 = vrot.lane.b32.xlu0 %v82_v1, %s3100_s3  ;;  %v83_v3 = vld [vmem:[#allocation3 + $0x8] sm:$0xff]  ;;  %v3101_v4 = vmov 0.0   ;;  %v86_v6 = vld [vmem:[#allocation3 + $0x20] sm:$0xff]  ;;  %v89_v7 = vld [vmem:[#allocation3 + $0x38] sm:$0xff]  ;;  %s3102_s15 = smov 22   ;;  %vm122_vm2 = vcmask 146448  }
  0x3b   :  { %73 = vst.msk [vmem:[#allocation2 + $0x18] sm:$0xff] %vm68_vm0, %v3101_v4  ;;  %74 = vst.msk [vmem:[#allocation2 + $0x20] sm:$0xff] %vm68_vm0, %v3101_v4  ;;  %v87_v5 = vld [vmem:[#allocation3 + $0x28] sm:$0xff]  ;;  %v88_v8 = vld [vmem:[#allocation3 + $0x30] sm:$0xff]  ;;  %vm172_vm3 = vcmask 310448   ;;  %s2790_s16 = sld [smem:[#allocation7 + $0x1]] }
  0x3c   :  { %69 = vst.msk [vmem:[#allocation2] sm:$0xff] %vm68_vm0, %v3101_v4  ;;  %70 = vst.msk [vmem:[#allocation2 + $0x8] sm:$0xff] %vm68_vm0, %v3101_v4  ;;  %v133_v9 = vld [vmem:[#allocation3 + $0x48] sm:$0xff]  ;;  %v132_v10 = vld [vmem:[#allocation3 + $0x40] sm:$0xff]  ;;  %s3167_s17 = sld [smem:[#allocation7 + $0x29]]  ;;  %s3175_s20 = sld [smem:[#allocation7]] }
  0x3d   :  { %76 = vst.msk [vmem:[#allocation2 + $0x30] sm:$0xff] %vm68_vm0, %v3101_v4  ;;  %77 = vst.msk [vmem:[#allocation2 + $0x38] sm:$0xff] %vm68_vm0, %v3101_v4  ;;  %v135_v11 = vld [vmem:[#allocation3 + $0x58] sm:$0xff]  ;;  %v134_v12 = vld [vmem:[#allocation3 + $0x50] sm:$0xff]  ;;  %s3171_s18 = sld [smem:[#allocation7 + $0x51]]  ;;  %s3181_s21 = sld [smem:[#allocation7 + $0xa]] }
  0x3e   :  { %79 = vst.msk [vmem:[#allocation2 + $0x48] sm:$0xff] %vm68_vm0, %v3101_v4  ;;  %80 = vst.msk [vmem:[#allocation2 + $0x50] sm:$0xff] %vm68_vm0, %v3101_v4  ;;  %104 = vrot.lane.b32.xlu1 %v85_v2, %s3100_s3  ;;  %100 = vrot.lane.b32.xlu0 %v83_v3, %s3100_s3  ;;  %v137_v13 = vld [vmem:[#allocation3 + $0x68] sm:$0xff]  ;;  %v136_v14 = vld [vmem:[#allocation3 + $0x60] sm:$0xff]  ;;  %s3173_s19 = sld [smem:[#allocation7 + $0x79]]  ;;  %s3187_s22 = sld [smem:[#allocation7 + $0xb]] }
  0x3f   :  { %75 = vst.msk [vmem:[#allocation2 + $0x28] sm:$0x3] %vm71_vm1, %v3101_v4  ;;  %72 = vst.msk [vmem:[#allocation2 + $0x10] sm:$0x3] %vm71_vm1, %v3101_v4  ;;  %v139_v15 = vld [vmem:[#allocation3 + $0x78] sm:$0xff]  ;;  %v138_v16 = vld [vmem:[#allocation3 + $0x70] sm:$0xff] }
  0x40   :  { %78 = vst.msk [vmem:[#allocation2 + $0x40] sm:$0x3] %vm71_vm1, %v3101_v4  ;;  %81 = vst.msk [vmem:[#allocation2 + $0x58] sm:$0x3] %vm71_vm1, %v3101_v4  ;;  %s3189_s23 = sld [smem:[#allocation7 + $0x33]]  ;;  %s3103_s2 = smov 127  }
  0x41   :  { %v281_v29 = vstv %s2790_s16  ;;  %s3192_s24 = sld [smem:[#allocation7 + $0x5b]]  ;;  %s3198_s26 = sld [smem:[#allocation7 + $0x14]]  ;;  %vm2732_vm4 = vcmask 326656  }
  0x42   :  { %108 = vrot.lane.b32.xlu1 %v87_v5, %s3100_s3  ;;  %106 = vrot.lane.b32.xlu0 %v86_v6, %s3100_s3  ;;  %v295_v36 = vstv %s3167_s17  ;;  %s3194_s25 = sld [smem:[#allocation7 + $0x83]]  ;;  %s3200_s27 = sld [smem:[#allocation7 + $0x28]]  ;;  %v184_v45 = vstv %s3175_s20 }
  0x43   :  { %s3202_s28 = sld [smem:[#allocation7 + $0x32]]  ;;  %s3204_s5 = sld [smem:[#allocation7 + $0x50]]  ;;  %v309_v41 = vstv %s3171_s18  ;;  %v203_v47 = vstv %s3181_s21 }
  0x44   :  { %s3210_s6 = sld [smem:[#allocation7 + $0x1e]]  ;;  %s3212_s7 = sld [smem:[#allocation7 + $0x5a]]  ;;  %v323_v44 = vstv %s3173_s19  ;;  %v337_v46 = vstv %s3187_s22 }
  0x45   :  { %s3215_s8 = sld [smem:[#allocation7 + $0x3c]]  ;;  %s3217_s9 = sld [smem:[#allocation7 + $0x78]] }
  0x46   :  { %112 = vrot.lane.b32.xlu1 %v89_v7, %s3100_s3  ;;  %110 = vrot.lane.b32.xlu0 %v88_v8, %s3100_s3  ;;  %s3221_s10 = sld [smem:[#allocation7 + $0x46]]  ;;  %s3223_s11 = sld [smem:[#allocation7 + $0x64]]  ;;  %v351_v48 = vstv %s3189_s23 }
  0x47   :  { %s3225_s12 = sld [smem:[#allocation7 + $0x6e]]  ;;  %s3227_s13 = sld [smem:[#allocation7 + $0x82]]  ;;  %v365_v49 = vstv %s3192_s24  ;;  %v230_v51 = vstv %s3198_s26 }
  0x48   :  { %s3236_s14 = sld [smem:[#allocation7 + $0x15]]  ;;  %v379_v50 = vstv %s3194_s25  ;;  %v188_v55 = vstv %s3200_s27  ;;  %s3267_s0 = sld [smem:[#allocation7 + $0x8c]] }
  0x49   :  { %v192_v56 = vstv %s3204_s5  ;;  %v209_v60 = vstv %s3202_s28  ;;  %s3288_s1 = sld [smem:[#allocation7 + $0x96]]  ;;  %s3318_s3 = sld [smem:[#allocation7 + $0x3d]] }
  0x4a   :  { %150 = vrot.lane.b32.xlu1 %v133_v9, %s3102_s15  ;;  %148 = vrot.lane.b32.xlu0 %v132_v10, %s3102_s15  ;;  %v257_v59 = vstv %s3210_s6  ;;  %v215_v62 = vstv %s3212_s7  ;;  %s2801_s16 = sld [smem:[#allocation7 + $0x8d]]  ;;  %s2802_s17 = sld [smem:[#allocation7 + $0x1f]] }
  0x4b   :  { %v236_v61 = vstv %s3215_s8  ;;  %v196_v4 = vstv %s3217_s9  ;;  %s2803_s18 = sld [smem:[#allocation7 + $0x47]]  ;;  %s2806_s21 = sld [smem:[#allocation7 + $0x2]] }
  0x4c   :  { %v242_v3 = vstv %s3223_s11  ;;  %v263_v7 = vstv %s3221_s10  ;;  %s2804_s19 = sld [smem:[#allocation7 + $0x6f]]  ;;  %s2807_s22 = sld [smem:[#allocation7 + $0x2a]] }
  0x4d   :  { %v269_v8 = vstv %s3225_s12  ;;  %v221_v9 = vstv %s3227_s13  ;;  %s2805_s20 = sld [smem:[#allocation7 + $0x97]]  ;;  %s2808_s23 = sld [smem:[#allocation7 + $0x52]] }
  0x4e   :  { %154 = vrot.lane.b32.xlu1 %v135_v11, %s3102_s15  ;;  %152 = vrot.lane.b32.xlu0 %v134_v12, %s3102_s15  ;;  %s2809_s24 = sld [smem:[#allocation7 + $0x7a]]  ;;  %s3104_s25 = smov 126  }
  0x4f   :  { %s2810_s26 = sld [smem:[#allocation7 + $0xc]]  ;;  %s2814_s6 = sld [smem:[#allocation7 + $0x16]] }
  0x50   :  { %s2811_s27 = sld [smem:[#allocation7 + $0x34]]  ;;  %s2815_s7 = sld [smem:[#allocation7 + $0x3e]] }
  0x51   :  { %s2812_s28 = sld [smem:[#allocation7 + $0x5c]]  ;;  %s2816_s8 = sld [smem:[#allocation7 + $0x66]] }
  0x52   :  { %158 = vrot.lane.b32.xlu1 %v137_v13, %s3102_s15  ;;  %156 = vrot.lane.b32.xlu0 %v136_v14, %s3102_s15  ;;  %s2813_s5 = sld [smem:[#allocation7 + $0x84]]  ;;  %s2817_s9 = sld [smem:[#allocation7 + $0x8e]] }
  0x53   :  { %s2818_s10 = sld [smem:[#allocation7 + $0x20]] }
  0x54   :  { %s2819_s11 = sld [smem:[#allocation7 + $0x48]] }
  0x55   :  { %s2820_s12 = sld [smem:[#allocation7 + $0x70]] }
  0x56   :  { %162 = vrot.lane.b32.xlu1 %v139_v15, %s3102_s15  ;;  %160 = vrot.lane.b32.xlu0 %v138_v16, %s3102_s15  ;;  %s2800_s15 = sld [smem:[#allocation7 + $0x65]]  ;;  %s2821_s13 = sld [smem:[#allocation7 + $0x98]] }
  0xac   :  { %v103_v17 = vpop.permute.xlu1 %102  ;;  %v99_v18 = vpop.permute.xlu0 %98 }
  0xad   :  { %125 = vst.msk [vmem:[#allocation2 + $0x1a] sm:$0xff] %vm122_vm2, %v103_v17  ;;  %123 = vst.msk [vmem:[#allocation2 + $0x2] sm:$0xff] %vm122_vm2, %v99_v18  ;;  %v393_v18 = vstv %s3236_s14  ;;  %s2822_s14 = sld [smem:[#allocation7 + $0x3]] }
  0xb0   :  { %v105_v19 = vpop.permute.xlu1 %104  ;;  %v101_v20 = vpop.permute.xlu0 %100 }
  0xb1   :  { %126 = vst.msk [vmem:[#allocation2 + $0x22] sm:$0xff] %vm122_vm2, %v105_v19  ;;  %124 = vst.msk [vmem:[#allocation2 + $0xa] sm:$0xff] %vm122_vm2, %v101_v20 }
  0xb4   :  { %v109_v21 = vpop.permute.xlu1 %108  ;;  %v107_v22 = vpop.permute.xlu0 %106 }
  0xb5   :  { %128 = vst.msk [vmem:[#allocation2 + $0x3a] sm:$0xff] %vm122_vm2, %v109_v21  ;;  %127 = vst.msk [vmem:[#allocation2 + $0x32] sm:$0xff] %vm122_vm2, %v107_v22 }
  0xb8   :  { %v113_v23 = vpop.permute.xlu1 %112  ;;  %v111_v24 = vpop.permute.xlu0 %110 }
  0xb9   :  { %130 = vst.msk [vmem:[#allocation2 + $0x52] sm:$0xff] %vm122_vm2, %v113_v23  ;;  %129 = vst.msk [vmem:[#allocation2 + $0x4a] sm:$0xff] %vm122_vm2, %v111_v24 }
  0xbc   :  { %v151_v25 = vpop.permute.xlu1 %150  ;;  %v149_v26 = vpop.permute.xlu0 %148 }
  0xbd   :  { %174 = vst.msk [vmem:[#allocation2 + $0xa] sm:$0xff] %vm172_vm3, %v151_v25  ;;  %173 = vst.msk [vmem:[#allocation2 + $0x2] sm:$0xff] %vm172_vm3, %v149_v26 }
  0xc0   :  { %v155_v27 = vpop.permute.xlu1 %154  ;;  %v153_v28 = vpop.permute.xlu0 %152 }
  0xc1   :  { %176 = vst.msk [vmem:[#allocation2 + $0x22] sm:$0xff] %vm172_vm3, %v155_v27  ;;  %175 = vst.msk [vmem:[#allocation2 + $0x1a] sm:$0xff] %vm172_vm3, %v153_v28 }
  0xc4   :  { %v3177_v30 = vld [vmem:[#allocation2] sm:$0xff]  ;;  %v3179_v31 = vld [vmem:[#allocation2 + $0x8] sm:$0xff]  ;;  %v159_v32 = vpop.permute.xlu1 %158  ;;  %v157_v33 = vpop.permute.xlu0 %156 }
  0xc5   :  { %178 = vst.msk [vmem:[#allocation2 + $0x3a] sm:$0xff] %vm172_vm3, %v159_v32  ;;  %177 = vst.msk [vmem:[#allocation2 + $0x32] sm:$0xff] %vm172_vm3, %v157_v33  ;;  %v283_v34 = vmul.f32 %v281_v29, %v3179_v31  ;;  %v282_v35 = vmul.f32 %v281_v29, %v3177_v30  ;;  %v297_v39 = vmul.f32 %v295_v36, %v3179_v31 }
  0xc6   :  { %v296_v40 = vmul.f32 %v295_v36, %v3177_v30  ;;  %v311_v42 = vmul.f32 %v309_v41, %v3179_v31  ;;  %v310_v43 = vmul.f32 %v309_v41, %v3177_v30  ;;  %v325_v53 = vmul.f32 %v323_v44, %v3179_v31 }
  0xc7   :  { %288 = vrot.lane.b32.xlu1 %v283_v34, %s3103_s2  ;;  %286 = vrot.lane.b32.xlu0 %v282_v35, %s3103_s2  ;;  %v324_v54 = vmul.f32 %v323_v44, %v3177_v30  ;;  %v186_v12 = vmul.f32 %v184_v45, %v3179_v31  ;;  %v185_v17 = vmul.f32 %v184_v45, %v3177_v30 }
  0xc8   :  { %v163_v37 = vpop.permute.xlu1 %162  ;;  %v161_v38 = vpop.permute.xlu0 %160  ;;  %v3243_v52 = vld [vmem:[#allocation2 + $0x20] sm:$0xff]  ;;  %v3249_v57 = vld [vmem:[#allocation2 + $0x18] sm:$0xff]  ;;  %v190_v24 = vmul.f32 %v188_v55, %v3179_v31  ;;  %v189_v29 = vmul.f32 %v188_v55, %v3177_v30 }
  0xc9   :  { %180 = vst.msk [vmem:[#allocation2 + $0x52] sm:$0xff] %vm172_vm3, %v163_v37  ;;  %179 = vst.msk [vmem:[#allocation2 + $0x4a] sm:$0xff] %vm172_vm3, %v161_v38  ;;  %v339_v1 = vmul.f32 %v337_v46, %v3243_v52  ;;  %v338_v2 = vmul.f32 %v337_v46, %v3249_v57  ;;  %v205_v6 = vmul.f32 %v203_v47, %v3243_v52 }
  0xca   :  { %v353_v10 = vmul.f32 %v351_v48, %v3243_v52  ;;  %v204_v13 = vmul.f32 %v203_v47, %v3249_v57  ;;  %v352_v14 = vmul.f32 %v351_v48, %v3249_v57  ;;  %v211_v21 = vmul.f32 %v209_v60, %v3243_v52 }
  0xcb   :  { %302 = vrot.lane.b32.xlu1 %v297_v39, %s3103_s2  ;;  %300 = vrot.lane.b32.xlu0 %v296_v40, %s3103_s2  ;;  %v207_v19 = vadd.f32 %v205_v6, %v186_v12  ;;  %v210_v25 = vmul.f32 %v209_v60, %v3249_v57  ;;  %v367_v26 = vmul.f32 %v365_v49, %v3243_v52  ;;  %v248_v39 = vstv %s3267_s0  ;;  %s2823_s0 = sld [smem:[#allocation7 + $0x2b]] }
  0xcc   :  { %v3251_v58 = vld [vmem:[#allocation2 + $0x38] sm:$0xff]  ;;  %v3257_v63 = vld [vmem:[#allocation2 + $0x30] sm:$0xff]  ;;  %v206_v22 = vadd.f32 %v204_v13, %v185_v17  ;;  %v213_v34 = vadd.f32 %v211_v21, %v190_v24  ;;  %v217_v38 = vmul.f32 %v215_v62, %v3243_v52  ;;  %v366_v40 = vmul.f32 %v365_v49, %v3249_v57 }
  0xcd   :  { %v232_v11 = vmul.f32 %v230_v51, %v3251_v58  ;;  %v231_v16 = vmul.f32 %v230_v51, %v3257_v63  ;;  %v238_v23 = vmul.f32 %v236_v61, %v3251_v58  ;;  %v237_v28 = vmul.f32 %v236_v61, %v3257_v63 }
  0xce   :  { %v212_v37 = vadd.f32 %v210_v25, %v189_v29  ;;  %v381_v41 = vmul.f32 %v379_v50, %v3243_v52  ;;  %v244_v45 = vmul.f32 %v242_v3, %v3251_v58  ;;  %v194_v46 = vmul.f32 %v192_v56, %v3179_v31 }
  0xcf   :  { %316 = vrot.lane.b32.xlu1 %v311_v42, %s3103_s2  ;;  %314 = vrot.lane.b32.xlu0 %v310_v43, %s3103_s2  ;;  %v234_v27 = vadd.f32 %v232_v11, %v207_v19  ;;  %v233_v32 = vadd.f32 %v231_v16, %v206_v22  ;;  %v240_v43 = vadd.f32 %v238_v23, %v213_v34  ;;  %v421_v23 = vstv %s2800_s15  ;;  %s3105_s15 = smov 125  }
  0xd0   :  { %v3259_v0 = vld [vmem:[#allocation2 + $0x50] sm:$0xff]  ;;  %v3269_v5 = vld [vmem:[#allocation2 + $0x48] sm:$0xff]  ;;  %v239_v44 = vadd.f32 %v237_v28, %v212_v37  ;;  %v216_v47 = vmul.f32 %v215_v62, %v3249_v57  ;;  %v380_v48 = vmul.f32 %v379_v50, %v3249_v57  ;;  %v243_v51 = vmul.f32 %v242_v3, %v3257_v63 }
  0xd1   :  { %v259_v15 = vmul.f32 %v257_v59, %v3259_v0  ;;  %v258_v20 = vmul.f32 %v257_v59, %v3269_v5  ;;  %v265_v33 = vmul.f32 %v263_v7, %v3259_v0  ;;  %v264_v35 = vmul.f32 %v263_v7, %v3269_v5 }
  0xd2   :  { %v271_v55 = vmul.f32 %v269_v8, %v3259_v0  ;;  %v219_v50 = vadd.f32 %v217_v38, %v194_v46  ;;  %v275_v59 = vstv %s3288_s1  ;;  %v395_v60 = vmul.f32 %v393_v18, %v3251_v58  ;;  %s2824_s1 = sld [smem:[#allocation7 + $0x53]] }
  0xd3   :  { %330 = vrot.lane.b32.xlu1 %v325_v53, %s3103_s2  ;;  %328 = vrot.lane.b32.xlu0 %v324_v54, %s3103_s2  ;;  %v3300_v36 = vadd.f32 %v259_v15, %v234_v27  ;;  %v3308_v42 = vadd.f32 %v258_v20, %v233_v32  ;;  %v3320_v49 = vadd.f32 %v265_v33, %v240_v43  ;;  %v449_v27 = vstv %s2802_s17  ;;  %s2827_s17 = sld [smem:[#allocation7 + $0x35]] }
  0xd4   :  { %v193_v53 = vmul.f32 %v192_v56, %v3177_v30  ;;  %v3328_v54 = vadd.f32 %v264_v35, %v239_v44  ;;  %v270_v61 = vmul.f32 %v269_v8, %v3269_v5  ;;  %v250_v56 = vmul.f32 %v248_v39, %v3251_v58 }
  0xd5   :  { %v198_v3 = vmul.f32 %v196_v4, %v3179_v31  ;;  %v222_v6 = vmul.f32 %v221_v9, %v3249_v57  ;;  %v394_v7 = vmul.f32 %v393_v18, %v3257_v63  ;;  %v249_v11 = vmul.f32 %v248_v39, %v3257_v63 }
  0xd6   :  { %v218_v62 = vadd.f32 %v216_v47, %v193_v53  ;;  %v197_v8 = vmul.f32 %v196_v4, %v3177_v30  ;;  %v277_v13 = vmul.f32 %v275_v59, %v3259_v0  ;;  %v407_v18 = vstv %s3318_s3  ;;  %s2825_s3 = sld [smem:[#allocation7 + $0x7b]] }
  0xd7   :  { %344 = vrot.lane.b32.xlu1 %v339_v1, %s3103_s2  ;;  %342 = vrot.lane.b32.xlu0 %v338_v2, %s3103_s2  ;;  %v223_v1 = vmul.f32 %v221_v9, %v3243_v52  ;;  %v246_v2 = vadd.f32 %v244_v45, %v219_v50  ;;  %v276_v9 = vmul.f32 %v275_v59, %v3269_v5  ;;  %v463_v34 = vstv %s2803_s18  ;;  %s2828_s18 = sld [smem:[#allocation7 + $0x5d]] }
  0xd8   :  { %v224_v16 = vadd.f32 %v222_v6, %v197_v8  ;;  %v409_v21 = vmul.f32 %v407_v18, %v3251_v58  ;;  %v408_v22 = vmul.f32 %v407_v18, %v3257_v63  ;;  %v423_v24 = vmul.f32 %v421_v23, %v3251_v58 }
  0xd9   :  { %v3347_v12 = vadd.f32 %v271_v55, %v246_v2  ;;  %v422_v25 = vmul.f32 %v421_v23, %v3257_v63  ;;  %v451_v32 = vmul.f32 %v449_v27, %v3259_v0  ;;  %v450_v33 = vmul.f32 %v449_v27, %v3269_v5 }
  0xda   :  { %v251_v19 = vadd.f32 %v249_v11, %v224_v16  ;;  %v465_v35 = vmul.f32 %v463_v34, %v3259_v0  ;;  %v464_v37 = vmul.f32 %v463_v34, %v3269_v5  ;;  %v477_v38 = vstv %s2804_s19  ;;  %s2829_s19 = sld [smem:[#allocation7 + $0x85]] }
  0xdb   :  { %358 = vrot.lane.b32.xlu1 %v353_v10, %s3103_s2  ;;  %356 = vrot.lane.b32.xlu0 %v352_v14, %s3103_s2  ;;  %v245_v10 = vadd.f32 %v243_v51, %v218_v62  ;;  %v225_v14 = vadd.f32 %v223_v1, %v198_v3  ;;  %v479_v39 = vmul.f32 %v477_v38, %v3259_v0  ;;  %v505_v45 = vstv %s2806_s21  ;;  %s2831_s21 = sld [smem:[#allocation7 + $0x3f]] }
  0xdc   :  { %v3358_v20 = vadd.f32 %v276_v9, %v251_v19  ;;  %v507_v46 = vmul.f32 %v505_v45, %v3179_v31  ;;  %v506_v47 = vmul.f32 %v505_v45, %v3177_v30  ;;  %v533_v55 = vstv %s2808_s23  ;;  %s2833_s23 = sld [smem:[#allocation7 + $0x8f]] }
  0xdd   :  { %v3350_v15 = vadd.f32 %v270_v61, %v245_v10  ;;  %v252_v17 = vadd.f32 %v250_v56, %v225_v14  ;;  %v535_v50 = vmul.f32 %v533_v55, %v3179_v31  ;;  %v534_v59 = vmul.f32 %v533_v55, %v3177_v30 }
  0xde   :  { %v561_v1 = vstv %s2810_s26  ;;  %v575_v3 = vstv %s2811_s27  ;;  %v589_v10 = vstv %s2812_s28  ;;  %v617_v16 = vstv %s2814_s6  ;;  %s2835_s26 = sld [smem:[#allocation7 + $0x49]]  ;;  %s2839_s6 = sld [smem:[#allocation7 + $0x2c]] }
  0xdf   :  { %372 = vrot.lane.b32.xlu1 %v367_v26, %s3103_s2  ;;  %370 = vrot.lane.b32.xlu0 %v366_v40, %s3103_s2  ;;  %v3356_v4 = vadd.f32 %v277_v13, %v252_v17  ;;  %v435_v26 = vstv %s2801_s16  ;;  %v478_v40 = vmul.f32 %v477_v38, %v3269_v5  ;;  %v563_v2 = vmul.f32 %v561_v1, %v3243_v52  ;;  %s2826_s16 = sld [smem:[#allocation7 + $0xd]]  ;;  %s2836_s27 = sld [smem:[#allocation7 + $0x71]] }
  0xe0   :  { %v437_v28 = vmul.f32 %v435_v26, %v3251_v58  ;;  %v436_v29 = vmul.f32 %v435_v26, %v3257_v63  ;;  %v562_v56 = vmul.f32 %v561_v1, %v3249_v57  ;;  %v577_v6 = vmul.f32 %v575_v3, %v3243_v52  ;;  %s2837_s28 = sld [smem:[#allocation7 + $0x99]] }
  0xe1   :  { %v591_v11 = vmul.f32 %v589_v10, %v3243_v52  ;;  %v590_v8 = vmul.f32 %v589_v10, %v3249_v57  ;;  %v603_v13 = vstv %s2813_s5  ;;  %v619_v17 = vmul.f32 %v617_v16, %v3251_v58  ;;  %s2838_s5 = sld [smem:[#allocation7 + $0x4]] }
  0xe2   :  { %v605_v14 = vmul.f32 %v603_v13, %v3243_v52  ;;  %v604_v9 = vmul.f32 %v603_v13, %v3249_v57  ;;  %v618_v18 = vmul.f32 %v617_v16, %v3257_v63  ;;  %v631_v19 = vstv %s2815_s7  ;;  %s2840_s7 = sld [smem:[#allocation7 + $0x54]] }
  0xe3   :  { %386 = vrot.lane.b32.xlu1 %v381_v41, %s3103_s2  ;;  %384 = vrot.lane.b32.xlu0 %v380_v48, %s3103_s2  ;;  %v491_v41 = vstv %s2805_s20  ;;  %v519_v48 = vstv %s2807_s22  ;;  %s2830_s20 = sld [smem:[#allocation7 + $0x17]] }
  0xe4   :  { %v493_v43 = vmul.f32 %v491_v41, %v3259_v0  ;;  %v492_v44 = vmul.f32 %v491_v41, %v3269_v5  ;;  %v521_v51 = vmul.f32 %v519_v48, %v3179_v31  ;;  %v520_v53 = vmul.f32 %v519_v48, %v3177_v30  ;;  %s2832_s22 = sld [smem:[#allocation7 + $0x67]] }
  0xe5   :  { %v645_v23 = vstv %s2816_s8  ;;  %v659_v26 = vstv %s2817_s9  ;;  %v687_v34 = vstv %s2819_s11  ;;  %v729_v55 = vstv %s2822_s14  ;;  %s2841_s8 = sld [smem:[#allocation7 + $0x7c]]  ;;  %s3106_s9 = smov 124  }
  0xe6   :  { %v661_v27 = vmul.f32 %v659_v26, %v3251_v58  ;;  %v689_v38 = vmul.f32 %v687_v34, %v3259_v0  ;;  %v771_v13 = vstv %s2825_s3  ;;  %s2843_s11 = sld [smem:[#allocation7 + $0x36]]  ;;  %s2846_s14 = sld [smem:[#allocation7 + $0x18]] }
  0xe7   :  { %400 = vrot.lane.b32.xlu1 %v395_v60, %s3103_s2  ;;  %398 = vrot.lane.b32.xlu0 %v394_v7, %s3103_s2  ;;  %v547_v60 = vstv %s2809_s24  ;;  %v576_v7 = vmul.f32 %v575_v3, %v3249_v57  ;;  %v773_v16 = vmul.f32 %v771_v13, %v3179_v31  ;;  %s2834_s24 = sld [smem:[#allocation7 + $0x21]]  ;;  %s2849_s3 = sld [smem:[#allocation7 + $0x90]] }
  0xe8   :  { %v549_v61 = vmul.f32 %v547_v60, %v3179_v31  ;;  %v548_v62 = vmul.f32 %v547_v60, %v3177_v30  ;;  %v731_v60 = vmul.f32 %v729_v55, %v3179_v31 }
  0xeb   :  { %414 = vrot.lane.b32.xlu1 %v409_v21, %s3103_s2  ;;  %412 = vrot.lane.b32.xlu0 %v408_v22, %s3103_s2  ;;  %v633_v21 = vmul.f32 %v631_v19, %v3251_v58  ;;  %v632_v22 = vmul.f32 %v631_v19, %v3257_v63 }
  0xef   :  { %428 = vrot.lane.b32.xlu1 %v423_v24, %s3103_s2  ;;  %426 = vrot.lane.b32.xlu0 %v422_v25, %s3103_s2  ;;  %v647_v24 = vmul.f32 %v645_v23, %v3251_v58  ;;  %v646_v25 = vmul.f32 %v645_v23, %v3257_v63 }
  0xf3   :  { %442 = vrot.lane.b32.xlu1 %v437_v28, %s3103_s2  ;;  %440 = vrot.lane.b32.xlu0 %v436_v29, %s3103_s2  ;;  %v660_v28 = vmul.f32 %v659_v26, %v3257_v63  ;;  %v673_v29 = vstv %s2818_s10  ;;  %s2842_s10 = sld [smem:[#allocation7 + $0xe]] }
  0xf7   :  { %456 = vrot.lane.b32.xlu1 %v451_v32, %s3103_s2  ;;  %454 = vrot.lane.b32.xlu0 %v450_v33, %s3103_s2  ;;  %v675_v32 = vmul.f32 %v673_v29, %v3259_v0  ;;  %v674_v33 = vmul.f32 %v673_v29, %v3269_v5  ;;  %v813_v29 = vstv %s2828_s18  ;;  %s2852_s18 = sld [smem:[#allocation7 + $0x72]] }
  0xfb   :  { %470 = vrot.lane.b32.xlu1 %v465_v35, %s3103_s2  ;;  %468 = vrot.lane.b32.xlu0 %v464_v37, %s3103_s2 }
  0xff   :  { %484 = vrot.lane.b32.xlu1 %v479_v39, %s3103_s2  ;;  %482 = vrot.lane.b32.xlu0 %v478_v40, %s3103_s2  ;;  %v688_v39 = vmul.f32 %v687_v34, %v3269_v5  ;;  %v701_v40 = vstv %s2820_s12  ;;  %v815_v34 = vmul.f32 %v813_v29, %v3243_v52  ;;  %s2844_s12 = sld [smem:[#allocation7 + $0x5e]] }
 0x100   :  { %v702_v45 = vmul.f32 %v701_v40, %v3269_v5 }
 0x103   :  { %498 = vrot.lane.b32.xlu1 %v493_v43, %s3103_s2  ;;  %496 = vrot.lane.b32.xlu0 %v492_v44, %s3103_s2  ;;  %v703_v44 = vmul.f32 %v701_v40, %v3259_v0 }
 0x107   :  { %512 = vrot.lane.b32.xlu1 %v507_v46, %s3104_s25  ;;  %510 = vrot.lane.b32.xlu0 %v506_v47, %s3104_s25  ;;  %v715_v46 = vstv %s2821_s13  ;;  %s2845_s13 = sld [smem:[#allocation7 + $0x86]] }
 0x10b   :  { %526 = vrot.lane.b32.xlu1 %v521_v51, %s3104_s25  ;;  %524 = vrot.lane.b32.xlu0 %v520_v53, %s3104_s25  ;;  %v717_v51 = vmul.f32 %v715_v46, %v3259_v0  ;;  %v716_v53 = vmul.f32 %v715_v46, %v3269_v5 }
 0x10f   :  { %540 = vrot.lane.b32.xlu1 %v535_v50, %s3104_s25  ;;  %538 = vrot.lane.b32.xlu0 %v534_v59, %s3104_s25 }
 0x113   :  { %554 = vrot.lane.b32.xlu1 %v549_v61, %s3104_s25  ;;  %552 = vrot.lane.b32.xlu0 %v548_v62, %s3104_s25  ;;  %v730_v61 = vmul.f32 %v729_v55, %v3177_v30  ;;  %v743_v62 = vstv %s2823_s0  ;;  %s2847_s0 = sld [smem:[#allocation7 + $0x40]] }
 0x114   :  { %v744_v3 = vmul.f32 %v743_v62, %v3177_v30 }
 0x117   :  { %568 = vrot.lane.b32.xlu1 %v563_v2, %s3104_s25  ;;  %566 = vrot.lane.b32.xlu0 %v562_v56, %s3104_s25  ;;  %v745_v56 = vmul.f32 %v743_v62, %v3179_v31  ;;  %v855_v62 = vstv %s2831_s21  ;;  %s2871_s21 = sld [smem:[#allocation7 + $0x2e]] }
 0x11b   :  { %582 = vrot.lane.b32.xlu1 %v577_v6, %s3104_s25  ;;  %580 = vrot.lane.b32.xlu0 %v576_v7, %s3104_s25  ;;  %v757_v6 = vstv %s2824_s1  ;;  %s2848_s1 = sld [smem:[#allocation7 + $0x68]] }
 0x11f   :  { %596 = vrot.lane.b32.xlu1 %v591_v11, %s3104_s25  ;;  %594 = vrot.lane.b32.xlu0 %v590_v8, %s3104_s25  ;;  %v759_v11 = vmul.f32 %v757_v6, %v3179_v31  ;;  %v758_v8 = vmul.f32 %v757_v6, %v3177_v30  ;;  %v857_v6 = vmul.f32 %v855_v62, %v3251_v58 }
 0x123   :  { %610 = vrot.lane.b32.xlu1 %v605_v14, %s3104_s25  ;;  %608 = vrot.lane.b32.xlu0 %v604_v9, %s3104_s25 }
 0x127   :  { %624 = vrot.lane.b32.xlu1 %v619_v17, %s3104_s25  ;;  %622 = vrot.lane.b32.xlu0 %v618_v18, %s3104_s25  ;;  %v772_v17 = vmul.f32 %v771_v13, %v3177_v30  ;;  %v785_v18 = vstv %s2826_s16  ;;  %s2850_s16 = sld [smem:[#allocation7 + $0x22]] }
 0x128   :  { %v786_v23 = vmul.f32 %v785_v18, %v3249_v57 }
 0x12b   :  { %638 = vrot.lane.b32.xlu1 %v633_v21, %s3104_s25  ;;  %636 = vrot.lane.b32.xlu0 %v632_v22, %s3104_s25  ;;  %v787_v22 = vmul.f32 %v785_v18, %v3243_v52 }
 0x12f   :  { %652 = vrot.lane.b32.xlu1 %v647_v24, %s3104_s25  ;;  %650 = vrot.lane.b32.xlu0 %v646_v25, %s3104_s25  ;;  %v799_v24 = vstv %s2827_s17  ;;  %s2851_s17 = sld [smem:[#allocation7 + $0x4a]] }
 0x133   :  { %666 = vrot.lane.b32.xlu1 %v661_v27, %s3104_s25  ;;  %664 = vrot.lane.b32.xlu0 %v660_v28, %s3104_s25  ;;  %v801_v27 = vmul.f32 %v799_v24, %v3243_v52  ;;  %v800_v28 = vmul.f32 %v799_v24, %v3249_v57 }
 0x137   :  { %680 = vrot.lane.b32.xlu1 %v675_v32, %s3104_s25  ;;  %678 = vrot.lane.b32.xlu0 %v674_v33, %s3104_s25 }
 0x139   :  { %v3440_v35 = vpop.permute.xlu1 %288  ;;  %v3442_v37 = vpop.permute.xlu0 %286 }
 0x13b   :  { %694 = vrot.lane.b32.xlu1 %v689_v38, %s3104_s25  ;;  %692 = vrot.lane.b32.xlu0 %v688_v39, %s3104_s25  ;;  %v814_v38 = vmul.f32 %v813_v29, %v3249_v57  ;;  %v827_v39 = vstv %s2829_s19  ;;  %v897_v29 = vstv %s2834_s24  ;;  %s2853_s19 = sld [smem:[#allocation7 + $0x9a]]  ;;  %s2874_s24 = sld [smem:[#allocation7 + $0x10]] }
 0x13c   :  { %v828_v46 = vmul.f32 %v827_v39, %v3249_v57 }
 0x13d   :  { %v3448_v41 = vpop.permute.xlu1 %302  ;;  %v3450_v43 = vpop.permute.xlu0 %300 }
 0x13f   :  { %708 = vrot.lane.b32.xlu1 %v703_v44, %s3104_s25  ;;  %706 = vrot.lane.b32.xlu0 %v702_v45, %s3104_s25  ;;  %v829_v45 = vmul.f32 %v827_v39, %v3243_v52  ;;  %v899_v39 = vmul.f32 %v897_v29, %v3259_v0 }
 0x141   :  { %v3456_v47 = vpop.permute.xlu1 %316  ;;  %v3458_v48 = vpop.permute.xlu0 %314 }
 0x143   :  { %722 = vrot.lane.b32.xlu1 %v717_v51, %s3104_s25  ;;  %720 = vrot.lane.b32.xlu0 %v716_v53, %s3104_s25  ;;  %v841_v51 = vstv %s2830_s20  ;;  %s2870_s20 = sld [smem:[#allocation7 + $0x6]] }
 0x145   :  { %v3464_v50 = vpop.permute.xlu1 %330  ;;  %v3466_v59 = vpop.permute.xlu0 %328 }
 0x147   :  { %736 = vrot.lane.b32.xlu1 %v731_v60, %s3105_s15  ;;  %734 = vrot.lane.b32.xlu0 %v730_v61, %s3105_s15  ;;  %v843_v60 = vmul.f32 %v841_v51, %v3251_v58  ;;  %v842_v61 = vmul.f32 %v841_v51, %v3257_v63 }
 0x149   :  { %v3472_v1 = vpop.permute.xlu1 %344  ;;  %v3474_v2 = vpop.permute.xlu0 %342 }
 0x14b   :  { %750 = vrot.lane.b32.xlu1 %v745_v56, %s3105_s15  ;;  %748 = vrot.lane.b32.xlu0 %v744_v3, %s3105_s15 }
 0x14d   :  { %v3480_v7 = vpop.permute.xlu1 %358  ;;  %v3482_v10 = vpop.permute.xlu0 %356 }
 0x14f   :  { %764 = vrot.lane.b32.xlu1 %v759_v11, %s3105_s15  ;;  %762 = vrot.lane.b32.xlu0 %v758_v8, %s3105_s15  ;;  %v856_v11 = vmul.f32 %v855_v62, %v3257_v63  ;;  %v869_v8 = vstv %s2832_s22  ;;  %s2872_s22 = sld [smem:[#allocation7 + $0x56]] }
 0x150   :  { %v870_v18 = vmul.f32 %v869_v8, %v3257_v63 }
 0x151   :  { %v3488_v14 = vpop.permute.xlu1 %372  ;;  %v3490_v9 = vpop.permute.xlu0 %370 }
 0x153   :  { %778 = vrot.lane.b32.xlu1 %v773_v16, %s3105_s15  ;;  %776 = vrot.lane.b32.xlu0 %v772_v17, %s3105_s15  ;;  %v871_v17 = vmul.f32 %v869_v8, %v3251_v58 }
 0x155   :  { %v3496_v19 = vpop.permute.xlu1 %386  ;;  %v3498_v21 = vpop.permute.xlu0 %384 }
 0x156   :  { %5248 = vst [vmem:[#allocation16_spill] sm:$0xff] %v3498_v21 }
 0x157   :  { %792 = vrot.lane.b32.xlu1 %v787_v22, %s3105_s15  ;;  %790 = vrot.lane.b32.xlu0 %v786_v23, %s3105_s15  ;;  %v883_v22 = vstv %s2833_s23  ;;  %s2873_s23 = sld [smem:[#allocation7 + $0x7e]] }
 0x159   :  { %v3504_v25 = vpop.permute.xlu1 %400  ;;  %v3506_v26 = vpop.permute.xlu0 %398 }
 0x15b   :  { %806 = vrot.lane.b32.xlu1 %v801_v27, %s3105_s15  ;;  %804 = vrot.lane.b32.xlu0 %v800_v28, %s3105_s15  ;;  %v885_v27 = vmul.f32 %v883_v22, %v3251_v58  ;;  %v884_v28 = vmul.f32 %v883_v22, %v3257_v63  ;;  %v939_v22 = vstv %s2837_s28  ;;  %s2877_s28 = sld [smem:[#allocation7 + $0x88]] }
 0x15d   :  { %v3512_v32 = vpop.permute.xlu1 %414  ;;  %v3514_v33 = vpop.permute.xlu0 %412 }
 0x15e   :  { %5249 = vst [vmem:[#allocation17_spill] sm:$0xff] %v3512_v32  ;;  %5250 = vst [vmem:[#allocation18_spill] sm:$0xff] %v3514_v33 }
 0x15f   :  { %820 = vrot.lane.b32.xlu1 %v815_v34, %s3105_s15  ;;  %818 = vrot.lane.b32.xlu0 %v814_v38, %s3105_s15 }
 0x161   :  { %v3520_v40 = vpop.permute.xlu1 %428  ;;  %v3522_v44 = vpop.permute.xlu0 %426 }
 0x162   :  { %5251 = vst [vmem:[#allocation19_spill] sm:$0xff] %v3520_v40  ;;  %5252 = vst [vmem:[#allocation20_spill] sm:$0xff] %v3522_v44 }
 0x163   :  { %834 = vrot.lane.b32.xlu1 %v829_v45, %s3105_s15  ;;  %832 = vrot.lane.b32.xlu0 %v828_v46, %s3105_s15  ;;  %v898_v45 = vmul.f32 %v897_v29, %v3269_v5  ;;  %v911_v46 = vstv %s2835_s26  ;;  %v941_v29 = vmul.f32 %v939_v22, %v3259_v0  ;;  %s2875_s26 = sld [smem:[#allocation7 + $0x38]] }
 0x164   :  { %v912_v62 = vmul.f32 %v911_v46, %v3269_v5 }
 0x165   :  { %v3528_v53 = vpop.permute.xlu1 %442  ;;  %v3530_v55 = vpop.permute.xlu0 %440 }
 0x166   :  { %5253 = vst [vmem:[#allocation21_spill] sm:$0xff] %v3528_v53  ;;  %5254 = vst [vmem:[#allocation22_spill] sm:$0xff] %v3530_v55 }
 0x167   :  { %848 = vrot.lane.b32.xlu1 %v843_v60, %s3105_s15  ;;  %846 = vrot.lane.b32.xlu0 %v842_v61, %s3105_s15  ;;  %v913_v61 = vmul.f32 %v911_v46, %v3259_v0 }
 0x169   :  { %v3536_v56 = vpop.permute.xlu1 %456  ;;  %v3538_v3 = vpop.permute.xlu0 %454 }
 0x16b   :  { %862 = vrot.lane.b32.xlu1 %v857_v6, %s3105_s15  ;;  %860 = vrot.lane.b32.xlu0 %v856_v11, %s3105_s15  ;;  %v925_v6 = vstv %s2836_s27  ;;  %s2876_s27 = sld [smem:[#allocation7 + $0x60]] }
 0x16d   :  { %v3544_v13 = vpop.permute.xlu1 %470  ;;  %v3546_v16 = vpop.permute.xlu0 %468 }
 0x16e   :  { %5255 = vst [vmem:[#allocation23_spill] sm:$0xff] %v3544_v13  ;;  %5256 = vst [vmem:[#allocation24_spill] sm:$0xff] %v3546_v16 }
 0x16f   :  { %876 = vrot.lane.b32.xlu1 %v871_v17, %s3105_s15  ;;  %874 = vrot.lane.b32.xlu0 %v870_v18, %s3105_s15  ;;  %v927_v17 = vmul.f32 %v925_v6, %v3259_v0  ;;  %v926_v18 = vmul.f32 %v925_v6, %v3269_v5 }
 0x171   :  { %v3552_v23 = vpop.permute.xlu1 %484  ;;  %v3554_v24 = vpop.permute.xlu0 %482 }
 0x172   :  { %5257 = vst [vmem:[#allocation25_spill] sm:$0xff] %v3552_v23  ;;  %5258 = vst [vmem:[#allocation26_spill] sm:$0xff] %v3554_v24 }
 0x173   :  { %890 = vrot.lane.b32.xlu1 %v885_v27, %s3105_s15  ;;  %888 = vrot.lane.b32.xlu0 %v884_v28, %s3105_s15 }
 0x175   :  { %v3560_v34 = vpop.permute.xlu1 %498  ;;  %v3562_v38 = vpop.permute.xlu0 %496 }
 0x176   :  { %5259 = vst [vmem:[#allocation27_spill] sm:$0xff] %v3560_v34  ;;  %5260 = vst [vmem:[#allocation28_spill] sm:$0xff] %v3562_v38 }
 0x177   :  { %904 = vrot.lane.b32.xlu1 %v899_v39, %s3105_s15  ;;  %902 = vrot.lane.b32.xlu0 %v898_v45, %s3105_s15  ;;  %v940_v39 = vmul.f32 %v939_v22, %v3269_v5  ;;  %v953_v45 = vstv %s2838_s5  ;;  %s2878_s5 = sld [smem:[#allocation7 + $0x1a]] }
 0x178   :  { %v954_v6 = vmul.f32 %v953_v45, %v3177_v30 }
 0x179   :  { %v3568_v51 = vpop.permute.xlu1 %512  ;;  %v3570_v60 = vpop.permute.xlu0 %510 }
 0x17a   :  { %5261 = vst [vmem:[#allocation29_spill] sm:$0xff] %v3568_v51  ;;  %5262 = vst [vmem:[#allocation30_spill] sm:$0xff] %v3570_v60 }
 0x17b   :  { %918 = vrot.lane.b32.xlu1 %v913_v61, %s3105_s15  ;;  %916 = vrot.lane.b32.xlu0 %v912_v62, %s3105_s15  ;;  %v955_v62 = vmul.f32 %v953_v45, %v3179_v31 }
 0x17d   :  { %v3576_v11 = vpop.permute.xlu1 %526  ;;  %v3578_v8 = vpop.permute.xlu0 %524 }
 0x17e   :  { %5263 = vst [vmem:[#allocation31_spill] sm:$0xff] %v3576_v11  ;;  %5264 = vst [vmem:[#allocation32_spill] sm:$0xff] %v3578_v8 }
 0x17f   :  { %932 = vrot.lane.b32.xlu1 %v927_v17, %s3105_s15  ;;  %930 = vrot.lane.b32.xlu0 %v926_v18, %s3105_s15  ;;  %v967_v17 = vstv %s2839_s6  ;;  %s2879_s6 = sld [smem:[#allocation7 + $0x42]] }
 0x181   :  { %v3584_v27 = vpop.permute.xlu1 %540  ;;  %v3586_v28 = vpop.permute.xlu0 %538 }
 0x182   :  { %5265 = vst [vmem:[#allocation33_spill] sm:$0xff] %v3584_v27  ;;  %5266 = vst [vmem:[#allocation34_spill] sm:$0xff] %v3586_v28  ;;  %v995_v28 = vstv %s2841_s8  ;;  %s2881_s8 = sld [smem:[#allocation7 + $0x92]] }
 0x183   :  { %946 = vrot.lane.b32.xlu1 %v941_v29, %s3105_s15  ;;  %944 = vrot.lane.b32.xlu0 %v940_v39, %s3105_s15  ;;  %v969_v29 = vmul.f32 %v967_v17, %v3179_v31  ;;  %v968_v39 = vmul.f32 %v967_v17, %v3177_v30 }
 0x185   :  { %v3592_v46 = vpop.permute.xlu1 %554  ;;  %v3594_v61 = vpop.permute.xlu0 %552 }
 0x186   :  { %5267 = vst [vmem:[#allocation35_spill] sm:$0xff] %v3592_v46  ;;  %5268 = vst [vmem:[#allocation36_spill] sm:$0xff] %v3594_v61  ;;  %v981_v61 = vstv %s2840_s7  ;;  %s2880_s7 = sld [smem:[#allocation7 + $0x6a]] }
 0x187   :  { %960 = vrot.lane.b32.xlu1 %v955_v62, %s3106_s9  ;;  %958 = vrot.lane.b32.xlu0 %v954_v6, %s3106_s9  ;;  %v983_v62 = vmul.f32 %v981_v61, %v3179_v31  ;;  %v982_v6 = vmul.f32 %v981_v61, %v3177_v30 }
 0x189   :  { %v3600_v18 = vpop.permute.xlu1 %568  ;;  %v3602_v22 = vpop.permute.xlu0 %566 }
 0x18a   :  { %5269 = vst [vmem:[#allocation37_spill] sm:$0xff] %v3600_v18  ;;  %5270 = vst [vmem:[#allocation38_spill] sm:$0xff] %v3602_v22 }
 0x18b   :  { %974 = vrot.lane.b32.xlu1 %v969_v29, %s3106_s9  ;;  %972 = vrot.lane.b32.xlu0 %v968_v39, %s3106_s9  ;;  %v997_v29 = vmul.f32 %v995_v28, %v3179_v31  ;;  %v996_v39 = vmul.f32 %v995_v28, %v3177_v30 }
 0x18d   :  { %v3608_v45 = vpop.permute.xlu1 %582  ;;  %v3610_v46 = vpop.permute.xlu0 %580 }
 0x18e   :  { %5271 = vst [vmem:[#allocation39_spill] sm:$0xff] %v3608_v45  ;;  %5272 = vst [vmem:[#allocation40_spill] sm:$0xff] %v3610_v46  ;;  %v1009_v45 = vstv %s2842_s10  ;;  %s3810_s10 = sld [smem:[#allocation7 + $0x24]] }
 0x18f   :  { %988 = vrot.lane.b32.xlu1 %v983_v62, %s3106_s9  ;;  %986 = vrot.lane.b32.xlu0 %v982_v6, %s3106_s9  ;;  %v1011_v62 = vmul.f32 %v1009_v45, %v3243_v52  ;;  %v1010_v6 = vmul.f32 %v1009_v45, %v3249_v57 }
 0x191   :  { %v3616_v17 = vpop.permute.xlu1 %596  ;;  %v3618_v27 = vpop.permute.xlu0 %594 }
 0x192   :  { %5273 = vst [vmem:[#allocation41_spill] sm:$0xff] %v3616_v17  ;;  %5274 = vst [vmem:[#allocation42_spill] sm:$0xff] %v3618_v27  ;;  %v1023_v17 = vstv %s2843_s11  ;;  %s3820_s11 = sld [smem:[#allocation7 + $0x4c]] }
 0x193   :  { %1002 = vrot.lane.b32.xlu1 %v997_v29, %s3106_s9  ;;  %1000 = vrot.lane.b32.xlu0 %v996_v39, %s3106_s9  ;;  %v1025_v28 = vmul.f32 %v1023_v17, %v3243_v52  ;;  %v1024_v29 = vmul.f32 %v1023_v17, %v3249_v57  ;;  %v1037_v39 = vstv %s2844_s12  ;;  %s3824_s12 = sld [smem:[#allocation7 + $0x7]] }
 0x195   :  { %v3624_v61 = vpop.permute.xlu1 %610  ;;  %v3626_v46 = vpop.permute.xlu0 %608 }
 0x196   :  { %5275 = vst [vmem:[#allocation43_spill] sm:$0xff] %v3624_v61  ;;  %5276 = vst [vmem:[#allocation44_spill] sm:$0xff] %v3626_v46  ;;  %v1051_v61 = vstv %s2845_s13  ;;  %s3826_s13 = sld [smem:[#allocation7 + $0x2f]] }
 0x197   :  { %1016 = vrot.lane.b32.xlu1 %v1011_v62, %s3106_s9  ;;  %1014 = vrot.lane.b32.xlu0 %v1010_v6, %s3106_s9  ;;  %v1039_v62 = vmul.f32 %v1037_v39, %v3243_v52  ;;  %v1038_v6 = vmul.f32 %v1037_v39, %v3249_v57 }
 0x199   :  { %v3632_v30 = vpop.permute.xlu1 %624  ;;  %v3634_v31 = vpop.permute.xlu0 %622 }
 0x19a   :  { %5277 = vst [vmem:[#allocation45_spill] sm:$0xff] %v3632_v30  ;;  %5278 = vst [vmem:[#allocation46_spill] sm:$0xff] %v3634_v31 }
 0x19b   :  { %1030 = vrot.lane.b32.xlu1 %v1025_v28, %s3106_s9  ;;  %1028 = vrot.lane.b32.xlu0 %v1024_v29, %s3106_s9  ;;  %v1053_v28 = vmul.f32 %v1051_v61, %v3243_v52  ;;  %v1052_v29 = vmul.f32 %v1051_v61, %v3249_v57 }
 0x19d   :  { %v3640_v45 = vpop.permute.xlu1 %638  ;;  %v3642_v46 = vpop.permute.xlu0 %636 }
 0x19e   :  { %5279 = vst [vmem:[#allocation47_spill] sm:$0xff] %v3640_v45  ;;  %5280 = vst [vmem:[#allocation48_spill] sm:$0xff] %v3642_v46  ;;  %v1065_v45 = vstv %s2846_s14  ;;  %s3834_s14 = sld [smem:[#allocation7 + $0x57]] }
 0x19f   :  { %1044 = vrot.lane.b32.xlu1 %v1039_v62, %s3106_s9  ;;  %1042 = vrot.lane.b32.xlu0 %v1038_v6, %s3106_s9  ;;  %v1067_v62 = vmul.f32 %v1065_v45, %v3251_v58  ;;  %v1066_v6 = vmul.f32 %v1065_v45, %v3257_v63 }
 0x1a1   :  { %v3648_v17 = vpop.permute.xlu1 %652  ;;  %v3650_v27 = vpop.permute.xlu0 %650 }
 0x1a2   :  { %5281 = vst [vmem:[#allocation49_spill] sm:$0xff] %v3648_v17  ;;  %5282 = vst [vmem:[#allocation50_spill] sm:$0xff] %v3650_v27  ;;  %v1079_v17 = vstv %s2847_s0  ;;  %s3836_s0 = sld [smem:[#allocation7 + $0x7f]] }
 0x1a3   :  { %1058 = vrot.lane.b32.xlu1 %v1053_v28, %s3106_s9  ;;  %1056 = vrot.lane.b32.xlu0 %v1052_v29, %s3106_s9  ;;  %v1081_v61 = vmul.f32 %v1079_v17, %v3251_v58  ;;  %v1080_v28 = vmul.f32 %v1079_v17, %v3257_v63  ;;  %v1093_v29 = vstv %s2848_s1  ;;  %s3843_s1 = sld [smem:[#allocation7 + $0x74]] }
 0x1a5   :  { %v3656_v39 = vpop.permute.xlu1 %666  ;;  %v3658_v46 = vpop.permute.xlu0 %664 }
 0x1a6   :  { %5283 = vst [vmem:[#allocation51_spill] sm:$0xff] %v3656_v39  ;;  %5284 = vst [vmem:[#allocation52_spill] sm:$0xff] %v3658_v46  ;;  %v1107_v39 = vstv %s2849_s3  ;;  %s3845_s3 = sld [smem:[#allocation7 + $0x5]] }
 0x1a7   :  { %1072 = vrot.lane.b32.xlu1 %v1067_v62, %s3106_s9  ;;  %1070 = vrot.lane.b32.xlu0 %v1066_v6, %s3106_s9  ;;  %v1095_v62 = vmul.f32 %v1093_v29, %v3251_v58  ;;  %v1094_v6 = vmul.f32 %v1093_v29, %v3257_v63 }
 0x1a9   :  { %v3664_v52 = vpop.permute.xlu1 %680  ;;  %v3666_v57 = vpop.permute.xlu0 %678 }
 0x1aa   :  { %5285 = vst [vmem:[#allocation53_spill] sm:$0xff] %v3664_v52  ;;  %5286 = vst [vmem:[#allocation54_spill] sm:$0xff] %v3666_v57  ;;  %v1393_v57 = vstv %s2878_s5  ;;  %s3888_s5 = sld [smem:[#allocation7 + $0x1b]] }
 0x1ab   :  { %1086 = vrot.lane.b32.xlu1 %v1081_v61, %s3106_s9  ;;  %1084 = vrot.lane.b32.xlu0 %v1080_v28, %s3106_s9  ;;  %v1109_v61 = vmul.f32 %v1107_v39, %v3251_v58  ;;  %v1108_v28 = vmul.f32 %v1107_v39, %v3257_v63 }
 0x1ad   :  { %v3672_v45 = vpop.permute.xlu1 %694  ;;  %v3674_v46 = vpop.permute.xlu0 %692 }
 0x1ae   :  { %5287 = vst [vmem:[#allocation55_spill] sm:$0xff] %v3672_v45  ;;  %5288 = vst [vmem:[#allocation56_spill] sm:$0xff] %v3674_v46  ;;  %v1121_v45 = vstv %s2850_s16  ;;  %s3849_s16 = sld [smem:[#allocation7 + $0x2d]] }
 0x1af   :  { %1100 = vrot.lane.b32.xlu1 %v1095_v62, %s3106_s9  ;;  %1098 = vrot.lane.b32.xlu0 %v1094_v6, %s3106_s9  ;;  %v1123_v62 = vmul.f32 %v1121_v45, %v3259_v0  ;;  %v1122_v6 = vmul.f32 %v1121_v45, %v3269_v5 }
 0x1b1   :  { %v3680_v17 = vpop.permute.xlu1 %708  ;;  %v3682_v27 = vpop.permute.xlu0 %706 }
 0x1b2   :  { %5289 = vst [vmem:[#allocation57_spill] sm:$0xff] %v3680_v17  ;;  %5290 = vst [vmem:[#allocation58_spill] sm:$0xff] %v3682_v27  ;;  %v1135_v17 = vstv %s2851_s17  ;;  %s3851_s17 = sld [smem:[#allocation7 + $0x55]] }
 0x1b3   :  { %1114 = vrot.lane.b32.xlu1 %v1109_v61, %s3106_s9  ;;  %1112 = vrot.lane.b32.xlu0 %v1108_v28, %s3106_s9  ;;  %v1137_v39 = vmul.f32 %v1135_v17, %v3259_v0  ;;  %v1136_v61 = vmul.f32 %v1135_v17, %v3269_v5  ;;  %v1149_v28 = vstv %s2852_s18  ;;  %s3853_s18 = sld [smem:[#allocation7 + $0x11]] }
 0x1b4   :  { %v1185_v30 = vstv %s3849_s16  ;;  %s4259_s16 = sld [smem:[#allocation7 + $0x75]] }
 0x1b5   :  { %v3688_v29 = vpop.permute.xlu1 %722  ;;  %v3690_v46 = vpop.permute.xlu0 %720 }
 0x1b6   :  { %5291 = vst [vmem:[#allocation59_spill] sm:$0xff] %v3688_v29  ;;  %5292 = vst [vmem:[#allocation60_spill] sm:$0xff] %v3690_v46  ;;  %v1163_v29 = vstv %s2853_s19  ;;  %s3855_s19 = sld [smem:[#allocation7 + $0x7d]] }
 0x1b7   :  { %1128 = vrot.lane.b32.xlu1 %v1123_v62, %s3106_s9  ;;  %1126 = vrot.lane.b32.xlu0 %v1122_v6, %s3106_s9  ;;  %v1151_v62 = vmul.f32 %v1149_v28, %v3259_v0  ;;  %v1150_v6 = vmul.f32 %v1149_v28, %v3269_v5 }
 0x1b9   :  { %v3696_v58 = vpop.permute.xlu1 %736  ;;  %v3698_v63 = vpop.permute.xlu0 %734  ;;  %v1561_v34 = vstv %s3853_s18  ;;  %s4299_s18 = sld [smem:[#allocation7 + $0x9b]] }
 0x1ba   :  { %5293 = vst [vmem:[#allocation61_spill] sm:$0xff] %v3696_v58  ;;  %5294 = vst [vmem:[#allocation62_spill] sm:$0xff] %v3698_v63  ;;  %v1281_v63 = vstv %s2870_s20  ;;  %s3863_s20 = sld [smem:[#allocation7 + $0x39]] }
 0x1bb   :  { %1142 = vrot.lane.b32.xlu1 %v1137_v39, %s3106_s9  ;;  %1140 = vrot.lane.b32.xlu0 %v1136_v61, %s3106_s9  ;;  %v1165_v39 = vmul.f32 %v1163_v29, %v3259_v0  ;;  %v1164_v61 = vmul.f32 %v1163_v29, %v3269_v5 }
 0x1bd   :  { %v3704_v45 = vpop.permute.xlu1 %750  ;;  %v3706_v46 = vpop.permute.xlu0 %748 }
 0x1be   :  { %5295 = vst [vmem:[#allocation63_spill] sm:$0xff] %v3704_v45  ;;  %5296 = vst [vmem:[#allocation64_spill] sm:$0xff] %v3706_v46  ;;  %v3718_v45 = vld [vmem:[#allocation2 + $0x1] sm:$0xff]  ;;  %v3720_v46 = vld [vmem:[#allocation2 + $0x9] sm:$0xff] }
 0x1bf   :  { %1156 = vrot.lane.b32.xlu1 %v1151_v62, %s3106_s9  ;;  %1154 = vrot.lane.b32.xlu0 %v1150_v6, %s3106_s9  ;;  %5299 = vst [vmem:[#allocation67_spill] sm:$0xff] %v3720_v46  ;;  %v1283_v6 = vmul.f32 %v1281_v63, %v3720_v46  ;;  %v1282_v0 = vmul.f32 %v1281_v63, %v3718_v45 }
 0x1c0   :  { %v1575_v24 = vstv %s3863_s20  ;;  %s2902_s20 = sld [smem:[#allocation7 + $0x8]] }
 0x1c1   :  { %v3712_v17 = vpop.permute.xlu1 %764  ;;  %v3714_v27 = vpop.permute.xlu0 %762 }
 0x1c2   :  { %5297 = vst [vmem:[#allocation65_spill] sm:$0xff] %v3712_v17  ;;  %5298 = vst [vmem:[#allocation66_spill] sm:$0xff] %v3714_v27  ;;  %v1295_v27 = vstv %s2871_s21  ;;  %v1323_v17 = vstv %s2873_s23  ;;  %s3865_s21 = sld [smem:[#allocation7 + $0x61]] }
 0x1c3   :  { %1170 = vrot.lane.b32.xlu1 %v1165_v39, %s3106_s9  ;;  %1168 = vrot.lane.b32.xlu0 %v1164_v61, %s3106_s9  ;;  %v1297_v39 = vmul.f32 %v1295_v27, %v3720_v46  ;;  %v1296_v61 = vmul.f32 %v1295_v27, %v3718_v45  ;;  %s3870_s23 = sld [smem:[#allocation7 + $0x89]] }
 0x1c5   :  { %v3724_v28 = vpop.permute.xlu1 %778  ;;  %v3726_v62 = vpop.permute.xlu0 %776 }
 0x1c6   :  { %5300 = vst [vmem:[#allocation68_spill] sm:$0xff] %v3724_v28  ;;  %5301 = vst [vmem:[#allocation69_spill] sm:$0xff] %v3726_v62  ;;  %v1309_v28 = vstv %s2872_s22  ;;  %s3868_s22 = sld [smem:[#allocation7 + $0x9c]] }
 0x1c7   :  { %1288 = vrot.lane.b32.xlu1 %v1283_v6, %s3103_s2  ;;  %1286 = vrot.lane.b32.xlu0 %v1282_v0, %s3103_s2  ;;  %v1311_v6 = vmul.f32 %v1309_v28, %v3720_v46  ;;  %v1310_v0 = vmul.f32 %v1309_v28, %v3718_v45 }
 0x1c9   :  { %v3732_v5 = vpop.permute.xlu1 %792  ;;  %v3734_v29 = vpop.permute.xlu0 %790 }
 0x1ca   :  { %5302 = vst [vmem:[#allocation70_spill] sm:$0xff] %v3732_v5  ;;  %5303 = vst [vmem:[#allocation71_spill] sm:$0xff] %v3734_v29  ;;  %v1337_v5 = vstv %s2874_s24  ;;  %s3874_s24 = sld [smem:[#allocation7 + $0xf]] }
 0x1cb   :  { %1302 = vrot.lane.b32.xlu1 %v1297_v39, %s3103_s2  ;;  %1300 = vrot.lane.b32.xlu0 %v1296_v61, %s3103_s2  ;;  %v1325_v39 = vmul.f32 %v1323_v17, %v3720_v46  ;;  %v1324_v61 = vmul.f32 %v1323_v17, %v3718_v45 }
 0x1cc   :  { %v1491_v11 = vstv %s3868_s22  ;;  %s2904_s22 = sld [smem:[#allocation7 + $0x58]] }
 0x1cd   :  { %v3740_v63 = vpop.permute.xlu1 %806  ;;  %v3742_v62 = vpop.permute.xlu0 %804 }
 0x1ce   :  { %5304 = vst [vmem:[#allocation72_spill] sm:$0xff] %v3740_v63  ;;  %5305 = vst [vmem:[#allocation73_spill] sm:$0xff] %v3742_v62  ;;  %v3754_v63 = vld [vmem:[#allocation2 + $0x19] sm:$0xff]  ;;  %v3756_v62 = vld [vmem:[#allocation2 + $0x21] sm:$0xff] }
 0x1cf   :  { %1316 = vrot.lane.b32.xlu1 %v1311_v6, %s3103_s2  ;;  %1314 = vrot.lane.b32.xlu0 %v1310_v0, %s3103_s2  ;;  %5308 = vst [vmem:[#allocation76_spill] sm:$0xff] %v3754_v63  ;;  %v1339_v0 = vmul.f32 %v1337_v5, %v3756_v62  ;;  %v3963_v32 = vmul.f32 %v1561_v34, %v3754_v63 }
 0x1d0   :  { %v1205_v22 = vstv %s3874_s24  ;;  %v3966_v21 = vmul.f32 %v1575_v24, %v3756_v62  ;;  %s2906_s24 = sld [smem:[#allocation7 + $0x12]] }
 0x1d1   :  { %v3748_v27 = vpop.permute.xlu1 %820  ;;  %v3750_v29 = vpop.permute.xlu0 %818 }
 0x1d2   :  { %5306 = vst [vmem:[#allocation74_spill] sm:$0xff] %v3748_v27  ;;  %5307 = vst [vmem:[#allocation75_spill] sm:$0xff] %v3750_v29  ;;  %v1338_v29 = vmul.f32 %v1337_v5, %v3754_v63  ;;  %v1351_v27 = vstv %s2875_s26  ;;  %s3876_s26 = sld [smem:[#allocation7 + $0x37]] }
 0x1d3   :  { %1330 = vrot.lane.b32.xlu1 %v1325_v39, %s3103_s2  ;;  %1328 = vrot.lane.b32.xlu0 %v1324_v61, %s3103_s2  ;;  %v1353_v39 = vmul.f32 %v1351_v27, %v3756_v62  ;;  %v1352_v61 = vmul.f32 %v1351_v27, %v3754_v63 }
 0x1d5   :  { %v3760_v28 = vpop.permute.xlu1 %834  ;;  %v3762_v6 = vpop.permute.xlu0 %832 }
 0x1d6   :  { %5309 = vst [vmem:[#allocation77_spill] sm:$0xff] %v3760_v28  ;;  %5310 = vst [vmem:[#allocation78_spill] sm:$0xff] %v3762_v6  ;;  %v1365_v28 = vstv %s2876_s27  ;;  %s3878_s27 = sld [smem:[#allocation7 + $0x5f]] }
 0x1d7   :  { %1344 = vrot.lane.b32.xlu1 %v1339_v0, %s3103_s2  ;;  %1342 = vrot.lane.b32.xlu0 %v1338_v29, %s3103_s2  ;;  %v1367_v29 = vmul.f32 %v1365_v28, %v3756_v62  ;;  %v1366_v0 = vmul.f32 %v1365_v28, %v3754_v63 }
 0x1d9   :  { %v3768_v17 = vpop.permute.xlu1 %848  ;;  %v3770_v58 = vpop.permute.xlu0 %846 }
 0x1da   :  { %5311 = vst [vmem:[#allocation79_spill] sm:$0xff] %v3768_v17  ;;  %5312 = vst [vmem:[#allocation80_spill] sm:$0xff] %v3770_v58  ;;  %v1379_v17 = vstv %s2877_s28  ;;  %s3880_s28 = sld [smem:[#allocation7 + $0x87]] }
 0x1db   :  { %1358 = vrot.lane.b32.xlu1 %v1353_v39, %s3103_s2  ;;  %1356 = vrot.lane.b32.xlu0 %v1352_v61, %s3103_s2  ;;  %v1381_v39 = vmul.f32 %v1379_v17, %v3756_v62  ;;  %v1380_v61 = vmul.f32 %v1379_v17, %v3754_v63 }
 0x1dc   :  { %v1217_v18 = vstv %s3878_s27  ;;  %s2908_s27 = sld [smem:[#allocation7 + $0x62]] }
 0x1dd   :  { %v3776_v5 = vpop.permute.xlu1 %862  ;;  %v3778_v6 = vpop.permute.xlu0 %860 }
 0x1de   :  { %5313 = vst [vmem:[#allocation81_spill] sm:$0xff] %v3776_v5  ;;  %5314 = vst [vmem:[#allocation82_spill] sm:$0xff] %v3778_v6  ;;  %v3790_v5 = vld [vmem:[#allocation2 + $0x31] sm:$0xff]  ;;  %v3792_v6 = vld [vmem:[#allocation2 + $0x39] sm:$0xff] }
 0x1df   :  { %1372 = vrot.lane.b32.xlu1 %v1367_v29, %s3103_s2  ;;  %1370 = vrot.lane.b32.xlu0 %v1366_v0, %s3103_s2  ;;  %v1395_v0 = vmul.f32 %v1393_v57, %v3792_v6 }
 0x1e1   :  { %v3784_v27 = vpop.permute.xlu1 %876  ;;  %v3786_v58 = vpop.permute.xlu0 %874 }
 0x1e2   :  { %5315 = vst [vmem:[#allocation83_spill] sm:$0xff] %v3784_v27  ;;  %5316 = vst [vmem:[#allocation84_spill] sm:$0xff] %v3786_v58  ;;  %v1394_v58 = vmul.f32 %v1393_v57, %v3790_v5  ;;  %v1407_v27 = vstv %s2879_s6  ;;  %s3890_s6 = sld [smem:[#allocation7 + $0x43]] }
 0x1e3   :  { %1386 = vrot.lane.b32.xlu1 %v1381_v39, %s3103_s2  ;;  %1384 = vrot.lane.b32.xlu0 %v1380_v61, %s3103_s2  ;;  %v1409_v39 = vmul.f32 %v1407_v27, %v3792_v6  ;;  %v1408_v61 = vmul.f32 %v1407_v27, %v3790_v5 }
 0x1e5   :  { %v3796_v28 = vpop.permute.xlu1 %890  ;;  %v3798_v29 = vpop.permute.xlu0 %888 }
 0x1e6   :  { %5317 = vst [vmem:[#allocation85_spill] sm:$0xff] %v3796_v28  ;;  %5318 = vst [vmem:[#allocation86_spill] sm:$0xff] %v3798_v29  ;;  %v1421_v28 = vstv %s2880_s7  ;;  %s3893_s7 = sld [smem:[#allocation7 + $0x6b]] }
 0x1e7   :  { %1400 = vrot.lane.b32.xlu1 %v1395_v0, %s3103_s2  ;;  %1398 = vrot.lane.b32.xlu0 %v1394_v58, %s3103_s2  ;;  %v1423_v58 = vmul.f32 %v1421_v28, %v3792_v6  ;;  %v1422_v29 = vmul.f32 %v1421_v28, %v3790_v5  ;;  %v3838_v28 = vld [vmem:[#allocation2 + $0x49] sm:$0xff] }
 0x1e8   :  { %v1631_v55 = vstv %s3890_s6  ;;  %s2911_s6 = sld [smem:[#allocation7 + $0x44]] }
 0x1e9   :  { %v3804_v17 = vpop.permute.xlu1 %904  ;;  %v3806_v52 = vpop.permute.xlu0 %902 }
 0x1ea   :  { %5319 = vst [vmem:[#allocation87_spill] sm:$0xff] %v3804_v17  ;;  %5320 = vst [vmem:[#allocation88_spill] sm:$0xff] %v3806_v52  ;;  %v1435_v52 = vstv %s2881_s8  ;;  %s3895_s8 = sld [smem:[#allocation7 + $0x93]]  ;;  %v1179_v17 = vstv %s3845_s3 }
 0x1eb   :  { %1414 = vrot.lane.b32.xlu1 %v1409_v39, %s3103_s2  ;;  %1412 = vrot.lane.b32.xlu0 %v1408_v61, %s3103_s2  ;;  %v1437_v61 = vmul.f32 %v1435_v52, %v3792_v6  ;;  %s4234_s3 = sld [smem:[#allocation7 + $0x4b]] }
 0x1ec   :  { %v1645_v40 = vstv %s3893_s7  ;;  %s2912_s7 = sld [smem:[#allocation7 + $0x6c]] }
 0x1ed   :  { %v3814_v57 = vpop.permute.xlu1 %918  ;;  %v3816_v0 = vpop.permute.xlu0 %916 }
 0x1ee   :  { %5321 = vst [vmem:[#allocation89_spill] sm:$0xff] %v3814_v57  ;;  %5322 = vst [vmem:[#allocation90_spill] sm:$0xff] %v3816_v0  ;;  %v1436_v0 = vmul.f32 %v1435_v52, %v3790_v5 }
 0x1ef   :  { %1428 = vrot.lane.b32.xlu1 %v1423_v58, %s3103_s2  ;;  %1426 = vrot.lane.b32.xlu0 %v1422_v29, %s3103_s2  ;;  %v3840_v58 = vld [vmem:[#allocation2 + $0x51] sm:$0xff]  ;;  %v1449_v29 = vstv %s3810_s10  ;;  %s3900_s10 = sld [smem:[#allocation7 + $0x19]] }
 0x1f0   :  { %v1450_v57 = vmul.f32 %v1449_v29, %v3838_v28  ;;  %v1493_v23 = vmul.f32 %v1491_v11, %v3840_v58  ;;  %v1659_v60 = vstv %s3895_s8  ;;  %s2913_s8 = sld [smem:[#allocation7 + $0x94]] }
 0x1f1   :  { %v3828_v27 = vpop.permute.xlu1 %932  ;;  %v3830_v39 = vpop.permute.xlu0 %930 }
 0x1f2   :  { %5323 = vst [vmem:[#allocation91_spill] sm:$0xff] %v3828_v27  ;;  %5324 = vst [vmem:[#allocation92_spill] sm:$0xff] %v3830_v39  ;;  %v1451_v27 = vmul.f32 %v1449_v29, %v3840_v58 }
 0x1f3   :  { %1442 = vrot.lane.b32.xlu1 %v1437_v61, %s3103_s2  ;;  %1440 = vrot.lane.b32.xlu0 %v1436_v0, %s3103_s2  ;;  %v1463_v0 = vstv %s3820_s11  ;;  %s3922_s11 = sld [smem:[#allocation7 + $0x25]] }
 0x1f5   :  { %v3857_v52 = vpop.permute.xlu1 %946  ;;  %v3859_v39 = vpop.permute.xlu0 %944  ;;  %v1231_v51 = vstv %s3900_s10  ;;  %s2914_s10 = sld [smem:[#allocation7 + $0x26]] }
 0x1f6   :  { %5325 = vst [vmem:[#allocation93_spill] sm:$0xff] %v3857_v52  ;;  %5326 = vst [vmem:[#allocation94_spill] sm:$0xff] %v3859_v39  ;;  %v1477_v39 = vstv %s3843_s1  ;;  %v1519_v52 = vstv %s3826_s13  ;;  %s4132_s13 = sld [smem:[#allocation7 + $0x41]]  ;;  %s4208_s1 = sld [smem:[#allocation7 + $0x4d]] }
 0x1f7   :  { %1456 = vrot.lane.b32.xlu1 %v1451_v27, %s3103_s2  ;;  %1454 = vrot.lane.b32.xlu0 %v1450_v57, %s3103_s2  ;;  %v1465_v27 = vmul.f32 %v1463_v0, %v3840_v58  ;;  %v1464_v57 = vmul.f32 %v1463_v0, %v3838_v28  ;;  %v1505_v0 = vstv %s3824_s12  ;;  %v1521_v8 = vmul.f32 %v1519_v52, %v3720_v46  ;;  %s3946_s12 = sld [smem:[#allocation7 + $0x23]] }
 0x1f8   :  { %v1507_v53 = vmul.f32 %v1505_v0, %v3720_v46  ;;  %v1506_v44 = vmul.f32 %v1505_v0, %v3718_v45 }
 0x1f9   :  { %v3882_v61 = vpop.permute.xlu1 %960  ;;  %v3884_v29 = vpop.permute.xlu0 %958 }
 0x1fa   :  { %5327 = vst [vmem:[#allocation95_spill] sm:$0xff] %v3882_v61  ;;  %5328 = vst [vmem:[#allocation96_spill] sm:$0xff] %v3884_v29  ;;  %v1533_v29 = vstv %s3834_s14  ;;  %v1547_v61 = vstv %s3836_s0  ;;  %s4157_s14 = sld [smem:[#allocation7 + $0x69]] }
 0x1fb   :  { %1470 = vrot.lane.b32.xlu1 %v1465_v27, %s3103_s2  ;;  %1468 = vrot.lane.b32.xlu0 %v1464_v57, %s3103_s2  ;;  %v1479_v27 = vmul.f32 %v1477_v39, %v3840_v58  ;;  %v1478_v57 = vmul.f32 %v1477_v39, %v3838_v28  ;;  %v1211_v39 = vstv %s3876_s26  ;;  %v3950_v33 = vmul.f32 %v1547_v61, %v3720_v46  ;;  %s4183_s0 = sld [smem:[#allocation7 + $0x91]]  ;;  %s2907_s26 = sld [smem:[#allocation7 + $0x3a]] }
 0x1fc   :  { %v3953_v0 = vmul.f32 %v1547_v61, %v3718_v45 }
 0x1fd   :  { %v3906_v38 = vpop.permute.xlu1 %974  ;;  %v3908_v31 = vpop.permute.xlu0 %972 }
 0x1fe   :  { %5329 = vst [vmem:[#allocation97_spill] sm:$0xff] %v3906_v38  ;;  %5330 = vst [vmem:[#allocation98_spill] sm:$0xff] %v3908_v31  ;;  %v1589_v31 = vstv %s3865_s21  ;;  %v1603_v38 = vstv %s3870_s23  ;;  %s2903_s21 = sld [smem:[#allocation7 + $0x30]] }
 0x1ff   :  { %1484 = vrot.lane.b32.xlu1 %v1479_v27, %s3103_s2  ;;  %1482 = vrot.lane.b32.xlu0 %v1478_v57, %s3103_s2  ;;  %v1492_v27 = vmul.f32 %v1491_v11, %v3838_v28  ;;  %v1617_v57 = vstv %s3888_s5  ;;  %v1534_v11 = vmul.f32 %v1533_v29, %v3718_v45  ;;  %5333 = vst [vmem:[#allocation101_spill] sm:$0xff] %v3953_v0  ;;  %s2905_s23 = sld [smem:[#allocation7 + $0x80]]  ;;  %s2910_s5 = sld [smem:[#allocation7 + $0x1c]] }
 0x200   :  { %v3972_v61 = vmul.f32 %v1589_v31, %v3756_v62  ;;  %v3975_v0 = vmul.f32 %v1589_v31, %v3754_v63  ;;  %v3992_v31 = vmul.f32 %v1179_v17, %v3720_v46 }
 0x201   :  { %v3928_v16 = vpop.permute.xlu1 %988  ;;  %v3930_v13 = vpop.permute.xlu0 %986 }
 0x202   :  { %5331 = vst [vmem:[#allocation99_spill] sm:$0xff] %v3928_v16  ;;  %5332 = vst [vmem:[#allocation100_spill] sm:$0xff] %v3930_v13  ;;  %v1520_v13 = vmul.f32 %v1519_v52, %v3718_v45  ;;  %v1535_v16 = vmul.f32 %v1533_v29, %v3720_v46  ;;  %v3969_v29 = vmul.f32 %v1575_v24, %v3754_v63 }
 0x203   :  { %1498 = vrot.lane.b32.xlu1 %v1493_v23, %s3103_s2  ;;  %1496 = vrot.lane.b32.xlu0 %v1492_v27, %s3103_s2  ;;  %v3956_v23 = vmul.f32 %v1561_v34, %v3756_v62  ;;  %v3984_v34 = vmul.f32 %v1617_v57, %v3792_v6  ;;  %v3989_v24 = vmul.f32 %v1617_v57, %v3790_v5 }
 0x204   :  { %5339 = vst [vmem:[#allocation107_spill] sm:$0xff] %v3992_v31 }
 0x205   :  { %5334 = vst [vmem:[#allocation102_spill] sm:$0xff] %v3956_v23  ;;  %v3958_v27 = vpop.permute.xlu1 %1002  ;;  %v3960_v52 = vpop.permute.xlu0 %1000  ;;  %v3978_v23 = vmul.f32 %v1603_v38, %v3756_v62  ;;  %5338 = vst [vmem:[#allocation106_spill] sm:$0xff] %v3984_v34  ;;  %v4002_v34 = vmul.f32 %v1205_v22, %v3754_v63 }
 0x206   :  { %5335 = vst [vmem:[#allocation103_spill] sm:$0xff] %v3958_v27  ;;  %5336 = vst [vmem:[#allocation104_spill] sm:$0xff] %v3960_v52  ;;  %v3981_v52 = vmul.f32 %v1603_v38, %v3754_v63  ;;  %v3995_v27 = vmul.f32 %v1205_v22, %v3756_v62  ;;  %v3999_v38 = vmul.f32 %v1179_v17, %v3718_v45 }
 0x207   :  { %5337 = vst [vmem:[#allocation105_spill] sm:$0xff] %v3978_v23  ;;  %1512 = vrot.lane.b32.xlu1 %v1507_v53, %s3104_s25  ;;  %1510 = vrot.lane.b32.xlu0 %v1506_v44, %s3104_s25  ;;  %v1673_v23 = vstv %s3922_s11  ;;  %5342 = vst [vmem:[#allocation110_spill] sm:$0xff] %v4002_v34  ;;  %v4005_v44 = vmul.f32 %v1631_v55, %v3792_v6  ;;  %v4008_v53 = vmul.f32 %v1631_v55, %v3790_v5  ;;  %s2915_s11 = sld [smem:[#allocation7 + $0x4e]] }
 0x208   :  { %5340 = vst [vmem:[#allocation108_spill] sm:$0xff] %v3995_v27  ;;  %5341 = vst [vmem:[#allocation109_spill] sm:$0xff] %v3999_v38  ;;  %v4015_v27 = vmul.f32 %v1185_v30, %v3720_v46  ;;  %v4018_v17 = vmul.f32 %v1211_v39, %v3756_v62  ;;  %v4021_v22 = vmul.f32 %v1185_v30, %v3718_v45 }
 0x209   :  { %5343 = vst [vmem:[#allocation111_spill] sm:$0xff] %v4008_v53  ;;  %v4010_v57 = vpop.permute.xlu1 %1016  ;;  %v4012_v31 = vpop.permute.xlu0 %1014  ;;  %v4024_v34 = vmul.f32 %v1211_v39, %v3754_v63  ;;  %v4027_v55 = vmul.f32 %v1645_v40, %v3792_v6  ;;  %v4030_v38 = vmul.f32 %v1645_v40, %v3790_v5  ;;  %v5348_v53 = vstv %s3851_s17  ;;  %s4279_s17 = sld [smem:[#allocation7 + $0x73]] }
 0x20a   :  { %5344 = vst [vmem:[#allocation112_spill] sm:$0xff] %v4015_v27  ;;  %5345 = vst [vmem:[#allocation113_spill] sm:$0xff] %v4018_v17  ;;  %v4035_v27 = vmul.f32 %v5348_v53, %v3720_v46  ;;  %v4038_v17 = vmul.f32 %v1217_v18, %v3756_v62  ;;  %v5350_v30 = vmov %v5348_v53  ;;  %v4051_v40 = vmul.f32 %v1659_v60, %v3792_v6 }
 0x20b   :  { %5346 = vst [vmem:[#allocation114_spill] sm:$0xff] %v4021_v22  ;;  %5347 = vst [vmem:[#allocation115_spill] sm:$0xff] %v4024_v34  ;;  %1526 = vrot.lane.b32.xlu1 %v1521_v8, %s3104_s25  ;;  %1524 = vrot.lane.b32.xlu0 %v1520_v13, %s3104_s25  ;;  %v4045_v39 = vmul.f32 %v5350_v30, %v3718_v45  ;;  %v4048_v34 = vmul.f32 %v1217_v18, %v3754_v63  ;;  %v1257_v22 = vstv %s3946_s12  ;;  %s2916_s12 = sld [smem:[#allocation7 + $0x76]] }
 0x20c   :  { %5349 = vst [vmem:[#allocation116_spill] sm:$0xff] %v4038_v17  ;;  %v293_v53 = vadd.f32 %v3440_v35, %v3300_v36  ;;  %v292_v17 = vadd.f32 %v3442_v37, %v3308_v42  ;;  %v4059_v8 = vmul.f32 %v1659_v60, %v3790_v5  ;;  %v5353_v13 = vstv %s3855_s19  ;;  %s4338_s19 = sld [smem:[#allocation7 + $0x9d]] }
 0x20d   :  { %5351 = vst [vmem:[#allocation117_spill] sm:$0xff] %v4045_v39  ;;  %5352 = vst [vmem:[#allocation118_spill] sm:$0xff] %v4048_v34  ;;  %v4064_v30 = vmul.f32 %v5353_v13, %v3720_v46  ;;  %v4066_v39 = vpop.permute.xlu1 %1030  ;;  %v4068_v18 = vpop.permute.xlu0 %1028  ;;  %v5354_v63 = vstv %s3880_s28  ;;  %v5355_v36 = vmov %v5353_v13  ;;  %v4081_v42 = vmul.f32 %v1673_v23, %v3840_v58 }
 0x20e   :  { %v4073_v34 = vmul.f32 %v5354_v63, %v3756_v62  ;;  %v4078_v35 = vmul.f32 %v5355_v36, %v3718_v45  ;;  %v4084_v37 = vmul.f32 %v1673_v23, %v3838_v28  ;;  %v349_v60 = vadd.f32 %v3472_v1, %v293_v53 }
 0x20f   :  { %v348_v13 = vadd.f32 %v3474_v2, %v292_v17  ;;  %v4089_v46 = vmul.f32 %v1231_v51, %v3792_v6  ;;  %v4092_v63 = vmul.f32 %v1257_v22, %v3840_v58  ;;  %v307_v36 = vadd.f32 %v3448_v41, %v3320_v49  ;;  %1540 = vrot.lane.b32.xlu1 %v1535_v16, %s3104_s25 }
 0x210   :  { %1538 = vrot.lane.b32.xlu0 %v1534_v11, %s3104_s25  ;;  %v4099_v23 = vmul.f32 %v1231_v51, %v3790_v5  ;;  %v4102_v1 = vmul.f32 %v1257_v22, %v3838_v28  ;;  %v306_v2 = vadd.f32 %v3450_v43, %v3328_v54  ;;  %v321_v17 = vadd.f32 %v3456_v47, %v3347_v12 }
 0x211   :  { %v405_v53 = vadd.f32 %v3504_v25, %v349_v60  ;;  %v404_v49 = vadd.f32 %v3506_v26, %v348_v13  ;;  %v320_v41 = vadd.f32 %v3458_v48, %v3350_v15  ;;  %v335_v16 = vadd.f32 %v3464_v50, %v3356_v4  ;;  %v4117_v22 = vpop.permute.xlu1 %1044  ;;  %v4119_v54 = vpop.permute.xlu0 %1042  ;;  %v5356_v50 = vld [vmem:[#allocation16_spill] sm:$0xff]  ;;  %v5360_v26 = vld [vmem:[#allocation29_spill] sm:$0xff]  ;;  %v5362_v60 = vld [vmem:[#allocation19_spill] sm:$0xff] }
 0x212   :  { %v334_v51 = vadd.f32 %v3466_v59, %v3358_v20  ;;  %v363_v11 = vadd.f32 %v3480_v7, %v307_v36  ;;  %v362_v12 = vadd.f32 %v3482_v10, %v306_v2  ;;  %v377_v43 = vadd.f32 %v3488_v14, %v321_v17  ;;  %v5357_v59 = vld [vmem:[#allocation101_spill] sm:$0xff]  ;;  %v5359_v14 = vld [vmem:[#allocation18_spill] sm:$0xff]  ;;  %v5363_v13 = vld [vmem:[#allocation20_spill] sm:$0xff] }
 0x213   :  { %v461_v47 = vadd.f32 %v3536_v56, %v405_v53  ;;  %v460_v15 = vadd.f32 %v3538_v3, %v404_v49  ;;  %v376_v48 = vadd.f32 %v3490_v9, %v320_v41  ;;  %v391_v4 = vadd.f32 %v3496_v19, %v335_v16  ;;  %1554 = vrot.lane.b32.xlu1 %v3950_v33, %s3104_s25  ;;  %v5358_v7 = vld [vmem:[#allocation17_spill] sm:$0xff]  ;;  %v5361_v3 = vld [vmem:[#allocation30_spill] sm:$0xff]  ;;  %v5366_v16 = vld [vmem:[#allocation23_spill] sm:$0xff] }
 0x214   :  { %v390_v20 = vadd.f32 %v5356_v50, %v334_v51  ;;  %1552 = vrot.lane.b32.xlu0 %v5357_v59, %s3104_s25  ;;  %v419_v10 = vadd.f32 %v5358_v7, %v363_v11  ;;  %v418_v25 = vadd.f32 %v5359_v14, %v362_v12  ;;  %v433_v19 = vadd.f32 %v5362_v60, %v377_v43  ;;  %v5364_v2 = vld [vmem:[#allocation21_spill] sm:$0xff]  ;;  %v5365_v33 = vld [vmem:[#allocation22_spill] sm:$0xff]  ;;  %v5367_v11 = vld [vmem:[#allocation24_spill] sm:$0xff] }
 0x215   :  { %v517_v56 = vadd.f32 %v5360_v26, %v461_v47  ;;  %v516_v9 = vadd.f32 %v5361_v3, %v460_v15  ;;  %v432_v36 = vadd.f32 %v5363_v13, %v376_v48  ;;  %v447_v17 = vadd.f32 %v5364_v2, %v391_v4  ;;  %v4142_v49 = vpop.permute.xlu1 %1058  ;;  %v4144_v41 = vpop.permute.xlu0 %1056  ;;  %v5368_v50 = vld [vmem:[#allocation37_spill] sm:$0xff]  ;;  %v5369_v59 = vld [vmem:[#allocation38_spill] sm:$0xff]  ;;  %v5372_v26 = vld [vmem:[#allocation27_spill] sm:$0xff] }
 0x216   :  { %v446_v53 = vadd.f32 %v5365_v33, %v390_v20  ;;  %v475_v51 = vadd.f32 %v5366_v16, %v419_v10  ;;  %v474_v12 = vadd.f32 %v5367_v11, %v418_v25  ;;  %v5370_v7 = vld [vmem:[#allocation25_spill] sm:$0xff]  ;;  %v5371_v14 = vld [vmem:[#allocation26_spill] sm:$0xff]  ;;  %v5374_v10 = vld [vmem:[#allocation31_spill] sm:$0xff] }
 0x217   :  { %v573_v47 = vadd.f32 %v5368_v50, %v517_v56  ;;  %v572_v15 = vadd.f32 %v5369_v59, %v516_v9  ;;  %v489_v43 = vadd.f32 %v5370_v7, %v433_v19  ;;  %v488_v48 = vadd.f32 %v5371_v14, %v432_v36  ;;  %v5373_v20 = vld [vmem:[#allocation102_spill] sm:$0xff]  ;;  %v5375_v3 = vld [vmem:[#allocation32_spill] sm:$0xff]  ;;  %v5376_v60 = vld [vmem:[#allocation45_spill] sm:$0xff] }
 0x218   :  { %v503_v4 = vadd.f32 %v5372_v26, %v447_v17  ;;  %1568 = vrot.lane.b32.xlu1 %v5373_v20, %s3104_s25  ;;  %1566 = vrot.lane.b32.xlu0 %v3963_v32, %s3104_s25  ;;  %v531_v25 = vadd.f32 %v5374_v10, %v475_v51  ;;  %v530_v56 = vadd.f32 %v5375_v3, %v474_v12  ;;  %v5377_v13 = vld [vmem:[#allocation46_spill] sm:$0xff]  ;;  %v5378_v2 = vld [vmem:[#allocation28_spill] sm:$0xff]  ;;  %v5379_v17 = vld [vmem:[#allocation33_spill] sm:$0xff] }
 0x219   :  { %v629_v9 = vadd.f32 %v5376_v60, %v573_v47  ;;  %v628_v19 = vadd.f32 %v5377_v13, %v572_v15  ;;  %v502_v36 = vadd.f32 %v5378_v2, %v446_v53  ;;  %v545_v33 = vadd.f32 %v5379_v17, %v489_v43  ;;  %v5380_v16 = vld [vmem:[#allocation34_spill] sm:$0xff]  ;;  %v5381_v50 = vld [vmem:[#allocation35_spill] sm:$0xff]  ;;  %v4167_v32 = vpop.permute.xlu1 %1072  ;;  %v4169_v7 = vpop.permute.xlu0 %1070  ;;  %v5383_v12 = vld [vmem:[#allocation40_spill] sm:$0xff] }
 0x21a   :  { %v544_v11 = vadd.f32 %v5380_v16, %v488_v48  ;;  %v559_v59 = vadd.f32 %v5381_v50, %v503_v4  ;;  %v5382_v51 = vld [vmem:[#allocation39_spill] sm:$0xff]  ;;  %v586_v26 = vadd.f32 %v5383_v12, %v530_v56  ;;  %v5384_v47 = vld [vmem:[#allocation53_spill] sm:$0xff]  ;;  %v5385_v15 = vld [vmem:[#allocation54_spill] sm:$0xff]  ;;  %v1237_v4 = vstv %s4132_s13  ;;  %s2917_s13 = sld [smem:[#allocation7 + $0x9e]] }
 0x21b   :  { %v587_v14 = vadd.f32 %v5382_v51, %v531_v25  ;;  %v685_v20 = vadd.f32 %v5384_v47, %v629_v9  ;;  %v684_v10 = vadd.f32 %v5385_v15, %v628_v19  ;;  %v5386_v3 = vld [vmem:[#allocation36_spill] sm:$0xff]  ;;  %v5387_v60 = vld [vmem:[#allocation41_spill] sm:$0xff]  ;;  %v5388_v13 = vld [vmem:[#allocation42_spill] sm:$0xff] }
 0x21c   :  { %v558_v53 = vadd.f32 %v5386_v3, %v502_v36  ;;  %v601_v43 = vadd.f32 %v5387_v60, %v545_v33  ;;  %v600_v48 = vadd.f32 %v5388_v13, %v544_v11  ;;  %1582 = vrot.lane.b32.xlu1 %v3966_v21, %s3104_s25  ;;  %1580 = vrot.lane.b32.xlu0 %v3969_v29, %s3104_s25  ;;  %v5389_v25 = vld [vmem:[#allocation47_spill] sm:$0xff]  ;;  %v5390_v9 = vld [vmem:[#allocation48_spill] sm:$0xff]  ;;  %v5391_v19 = vld [vmem:[#allocation61_spill] sm:$0xff] }
 0x21d   :  { %v643_v56 = vadd.f32 %v5389_v25, %v587_v14  ;;  %v642_v2 = vadd.f32 %v5390_v9, %v586_v26  ;;  %v741_v17 = vadd.f32 %v5391_v19, %v685_v20  ;;  %v5392_v36 = vld [vmem:[#allocation62_spill] sm:$0xff]  ;;  %v5393_v33 = vld [vmem:[#allocation43_spill] sm:$0xff]  ;;  %v5394_v11 = vld [vmem:[#allocation44_spill] sm:$0xff]  ;;  %v4193_v15 = vpop.permute.xlu1 %1086  ;;  %v4195_v3 = vpop.permute.xlu0 %1084 }
 0x21e   :  { %v740_v16 = vadd.f32 %v5392_v36, %v684_v10  ;;  %v615_v50 = vadd.f32 %v5393_v33, %v559_v59  ;;  %v614_v51 = vadd.f32 %v5394_v11, %v558_v53  ;;  %v5395_v21 = vld [vmem:[#allocation49_spill] sm:$0xff]  ;;  %v5396_v47 = vld [vmem:[#allocation50_spill] sm:$0xff]  ;;  %v5397_v14 = vld [vmem:[#allocation55_spill] sm:$0xff] }
 0x21f   :  { %v657_v12 = vadd.f32 %v5395_v21, %v601_v43  ;;  %v656_v29 = vadd.f32 %v5396_v47, %v600_v48  ;;  %v699_v60 = vadd.f32 %v5397_v14, %v643_v56  ;;  %v5398_v26 = vld [vmem:[#allocation56_spill] sm:$0xff]  ;;  %v5399_v20 = vld [vmem:[#allocation70_spill] sm:$0xff]  ;;  %v5400_v10 = vld [vmem:[#allocation71_spill] sm:$0xff] }
 0x220   :  { %v698_v13 = vadd.f32 %v5398_v26, %v642_v2  ;;  %v797_v25 = vadd.f32 %v5399_v20, %v741_v17  ;;  %v796_v9 = vadd.f32 %v5400_v10, %v740_v16  ;;  %v5401_v59 = vld [vmem:[#allocation51_spill] sm:$0xff]  ;;  %v5402_v36 = vld [vmem:[#allocation52_spill] sm:$0xff]  ;;  %v5403_v33 = vld [vmem:[#allocation57_spill] sm:$0xff]  ;;  %1596 = vrot.lane.b32.xlu1 %v3972_v61, %s3104_s25  ;;  %1594 = vrot.lane.b32.xlu0 %v3975_v0, %s3104_s25 }
 0x221   :  { %v671_v19 = vadd.f32 %v5401_v59, %v615_v50  ;;  %v670_v53 = vadd.f32 %v5402_v36, %v614_v51  ;;  %v713_v43 = vadd.f32 %v5403_v33, %v657_v12  ;;  %v5404_v56 = vld [vmem:[#allocation63_spill] sm:$0xff]  ;;  %v5405_v17 = vld [vmem:[#allocation64_spill] sm:$0xff]  ;;  %v5408_v51 = vld [vmem:[#allocation58_spill] sm:$0xff]  ;;  %v4219_v59 = vpop.permute.xlu1 %1100  ;;  %v4221_v36 = vpop.permute.xlu0 %1098 }
 0x222   :  { %v755_v2 = vadd.f32 %v5404_v56, %v699_v60  ;;  %v754_v11 = vadd.f32 %v5405_v17, %v698_v13  ;;  %v5406_v16 = vld [vmem:[#allocation79_spill] sm:$0xff]  ;;  %v5407_v50 = vld [vmem:[#allocation80_spill] sm:$0xff]  ;;  %v712_v14 = vadd.f32 %v5408_v51, %v656_v29  ;;  %v5411_v10 = vld [vmem:[#allocation65_spill] sm:$0xff] }
 0x223   :  { %v853_v21 = vadd.f32 %v5406_v16, %v797_v25  ;;  %v852_v47 = vadd.f32 %v5407_v50, %v796_v9  ;;  %v5409_v12 = vld [vmem:[#allocation59_spill] sm:$0xff]  ;;  %v5410_v61 = vld [vmem:[#allocation60_spill] sm:$0xff]  ;;  %v769_v0 = vadd.f32 %v5411_v10, %v713_v43  ;;  %v5413_v13 = vld [vmem:[#allocation73_spill] sm:$0xff] }
 0x224   :  { %v727_v26 = vadd.f32 %v5409_v12, %v671_v19  ;;  %v726_v20 = vadd.f32 %v5410_v61, %v670_v53  ;;  %v5412_v60 = vld [vmem:[#allocation72_spill] sm:$0xff]  ;;  %v810_v56 = vadd.f32 %v5413_v13, %v754_v11  ;;  %v5414_v25 = vld [vmem:[#allocation87_spill] sm:$0xff]  ;;  %v5416_v29 = vld [vmem:[#allocation66_spill] sm:$0xff]  ;;  %1608 = vrot.lane.b32.xlu0 %v3981_v52, %s3104_s25 }
 0x225   :  { %v811_v33 = vadd.f32 %v5412_v60, %v755_v2  ;;  %v909_v17 = vadd.f32 %v5414_v25, %v853_v21  ;;  %v5415_v9 = vld [vmem:[#allocation88_spill] sm:$0xff]  ;;  %v768_v50 = vadd.f32 %v5416_v29, %v712_v14  ;;  %v5418_v12 = vld [vmem:[#allocation69_spill] sm:$0xff]  ;;  %v5421_v21 = vld [vmem:[#allocation82_spill] sm:$0xff]  ;;  %v4245_v48 = vpop.permute.xlu0 %1112 }
 0x226   :  { %v908_v16 = vadd.f32 %v5415_v9, %v852_v47  ;;  %v5417_v51 = vld [vmem:[#allocation68_spill] sm:$0xff]  ;;  %v782_v53 = vadd.f32 %v5418_v12, %v726_v20  ;;  %v5419_v43 = vld [vmem:[#allocation105_spill] sm:$0xff]  ;;  %v866_v10 = vadd.f32 %v5421_v21, %v810_v56  ;;  %v5422_v47 = vld [vmem:[#allocation95_spill] sm:$0xff] }
 0x227   :  { %v783_v19 = vadd.f32 %v5417_v51, %v727_v26  ;;  %1610 = vrot.lane.b32.xlu1 %v5419_v43, %s3104_s25  ;;  %v5420_v11 = vld [vmem:[#allocation81_spill] sm:$0xff]  ;;  %v965_v60 = vadd.f32 %v5422_v47, %v909_v17  ;;  %v5423_v14 = vld [vmem:[#allocation96_spill] sm:$0xff]  ;;  %v5424_v26 = vld [vmem:[#allocation74_spill] sm:$0xff]  ;;  %v1115_v43 = vpop.permute.xlu1 %1114 }
 0x228   :  { %v867_v61 = vadd.f32 %v5420_v11, %v811_v33  ;;  %v964_v13 = vadd.f32 %v5423_v14, %v908_v16  ;;  %v825_v20 = vadd.f32 %v5424_v26, %v769_v0  ;;  %v5425_v25 = vld [vmem:[#allocation75_spill] sm:$0xff]  ;;  %v5426_v29 = vld [vmem:[#allocation77_spill] sm:$0xff]  ;;  %v5427_v12 = vld [vmem:[#allocation78_spill] sm:$0xff]  ;;  %1622 = vrot.lane.b32.xlu0 %v3989_v24, %s3104_s25 }
 0x229   :  { %v824_v9 = vadd.f32 %v5425_v25, %v768_v50  ;;  %v839_v51 = vadd.f32 %v5426_v29, %v783_v19  ;;  %v838_v52 = vadd.f32 %v5427_v12, %v782_v53  ;;  %v5428_v2 = vld [vmem:[#allocation89_spill] sm:$0xff]  ;;  %v5429_v11 = vld [vmem:[#allocation90_spill] sm:$0xff]  ;;  %v1021_v17 = vadd.f32 %v4010_v57, %v965_v60  ;;  %v5430_v21 = vld [vmem:[#allocation83_spill] sm:$0xff] }
 0x22a   :  { %v923_v33 = vadd.f32 %v5428_v2, %v867_v61  ;;  %v922_v56 = vadd.f32 %v5429_v11, %v866_v10  ;;  %v1020_v16 = vadd.f32 %v4012_v31, %v964_v13  ;;  %v881_v47 = vadd.f32 %v5430_v21, %v825_v20  ;;  %v5431_v0 = vld [vmem:[#allocation84_spill] sm:$0xff]  ;;  %v5432_v50 = vld [vmem:[#allocation85_spill] sm:$0xff]  ;;  %v5433_v19 = vld [vmem:[#allocation106_spill] sm:$0xff]  ;;  %v1127_v21 = vpop.permute.xlu0 %1126 }
 0x22b   :  { %v880_v14 = vadd.f32 %v5431_v0, %v824_v9  ;;  %v895_v26 = vadd.f32 %v5432_v50, %v839_v51  ;;  %1624 = vrot.lane.b32.xlu1 %v5433_v19, %s3104_s25  ;;  %v1687_v53 = vstv %s4208_s1  ;;  %v5434_v2 = vld [vmem:[#allocation97_spill] sm:$0xff]  ;;  %v5435_v57 = vld [vmem:[#allocation98_spill] sm:$0xff]  ;;  %v1077_v31 = vadd.f32 %v4167_v32, %v1021_v17  ;;  %v5437_v25 = vld [vmem:[#allocation91_spill] sm:$0xff]  ;;  %v1129_v11 = vpop.permute.xlu1 %1128  ;;  %s2920_s1 = sld [smem:[#allocation7 + $0x59]] }
 0x22c   :  { %v979_v61 = vadd.f32 %v5434_v2, %v923_v33  ;;  %v978_v10 = vadd.f32 %v5435_v57, %v922_v56  ;;  %v1076_v60 = vadd.f32 %v4169_v7, %v1020_v16  ;;  %v5436_v13 = vld [vmem:[#allocation86_spill] sm:$0xff]  ;;  %v937_v9 = vadd.f32 %v5437_v25, %v881_v47  ;;  %v5438_v29 = vld [vmem:[#allocation92_spill] sm:$0xff]  ;;  %v5439_v12 = vld [vmem:[#allocation93_spill] sm:$0xff] }
 0x22d   :  { %v894_v20 = vadd.f32 %v5436_v13, %v838_v52  ;;  %v936_v51 = vadd.f32 %v5438_v29, %v880_v14  ;;  %v951_v24 = vadd.f32 %v5439_v12, %v895_v26  ;;  %v1133_v56 = vadd.f32 %v1129_v11, %v1077_v31  ;;  %v5440_v32 = vld [vmem:[#allocation94_spill] sm:$0xff]  ;;  %v5441_v7 = vld [vmem:[#allocation99_spill] sm:$0xff]  ;;  %v5442_v19 = vld [vmem:[#allocation100_spill] sm:$0xff] }
 0x22e   :  { %v1035_v0 = vadd.f32 %v4066_v39, %v979_v61  ;;  %v1034_v33 = vadd.f32 %v4068_v18, %v978_v10  ;;  %v1132_v50 = vadd.f32 %v1127_v21, %v1076_v60  ;;  %v993_v16 = vadd.f32 %v5441_v7, %v937_v9  ;;  %v5443_v47 = vld [vmem:[#allocation111_spill] sm:$0xff]  ;;  %v5445_v61 = vld [vmem:[#allocation109_spill] sm:$0xff]  ;;  %v5447_v60 = vld [vmem:[#allocation104_spill] sm:$0xff]  ;;  %v1141_v9 = vpop.permute.xlu0 %1140 }
 0x22f   :  { %v950_v17 = vadd.f32 %v5440_v32, %v894_v20  ;;  %v992_v52 = vadd.f32 %v5442_v19, %v936_v51  ;;  %1638 = vrot.lane.b32.xlu1 %v4005_v44, %s3104_s25  ;;  %1636 = vrot.lane.b32.xlu0 %v5443_v47, %s3104_s25  ;;  %v1263_v14 = vstv %s4234_s3  ;;  %v5444_v26 = vld [vmem:[#allocation107_spill] sm:$0xff]  ;;  %v1143_v25 = vpop.permute.xlu1 %1142  ;;  %v5448_v29 = vld [vmem:[#allocation108_spill] sm:$0xff]  ;;  %v1238_v7 = vmul.f32 %v1237_v4, %v3790_v5  ;;  %s2921_s3 = sld [smem:[#allocation7 + $0x81]] }
 0x230   :  { %v1091_v39 = vadd.f32 %v4193_v15, %v1035_v0  ;;  %v1090_v18 = vadd.f32 %v4195_v3, %v1034_v33  ;;  %v1183_v2 = vadd.f32 %v5444_v26, %v1133_v56  ;;  %v1182_v57 = vadd.f32 %v5445_v61, %v1132_v50  ;;  %v5446_v10 = vld [vmem:[#allocation103_spill] sm:$0xff]  ;;  %v5449_v15 = vld [vmem:[#allocation110_spill] sm:$0xff]  ;;  %v5454_v26 = vld [vmem:[#allocation117_spill] sm:$0xff] }
 0x231   :  { %v1007_v31 = vadd.f32 %v5446_v10, %v951_v24  ;;  %v1006_v13 = vadd.f32 %v5447_v60, %v950_v17  ;;  %v1049_v44 = vadd.f32 %v4117_v22, %v993_v16  ;;  %v1048_v20 = vadd.f32 %v4119_v54, %v992_v52  ;;  %v5450_v54 = vld [vmem:[#allocation112_spill] sm:$0xff]  ;;  %v5451_v56 = vld [vmem:[#allocation114_spill] sm:$0xff]  ;;  %v5452_v16 = vld [vmem:[#allocation113_spill] sm:$0xff] }
 0x232   :  { %v1209_v51 = vadd.f32 %v5448_v29, %v1183_v2  ;;  %v1208_v12 = vadd.f32 %v5449_v15, %v1182_v57  ;;  %v1147_v3 = vadd.f32 %v1143_v25, %v1091_v39  ;;  %v1146_v11 = vadd.f32 %v1141_v9, %v1090_v18  ;;  %v5453_v52 = vld [vmem:[#allocation115_spill] sm:$0xff]  ;;  %v5459_v29 = vld [vmem:[#allocation76_spill] sm:$0xff] }
 0x233   :  { %v1063_v21 = vadd.f32 %v4142_v49, %v1007_v31  ;;  %v1105_v24 = vadd.f32 %v4219_v59, %v1049_v44  ;;  %v1104_v0 = vadd.f32 %v4221_v36, %v1048_v20  ;;  %1652 = vrot.lane.b32.xlu1 %v4027_v55, %s3104_s25  ;;  %1650 = vrot.lane.b32.xlu0 %v4030_v38, %s3104_s25  ;;  %v1701_v22 = vstv %s4259_s16  ;;  %v1157_v17 = vpop.permute.xlu1 %1156  ;;  %v1155_v55 = vpop.permute.xlu0 %1154  ;;  %s2923_s16 = sld [smem:[#allocation7 + $0x3b]] }
 0x234   :  { %v1189_v33 = vadd.f32 %v5450_v54, %v1147_v3  ;;  %v1188_v50 = vadd.f32 %v5451_v56, %v1146_v11  ;;  %v1235_v49 = vadd.f32 %v4089_v46, %v1209_v51  ;;  %v1234_v32 = vadd.f32 %v4099_v23, %v1208_v12 }
 0x235   :  { %v1062_v59 = vadd.f32 %v4144_v41, %v1006_v13  ;;  %v1119_v36 = vadd.f32 %v1115_v43, %v1063_v21  ;;  %v1239_v38 = vmul.f32 %v1237_v4, %v3792_v6  ;;  %v1161_v39 = vadd.f32 %v1157_v17, %v1105_v24  ;;  %v5457_v13 = vld [vmem:[#allocation116_spill] sm:$0xff] }
 0x236   :  { %v1215_v19 = vadd.f32 %v5452_v16, %v1189_v33  ;;  %v1214_v47 = vadd.f32 %v5453_v52, %v1188_v50  ;;  %v1160_v46 = vadd.f32 %v1155_v55, %v1104_v0  ;;  %v4320_v41 = vadd.f32 %v4092_v63, %v1235_v49 }
 0x237   :  { %v1118_v23 = vadd.f32 %v4245_v48, %v1062_v59  ;;  %1666 = vrot.lane.b32.xlu1 %v4051_v40, %s3104_s25  ;;  %1664 = vrot.lane.b32.xlu0 %v4059_v8, %s3104_s25  ;;  %v4323_v4 = vadd.f32 %v4102_v1, %v1234_v32  ;;  %v1269_v43 = vstv %s4279_s17  ;;  %v1195_v18 = vadd.f32 %v4035_v27, %v1161_v39  ;;  %v1171_v57 = vpop.permute.xlu1 %1170  ;;  %v1169_v40 = vpop.permute.xlu0 %1168  ;;  %v5458_v27 = vld [vmem:[#allocation118_spill] sm:$0xff]  ;;  %s2924_s17 = sld [smem:[#allocation7 + $0x63]] }
 0x238   :  { %v1194_v2 = vadd.f32 %v5454_v26, %v1160_v46  ;;  %v1241_v61 = vadd.f32 %v1239_v38, %v1215_v19  ;;  %v1240_v48 = vadd.f32 %v1238_v7, %v1214_v47  ;;  %v1265_v10 = vmul.f32 %v1263_v14, %v3840_v58 }
 0x239   :  { %v1264_v8 = vmul.f32 %v1263_v14, %v3838_v28  ;;  %v5455_v63 = vstv %s4157_s14  ;;  %v1221_v44 = vadd.f32 %v5457_v13, %v1195_v18  ;;  %v1175_v25 = vadd.f32 %v1171_v57, %v1119_v36  ;;  %v5463_v57 = vld [vmem:[#allocation67_spill] sm:$0xff]  ;;  %s2918_s14 = sld [smem:[#allocation7 + $0x9]] }
 0x23a   :  { %v1245_v31 = vmul.f32 %v5455_v63, %v3792_v6  ;;  %v5456_v1 = vmov %v5455_v63  ;;  %v1220_v20 = vadd.f32 %v5458_v27, %v1194_v2  ;;  %v1174_v9 = vadd.f32 %v1169_v40, %v1118_v23 }
 0x23b   :  { %v1244_v60 = vmul.f32 %v5456_v1, %v3790_v5  ;;  %v5460_v51 = vstv %s3880_s28  ;;  %1680 = vrot.lane.b32.xlu1 %v4081_v42, %s3104_s25  ;;  %1678 = vrot.lane.b32.xlu0 %v4084_v37, %s3104_s25  ;;  %v4347_v14 = vadd.f32 %v1265_v10, %v1241_v61  ;;  %v4349_v12 = vadd.f32 %v1264_v8, %v1240_v48  ;;  %v4354_v54 = vpop.permute.xlu1 %1288  ;;  %v4356_v33 = vpop.permute.xlu0 %1286  ;;  %s2909_s28 = sld [smem:[#allocation7 + $0x8a]] }
 0x23c   :  { %v1224_v15 = vmul.f32 %v5460_v51, %v5459_v29  ;;  %v1275_v3 = vstv %s4299_s18  ;;  %v1201_v11 = vadd.f32 %v4064_v30, %v1175_v25  ;;  %v1200_v21 = vadd.f32 %v4078_v35, %v1174_v9  ;;  %s2925_s18 = sld [smem:[#allocation7 + $0x8b]] }
 0x23d   :  { %v1247_v24 = vadd.f32 %v1245_v31, %v1221_v44  ;;  %v1246_v0 = vadd.f32 %v1244_v60, %v1220_v20  ;;  %v1689_v42 = vmul.f32 %v1687_v53, %v3840_v58  ;;  %v1688_v37 = vmul.f32 %v1687_v53, %v3838_v28 }
 0x23e   :  { %v1271_v56 = vmul.f32 %v1269_v43, %v3840_v58  ;;  %v1270_v50 = vmul.f32 %v1269_v43, %v3838_v28  ;;  %v1227_v30 = vadd.f32 %v4073_v34, %v1201_v11  ;;  %v1226_v35 = vadd.f32 %v1224_v15, %v1200_v21  ;;  %v4437_v21 = vld [vmem:[#allocation2 + $0x1] sm:$0xff] }
 0x23f   :  { %v5461_v49 = vstv %s4183_s0  ;;  %1694 = vrot.lane.b32.xlu1 %v1689_v42, %s3104_s25  ;;  %1692 = vrot.lane.b32.xlu0 %v1688_v37, %s3104_s25  ;;  %v1277_v34 = vmul.f32 %v1275_v3, %v3840_v58  ;;  %v1276_v38 = vmul.f32 %v1275_v3, %v3838_v28  ;;  %v4381_v16 = vpop.permute.xlu1 %1302  ;;  %v4383_v19 = vpop.permute.xlu0 %1300  ;;  %v1703_v52 = vmul.f32 %v1701_v22, %v3840_v58  ;;  %v4434_v3 = vld [vmem:[#allocation2 + $0x9] sm:$0xff]  ;;  %s2919_s0 = sld [smem:[#allocation7 + $0x31]] }
 0x240   :  { %v1251_v32 = vmul.f32 %v5461_v49, %v3792_v6  ;;  %v5462_v59 = vmov %v5461_v49  ;;  %v4375_v53 = vadd.f32 %v1271_v56, %v1247_v24  ;;  %v4377_v17 = vadd.f32 %v1270_v50, %v1246_v0 }
 0x241   :  { %v1250_v36 = vmul.f32 %v5462_v59, %v3790_v5  ;;  %v1702_v47 = vmul.f32 %v1701_v22, %v3838_v28  ;;  %v1715_v39 = vstv %s4338_s19  ;;  %v1729_v61 = vstv %s2902_s20  ;;  %s2926_s19 = sld [smem:[#allocation7 + $0x1d]] }
 0x242   :  { %v1253_v55 = vadd.f32 %v1251_v32, %v1227_v30  ;;  %v1717_v26 = vmul.f32 %v1715_v39, %v3840_v58  ;;  %v1716_v2 = vmul.f32 %v1715_v39, %v3838_v28  ;;  %v1731_v40 = vmul.f32 %v1729_v61, %v5463_v57  ;;  %v4470_v39 = vld [vmem:[#allocation2 + $0x21] sm:$0xff]  ;;  %s2927_s20 = sld [smem:[#allocation7 + $0x45]] }
 0x243   :  { %v1252_v7 = vadd.f32 %v1250_v36, %v1226_v35  ;;  %1708 = vrot.lane.b32.xlu1 %v1703_v52, %s3104_s25  ;;  %1706 = vrot.lane.b32.xlu0 %v1702_v47, %s3104_s25  ;;  %v4398_v43 = vpop.permute.xlu1 %1316  ;;  %v4400_v18 = vpop.permute.xlu0 %1314  ;;  %v1730_v10 = vmul.f32 %v1729_v61, %v3718_v45  ;;  %v1743_v8 = vstv %s2903_s21  ;;  %v1757_v13 = vstv %s2904_s22  ;;  %s2928_s21 = sld [smem:[#allocation7 + $0x6d]] }
 0x244   :  { %v4392_v46 = vadd.f32 %v1277_v34, %v1253_v55  ;;  %v1745_v1 = vmul.f32 %v1743_v8, %v5463_v57  ;;  %v1744_v60 = vmul.f32 %v1743_v8, %v3718_v45  ;;  %v1759_v20 = vmul.f32 %v1757_v13, %v5463_v57  ;;  %s2929_s22 = sld [smem:[#allocation7 + $0x95]] }
 0x245   :  { %v4394_v23 = vadd.f32 %v1276_v38, %v1252_v7  ;;  %v1758_v25 = vmul.f32 %v1757_v13, %v3718_v45  ;;  %v1771_v9 = vstv %s2905_s23  ;;  %v1785_v0 = vstv %s2906_s24  ;;  %s2930_s23 = sld [smem:[#allocation7 + $0x27]] }
 0x246   :  { %v1773_v11 = vmul.f32 %v4434_v3, %v1771_v9  ;;  %v1772_v24 = vmul.f32 %v4437_v21, %v1771_v9  ;;  %v1787_v37 = vmul.f32 %v1785_v0, %v3756_v62  ;;  %v1786_v56 = vmul.f32 %v1785_v0, %v5459_v29  ;;  %s2931_s24 = sld [smem:[#allocation7 + $0x4f]] }
 0x247   :  { %1722 = vrot.lane.b32.xlu1 %v1717_v26, %s3104_s25  ;;  %1720 = vrot.lane.b32.xlu0 %v1716_v2, %s3104_s25  ;;  %v4406_v22 = vpop.permute.xlu1 %1330  ;;  %v4408_v48 = vpop.permute.xlu0 %1328  ;;  %v1799_v50 = vstv %s2907_s26  ;;  %v1813_v59 = vstv %s2908_s27  ;;  %v4473_v2 = vld [vmem:[#allocation2 + $0x19] sm:$0xff]  ;;  %s2932_s26 = sld [smem:[#allocation7 + $0x77]] }
 0x248   :  { %v1801_v49 = vmul.f32 %v1799_v50, %v3756_v62  ;;  %v1800_v32 = vmul.f32 %v1799_v50, %v5459_v29  ;;  %v1815_v55 = vmul.f32 %v1813_v59, %v3756_v62  ;;  %v1814_v38 = vmul.f32 %v1813_v59, %v5459_v29  ;;  %v4509_v59 = vld [vmem:[#allocation2 + $0x31] sm:$0xff]  ;;  %s2933_s27 = sld [smem:[#allocation7 + $0x9f]] }
 0x249   :  { %v1827_v7 = vstv %s2909_s28  ;;  %v1841_v61 = vstv %s2910_s5  ;;  %v1855_v8 = vstv %s2911_s6  ;;  %s2949_s28 = sld [smem:[#allocation8 + $0x1]]  ;;  %s2950_s5 = sld [smem:[#allocation8 + $0xd]] }
 0x24a   :  { %v1829_v26 = vmul.f32 %v4470_v39, %v1827_v7  ;;  %v1828_v62 = vmul.f32 %v4473_v2, %v1827_v7  ;;  %v1857_v13 = vmul.f32 %v1855_v8, %v3792_v6  ;;  %s2951_s6 = sld [smem:[#allocation8 + $0x19]] }
 0x24b   :  { %1736 = vrot.lane.b32.xlu1 %v1731_v40, %s3105_s15  ;;  %1734 = vrot.lane.b32.xlu0 %v1730_v10, %s3105_s15  ;;  %v4414_v63 = vpop.permute.xlu1 %1344  ;;  %v4416_v31 = vpop.permute.xlu0 %1342  ;;  %v1843_v40 = vmul.f32 %v1841_v61, %v3792_v6  ;;  %v1842_v10 = vmul.f32 %v1841_v61, %v3790_v5 }
 0x24f   :  { %1750 = vrot.lane.b32.xlu1 %v1745_v1, %s3105_s15  ;;  %1748 = vrot.lane.b32.xlu0 %v1744_v60, %s3105_s15  ;;  %v4422_v44 = vpop.permute.xlu1 %1358  ;;  %v4424_v27 = vpop.permute.xlu0 %1356 }
 0x253   :  { %1764 = vrot.lane.b32.xlu1 %v1759_v20, %s3105_s15  ;;  %1762 = vrot.lane.b32.xlu0 %v1758_v25, %s3105_s15  ;;  %v4430_v51 = vpop.permute.xlu1 %1372  ;;  %v4432_v15 = vpop.permute.xlu0 %1370  ;;  %v1856_v20 = vmul.f32 %v1855_v8, %v3790_v5  ;;  %v1869_v25 = vstv %s2912_s7  ;;  %s2952_s7 = sld [smem:[#allocation8 + $0x25]] }
 0x254   :  { %v1870_v0 = vmul.f32 %v1869_v25, %v3790_v5 }
 0x257   :  { %1778 = vrot.lane.b32.xlu1 %v1773_v11, %s3105_s15  ;;  %1776 = vrot.lane.b32.xlu0 %v1772_v24, %s3105_s15  ;;  %v4442_v45 = vpop.permute.xlu1 %1386  ;;  %v4444_v42 = vpop.permute.xlu0 %1384  ;;  %v1871_v24 = vmul.f32 %v1869_v25, %v3792_v6 }
 0x25b   :  { %1792 = vrot.lane.b32.xlu1 %v1787_v37, %s3105_s15  ;;  %1790 = vrot.lane.b32.xlu0 %v1786_v56, %s3105_s15  ;;  %v4450_v30 = vpop.permute.xlu1 %1400  ;;  %v4452_v35 = vpop.permute.xlu0 %1398  ;;  %v1883_v37 = vstv %s2913_s8  ;;  %s2954_s8 = sld [smem:[#allocation8 + $0x10]] }
 0x25c   :  { %v1884_v6 = vmul.f32 %v4509_v59, %v1883_v37 }
 0x25f   :  { %1806 = vrot.lane.b32.xlu1 %v1801_v49, %s3105_s15  ;;  %1804 = vrot.lane.b32.xlu0 %v1800_v32, %s3105_s15  ;;  %v4458_v36 = vpop.permute.xlu1 %1414  ;;  %v4460_v34 = vpop.permute.xlu0 %1412  ;;  %v4506_v49 = vld [vmem:[#allocation2 + $0x39] sm:$0xff] }
 0x260   :  { %v1885_v32 = vmul.f32 %v4506_v49, %v1883_v37  ;;  %v1939_v37 = vstv %s2917_s13  ;;  %s4716_s13 = sld [smem:[#allocation8 + $0x13]] }
 0x263   :  { %1820 = vrot.lane.b32.xlu1 %v1815_v55, %s3105_s15  ;;  %1818 = vrot.lane.b32.xlu0 %v1814_v38, %s3105_s15  ;;  %v4466_v52 = vpop.permute.xlu1 %1428  ;;  %v4468_v47 = vpop.permute.xlu0 %1426  ;;  %v1897_v55 = vstv %s2914_s10  ;;  %s2955_s10 = sld [smem:[#allocation8 + $0x1c]] }
 0x264   :  { %v1899_v7 = vmul.f32 %v1897_v55, %v3840_v58 }
 0x267   :  { %1834 = vrot.lane.b32.xlu1 %v1829_v26, %s3105_s15  ;;  %1832 = vrot.lane.b32.xlu0 %v1828_v62, %s3105_s15  ;;  %v4478_v29 = vpop.permute.xlu1 %1442  ;;  %v4480_v57 = vpop.permute.xlu0 %1440  ;;  %v1898_v26 = vmul.f32 %v1897_v55, %v3838_v28  ;;  %v1911_v62 = vstv %s2915_s11  ;;  %v1941_v55 = vmul.f32 %v1939_v37, %v3840_v58  ;;  %s4706_s11 = sld [smem:[#allocation8 + $0x28]] }
 0x268   :  { %v1912_v8 = vmul.f32 %v1911_v62, %v3838_v28 }
 0x26b   :  { %1848 = vrot.lane.b32.xlu1 %v1843_v40, %s3105_s15  ;;  %1846 = vrot.lane.b32.xlu0 %v1842_v10, %s3105_s15  ;;  %v4486_v1 = vpop.permute.xlu1 %1456  ;;  %v4488_v60 = vpop.permute.xlu0 %1454  ;;  %v1913_v10 = vmul.f32 %v1911_v62, %v3840_v58 }
 0x26f   :  { %1862 = vrot.lane.b32.xlu1 %v1857_v13, %s3105_s15  ;;  %1860 = vrot.lane.b32.xlu0 %v1856_v20, %s3105_s15  ;;  %v4494_v9 = vpop.permute.xlu1 %1470  ;;  %v4496_v11 = vpop.permute.xlu0 %1468  ;;  %v1925_v13 = vstv %s2916_s12  ;;  %s4708_s12 = sld [smem:[#allocation8 + $0x7]] }
 0x270   :  { %5464 = vst [vmem:[#allocation16_spill] sm:$0xff] %v4496_v11 }
 0x273   :  { %1876 = vrot.lane.b32.xlu1 %v1871_v24, %s3105_s15  ;;  %1874 = vrot.lane.b32.xlu0 %v1870_v0, %s3105_s15  ;;  %v4502_v56 = vpop.permute.xlu1 %1484  ;;  %v4504_v50 = vpop.permute.xlu0 %1482  ;;  %v1927_v24 = vmul.f32 %v1925_v13, %v3840_v58  ;;  %v1926_v0 = vmul.f32 %v1925_v13, %v3838_v28 }
 0x274   :  { %5465 = vst [vmem:[#allocation101_spill] sm:$0xff] %v4502_v56  ;;  %5466 = vst [vmem:[#allocation17_spill] sm:$0xff] %v4504_v50 }
 0x277   :  { %1890 = vrot.lane.b32.xlu1 %v1885_v32, %s3105_s15  ;;  %1888 = vrot.lane.b32.xlu0 %v1884_v6, %s3105_s15  ;;  %v4514_v5 = vpop.permute.xlu1 %1498  ;;  %v4516_v38 = vpop.permute.xlu0 %1496 }
 0x27b   :  { %1904 = vrot.lane.b32.xlu1 %v1899_v7, %s3105_s15  ;;  %1902 = vrot.lane.b32.xlu0 %v1898_v26, %s3105_s15  ;;  %v4522_v61 = vpop.permute.xlu1 %1512  ;;  %v4524_v40 = vpop.permute.xlu0 %1510  ;;  %v1940_v7 = vmul.f32 %v1939_v37, %v3838_v28  ;;  %v1953_v26 = vstv %s2918_s14  ;;  %s4718_s14 = sld [smem:[#allocation8 + $0x1f]] }
 0x27c   :  { %v1954_v13 = vmul.f32 %v4437_v21, %v1953_v26 }
 0x27f   :  { %1918 = vrot.lane.b32.xlu1 %v1913_v10, %s3105_s15  ;;  %1916 = vrot.lane.b32.xlu0 %v1912_v8, %s3105_s15  ;;  %v4530_v20 = vpop.permute.xlu1 %1526  ;;  %v4532_v25 = vpop.permute.xlu0 %1524  ;;  %v1955_v8 = vmul.f32 %v4434_v3, %v1953_v26 }
 0x280   :  { %5467 = vst [vmem:[#allocation18_spill] sm:$0xff] %v4530_v20  ;;  %5468 = vst [vmem:[#allocation29_spill] sm:$0xff] %v4532_v25  ;;  %v3005_v25 = vld [vmem:[#allocation2 + $0x49] sm:$0xff]  ;;  %v2135_v20 = vstv %s2931_s24  ;;  %s4972_s24 = sld [smem:[#allocation8 + $0xc]] }
 0x281   :  { %v2421_v50 = vstv %s4718_s14  ;;  %s5014_s14 = sld [smem:[#allocation8 + $0xb]] }
 0x283   :  { %1932 = vrot.lane.b32.xlu1 %v1927_v24, %s3105_s15  ;;  %1930 = vrot.lane.b32.xlu0 %v1926_v0, %s3105_s15  ;;  %v4538_v32 = vpop.permute.xlu1 %1540  ;;  %v4540_v6 = vpop.permute.xlu0 %1538  ;;  %v1967_v24 = vstv %s2919_s0  ;;  %s4720_s0 = sld [smem:[#allocation8 + $0x2b]] }
 0x284   :  { %5469 = vst [vmem:[#allocation30_spill] sm:$0xff] %v4538_v32  ;;  %5470 = vst [vmem:[#allocation19_spill] sm:$0xff] %v4540_v6  ;;  %v1969_v0 = vmul.f32 %v4434_v3, %v1967_v24  ;;  %v1968_v37 = vmul.f32 %v4437_v21, %v1967_v24  ;;  %v1995_v6 = vstv %s2921_s3  ;;  %s4842_s3 = sld [smem:[#allocation8 + $0x16]] }
 0x287   :  { %1946 = vrot.lane.b32.xlu1 %v1941_v55, %s3105_s15  ;;  %1944 = vrot.lane.b32.xlu0 %v1940_v7, %s3105_s15  ;;  %v4546_v62 = vpop.permute.xlu1 %1554  ;;  %v4548_v10 = vpop.permute.xlu0 %1552  ;;  %v1981_v55 = vstv %s2920_s1  ;;  %s2922_s15 = sld [smem:[#allocation7 + $0x13]]  ;;  %s4724_s1 = sld [smem:[#allocation8 + $0xa]] }
 0x28b   :  { %1960 = vrot.lane.b32.xlu1 %v1955_v8, %s3106_s9  ;;  %1958 = vrot.lane.b32.xlu0 %v1954_v13, %s3106_s9  ;;  %v4554_v28 = vpop.permute.xlu1 %1568  ;;  %v4556_v58 = vpop.permute.xlu0 %1566  ;;  %v1983_v8 = vmul.f32 %v4434_v3, %v1981_v55  ;;  %v1982_v13 = vmul.f32 %v4437_v21, %v1981_v55 }
 0x28c   :  { %5471 = vst [vmem:[#allocation20_spill] sm:$0xff] %v4554_v28  ;;  %5472 = vst [vmem:[#allocation21_spill] sm:$0xff] %v4556_v58  ;;  %v1334_v58 = vadd.f32 %v4408_v48, %v4394_v23  ;;  %v1293_v23 = vadd.f32 %v4354_v54, %v4320_v41 }
 0x28e   :  { %v1349_v41 = vadd.f32 %v4414_v63, %v1293_v23  ;;  %v5525_v23 = vld [vmem:[#allocation18_spill] sm:$0xff] }
 0x28f   :  { %1974 = vrot.lane.b32.xlu1 %v1969_v0, %s3106_s9  ;;  %1972 = vrot.lane.b32.xlu0 %v1968_v37, %s3106_s9  ;;  %v4562_v7 = vpop.permute.xlu1 %1582  ;;  %v4564_v26 = vpop.permute.xlu0 %1580  ;;  %v1997_v0 = vmul.f32 %v4434_v3, %v1995_v6  ;;  %v1996_v37 = vmul.f32 %v4437_v21, %v1995_v6 }
 0x290   :  { %5473 = vst [vmem:[#allocation22_spill] sm:$0xff] %v4562_v7  ;;  %5474 = vst [vmem:[#allocation23_spill] sm:$0xff] %v4564_v26  ;;  %v2009_v7 = vstv %s2922_s15  ;;  %s4867_s15 = sld [smem:[#allocation8 + $0x22]] }
 0x293   :  { %1988 = vrot.lane.b32.xlu1 %v1983_v8, %s3106_s9  ;;  %1986 = vrot.lane.b32.xlu0 %v1982_v13, %s3106_s9  ;;  %v4570_v24 = vpop.permute.xlu1 %1596  ;;  %v4572_v32 = vpop.permute.xlu0 %1594  ;;  %v2011_v8 = vmul.f32 %v4470_v39, %v2009_v7  ;;  %v2010_v13 = vmul.f32 %v4473_v2, %v2009_v7 }
 0x294   :  { %5475 = vst [vmem:[#allocation24_spill] sm:$0xff] %v4570_v24  ;;  %5476 = vst [vmem:[#allocation37_spill] sm:$0xff] %v4572_v32  ;;  %v2023_v24 = vstv %s2923_s16  ;;  %s4901_s16 = sld [smem:[#allocation8 + $0x2e]] }
 0x295   :  { %v2025_v6 = vmul.f32 %v4470_v39, %v2023_v24 }
 0x297   :  { %2002 = vrot.lane.b32.xlu1 %v1997_v0, %s3106_s9  ;;  %2000 = vrot.lane.b32.xlu0 %v1996_v37, %s3106_s9  ;;  %v4580_v26 = vpop.permute.xlu0 %1608  ;;  %v2024_v0 = vmul.f32 %v4473_v2, %v2023_v24  ;;  %v2037_v37 = vstv %s2924_s17  ;;  %s4922_s17 = sld [smem:[#allocation8 + $0x2]] }
 0x299   :  { %v4578_v55 = vpop.permute.xlu1 %1610 }
 0x29b   :  { %2016 = vrot.lane.b32.xlu1 %v2011_v8, %s3106_s9  ;;  %2014 = vrot.lane.b32.xlu0 %v2010_v13, %s3106_s9  ;;  %v4588_v21 = vpop.permute.xlu0 %1622  ;;  %v2039_v8 = vmul.f32 %v4470_v39, %v2037_v37  ;;  %v2038_v13 = vmul.f32 %v4473_v2, %v2037_v37 }
 0x29c   :  { %5478 = vst [vmem:[#allocation25_spill] sm:$0xff] %v4588_v21 }
 0x29d   :  { %v4586_v3 = vpop.permute.xlu1 %1624 }
 0x29e   :  { %5477 = vst [vmem:[#allocation38_spill] sm:$0xff] %v4586_v3  ;;  %v2051_v3 = vstv %s2925_s18  ;;  %s2966_s18 = sld [smem:[#allocation8 + $0xe]] }
 0x29f   :  { %2030 = vrot.lane.b32.xlu1 %v2025_v6, %s3106_s9  ;;  %2028 = vrot.lane.b32.xlu0 %v2024_v0, %s3106_s9  ;;  %v2053_v6 = vmul.f32 %v4470_v39, %v2051_v3  ;;  %v2052_v0 = vmul.f32 %v4473_v2, %v2051_v3 }
 0x2a1   :  { %v4594_v7 = vpop.permute.xlu1 %1638  ;;  %v4596_v32 = vpop.permute.xlu0 %1636 }
 0x2a2   :  { %5479 = vst [vmem:[#allocation26_spill] sm:$0xff] %v4594_v7  ;;  %5480 = vst [vmem:[#allocation27_spill] sm:$0xff] %v4596_v32  ;;  %v2065_v7 = vstv %s2926_s19  ;;  %s2967_s19 = sld [smem:[#allocation8 + $0x1a]] }
 0x2a3   :  { %2044 = vrot.lane.b32.xlu1 %v2039_v8, %s3106_s9  ;;  %2042 = vrot.lane.b32.xlu0 %v2038_v13, %s3106_s9  ;;  %v2067_v8 = vmul.f32 %v4506_v49, %v2065_v7  ;;  %v2066_v13 = vmul.f32 %v4509_v59, %v2065_v7 }
 0x2a5   :  { %v4602_v24 = vpop.permute.xlu1 %1652  ;;  %v4604_v21 = vpop.permute.xlu0 %1650 }
 0x2a6   :  { %5481 = vst [vmem:[#allocation102_spill] sm:$0xff] %v4602_v24  ;;  %5482 = vst [vmem:[#allocation31_spill] sm:$0xff] %v4604_v21  ;;  %v2079_v24 = vstv %s2927_s20  ;;  %s2968_s20 = sld [smem:[#allocation8 + $0x26]] }
 0x2a7   :  { %2058 = vrot.lane.b32.xlu1 %v2053_v6, %s3106_s9  ;;  %2056 = vrot.lane.b32.xlu0 %v2052_v0, %s3106_s9  ;;  %v2081_v3 = vmul.f32 %v4506_v49, %v2079_v24  ;;  %v2080_v6 = vmul.f32 %v4509_v59, %v2079_v24  ;;  %v2093_v0 = vstv %s2928_s21  ;;  %s4954_s21 = sld [smem:[#allocation8 + $0x11]] }
 0x2a9   :  { %v4610_v37 = vpop.permute.xlu1 %1666  ;;  %v4612_v32 = vpop.permute.xlu0 %1664 }
 0x2aa   :  { %5483 = vst [vmem:[#allocation32_spill] sm:$0xff] %v4610_v37  ;;  %5484 = vst [vmem:[#allocation45_spill] sm:$0xff] %v4612_v32  ;;  %v4755_v37 = vld [vmem:[#allocation2 + $0x52] sm:$0xff] }
 0x2ab   :  { %2072 = vrot.lane.b32.xlu1 %v2067_v8, %s3106_s9  ;;  %2070 = vrot.lane.b32.xlu0 %v2066_v13, %s3106_s9  ;;  %v2095_v8 = vmul.f32 %v4506_v49, %v2093_v0  ;;  %v2094_v13 = vmul.f32 %v4509_v59, %v2093_v0 }
 0x2ad   :  { %v4618_v39 = vpop.permute.xlu1 %1680  ;;  %v4620_v2 = vpop.permute.xlu0 %1678 }
 0x2ae   :  { %5485 = vst [vmem:[#allocation46_spill] sm:$0xff] %v4618_v39  ;;  %5486 = vst [vmem:[#allocation28_spill] sm:$0xff] %v4620_v2  ;;  %v2107_v39 = vstv %s2929_s22  ;;  %s4964_s22 = sld [smem:[#allocation8 + $0x1d]] }
 0x2af   :  { %2086 = vrot.lane.b32.xlu1 %v2081_v3, %s3106_s9  ;;  %2084 = vrot.lane.b32.xlu0 %v2080_v6, %s3106_s9  ;;  %v2109_v3 = vmul.f32 %v4506_v49, %v2107_v39  ;;  %v2108_v6 = vmul.f32 %v4509_v59, %v2107_v39 }
 0x2b1   :  { %v4626_v7 = vpop.permute.xlu1 %1694  ;;  %v4628_v21 = vpop.permute.xlu0 %1692 }
 0x2b2   :  { %5487 = vst [vmem:[#allocation33_spill] sm:$0xff] %v4626_v7  ;;  %5488 = vst [vmem:[#allocation34_spill] sm:$0xff] %v4628_v21  ;;  %v2121_v7 = vstv %s2930_s23  ;;  %s4970_s23 = sld [smem:[#allocation8]] }
 0x2b3   :  { %2100 = vrot.lane.b32.xlu1 %v2095_v8, %s3106_s9  ;;  %2098 = vrot.lane.b32.xlu0 %v2094_v13, %s3106_s9  ;;  %v3004_v8 = vld [vmem:[#allocation2 + $0x51] sm:$0xff] }
 0x2b4   :  { %v2123_v13 = vmul.f32 %v3004_v8, %v2121_v7  ;;  %v2137_v39 = vmul.f32 %v3004_v8, %v2135_v20 }
 0x2b5   :  { %v4634_v24 = vpop.permute.xlu1 %1708  ;;  %v4636_v2 = vpop.permute.xlu0 %1706 }
 0x2b6   :  { %5489 = vst [vmem:[#allocation35_spill] sm:$0xff] %v4634_v24  ;;  %5490 = vst [vmem:[#allocation39_spill] sm:$0xff] %v4636_v2  ;;  %v2122_v24 = vmul.f32 %v3005_v25, %v2121_v7 }
 0x2b7   :  { %2114 = vrot.lane.b32.xlu1 %v2109_v3, %s3106_s9  ;;  %2112 = vrot.lane.b32.xlu0 %v2108_v6, %s3106_s9  ;;  %v2136_v3 = vmul.f32 %v3005_v25, %v2135_v20  ;;  %v2149_v6 = vstv %s2932_s26  ;;  %s4979_s26 = sld [smem:[#allocation8 + $0x29]] }
 0x2b9   :  { %v4642_v0 = vpop.permute.xlu1 %1722  ;;  %v4644_v21 = vpop.permute.xlu0 %1720 }
 0x2ba   :  { %5491 = vst [vmem:[#allocation40_spill] sm:$0xff] %v4642_v0  ;;  %5492 = vst [vmem:[#allocation53_spill] sm:$0xff] %v4644_v21  ;;  %v2151_v21 = vmul.f32 %v3004_v8, %v2149_v6  ;;  %v2163_v0 = vstv %s2933_s27  ;;  %s4981_s27 = sld [smem:[#allocation8 + $0x18]] }
 0x2bb   :  { %2128 = vrot.lane.b32.xlu1 %v2123_v13, %s3106_s9  ;;  %2126 = vrot.lane.b32.xlu0 %v2122_v24, %s3106_s9  ;;  %v2150_v13 = vmul.f32 %v3005_v25, %v2149_v6 }
 0x2bd   :  { %v4648_v49 = vpop.permute.xlu1 %1736  ;;  %v4650_v59 = vpop.permute.xlu0 %1734 }
 0x2be   :  { %5493 = vst [vmem:[#allocation54_spill] sm:$0xff] %v4648_v49  ;;  %5494 = vst [vmem:[#allocation36_spill] sm:$0xff] %v4650_v59  ;;  %v2165_v59 = vmul.f32 %v3004_v8, %v2163_v0  ;;  %v4664_v49 = vld [vmem:[#allocation2 + $0xa] sm:$0xff]  ;;  %v2295_v8 = vstv %s2950_s5  ;;  %s4987_s5 = sld [smem:[#allocation8 + $0x24]] }
 0x2bf   :  { %2142 = vrot.lane.b32.xlu1 %v2137_v39, %s3106_s9  ;;  %2140 = vrot.lane.b32.xlu0 %v2136_v3, %s3106_s9  ;;  %v2164_v39 = vmul.f32 %v3005_v25, %v2163_v0  ;;  %5499 = vst [vmem:[#allocation61_spill] sm:$0xff] %v4664_v49  ;;  %v4666_v3 = vld [vmem:[#allocation2 + $0x2] sm:$0xff] }
 0x2c0   :  { %5500 = vst [vmem:[#allocation62_spill] sm:$0xff] %v4666_v3 }
 0x2c1   :  { %v4654_v2 = vpop.permute.xlu1 %1750  ;;  %v4656_v7 = vpop.permute.xlu0 %1748 }
 0x2c2   :  { %5495 = vst [vmem:[#allocation41_spill] sm:$0xff] %v4654_v2  ;;  %5496 = vst [vmem:[#allocation42_spill] sm:$0xff] %v4656_v7  ;;  %v2281_v2 = vstv %s2949_s28  ;;  %s4985_s28 = sld [smem:[#allocation8 + $0x3]] }
 0x2c3   :  { %2156 = vrot.lane.b32.xlu1 %v2151_v21, %s3106_s9  ;;  %2154 = vrot.lane.b32.xlu0 %v2150_v13, %s3106_s9  ;;  %v2283_v13 = vmul.f32 %v2281_v2, %v4664_v49 }
 0x2c5   :  { %v4660_v24 = vpop.permute.xlu1 %1764  ;;  %v4662_v20 = vpop.permute.xlu0 %1762 }
 0x2c6   :  { %5497 = vst [vmem:[#allocation47_spill] sm:$0xff] %v4660_v24  ;;  %5498 = vst [vmem:[#allocation48_spill] sm:$0xff] %v4662_v20  ;;  %v2282_v20 = vmul.f32 %v2281_v2, %v4666_v3  ;;  %v2309_v24 = vstv %s2951_s6  ;;  %s4989_s6 = sld [smem:[#allocation8 + $0xf]] }
 0x2c7   :  { %2170 = vrot.lane.b32.xlu1 %v2165_v59, %s3106_s9  ;;  %2168 = vrot.lane.b32.xlu0 %v2164_v39, %s3106_s9  ;;  %v2297_v59 = vmul.f32 %v2295_v8, %v4664_v49  ;;  %v2296_v39 = vmul.f32 %v2295_v8, %v4666_v3  ;;  %s2953_s9 = sld [smem:[#allocation8 + $0x4]] }
 0x2c9   :  { %v4670_v6 = vpop.permute.xlu1 %1778  ;;  %v4672_v21 = vpop.permute.xlu0 %1776 }
 0x2ca   :  { %5501 = vst [vmem:[#allocation43_spill] sm:$0xff] %v4670_v6  ;;  %5502 = vst [vmem:[#allocation44_spill] sm:$0xff] %v4672_v21  ;;  %v2407_v6 = vstv %s4716_s13  ;;  %s5012_s13 = sld [smem:[#allocation8 + $0x6]] }
 0x2cb   :  { %2288 = vrot.lane.b32.xlu1 %v2283_v13, %s3103_s2  ;;  %2286 = vrot.lane.b32.xlu0 %v2282_v20, %s3103_s2  ;;  %v2311_v20 = vmul.f32 %v2309_v24, %v4664_v49  ;;  %v2310_v13 = vmul.f32 %v2309_v24, %v4666_v3 }
 0x2cd   :  { %v4678_v25 = vpop.permute.xlu1 %1792  ;;  %v4680_v0 = vpop.permute.xlu0 %1790  ;;  %v2337_v21 = vstv %s2953_s9  ;;  %s4995_s9 = sld [smem:[#allocation8 + $0x8]] }
 0x2ce   :  { %5503 = vst [vmem:[#allocation49_spill] sm:$0xff] %v4678_v25  ;;  %5504 = vst [vmem:[#allocation50_spill] sm:$0xff] %v4680_v0  ;;  %v2323_v25 = vstv %s2952_s7  ;;  %s4991_s7 = sld [smem:[#allocation8 + $0x1b]] }
 0x2cf   :  { %2302 = vrot.lane.b32.xlu1 %v2297_v59, %s3103_s2  ;;  %2300 = vrot.lane.b32.xlu0 %v2296_v39, %s3103_s2  ;;  %v2325_v59 = vmul.f32 %v2323_v25, %v4664_v49  ;;  %v2324_v39 = vmul.f32 %v2323_v25, %v4666_v3  ;;  %v2351_v3 = vstv %s2954_s8  ;;  %s4997_s8 = sld [smem:[#allocation8 + $0x27]] }
 0x2d1   :  { %v4686_v2 = vpop.permute.xlu1 %1806  ;;  %v4688_v7 = vpop.permute.xlu0 %1804 }
 0x2d2   :  { %5505 = vst [vmem:[#allocation55_spill] sm:$0xff] %v4686_v2  ;;  %5506 = vst [vmem:[#allocation56_spill] sm:$0xff] %v4688_v7  ;;  %v4700_v2 = vld [vmem:[#allocation2 + $0x22] sm:$0xff]  ;;  %v4702_v7 = vld [vmem:[#allocation2 + $0x1a] sm:$0xff] }
 0x2d3   :  { %2316 = vrot.lane.b32.xlu1 %v2311_v20, %s3103_s2  ;;  %2314 = vrot.lane.b32.xlu0 %v2310_v13, %s3103_s2  ;;  %5509 = vst [vmem:[#allocation51_spill] sm:$0xff] %v4700_v2  ;;  %5510 = vst [vmem:[#allocation52_spill] sm:$0xff] %v4702_v7  ;;  %v2339_v25 = vmul.f32 %v2337_v21, %v4700_v2  ;;  %v2338_v13 = vmul.f32 %v2337_v21, %v4702_v7 }
 0x2d4   :  { %v2352_v49 = vmul.f32 %v2351_v3, %v4702_v7 }
 0x2d5   :  { %v4694_v8 = vpop.permute.xlu1 %1820  ;;  %v4696_v0 = vpop.permute.xlu0 %1818 }
 0x2d6   :  { %5507 = vst [vmem:[#allocation70_spill] sm:$0xff] %v4694_v8  ;;  %5508 = vst [vmem:[#allocation71_spill] sm:$0xff] %v4696_v0  ;;  %v2365_v0 = vstv %s2955_s10  ;;  %v2393_v8 = vstv %s4708_s12  ;;  %s5004_s10 = sld [smem:[#allocation8 + $0x14]] }
 0x2d7   :  { %2330 = vrot.lane.b32.xlu1 %v2325_v59, %s3103_s2  ;;  %2328 = vrot.lane.b32.xlu0 %v2324_v39, %s3103_s2  ;;  %v2353_v39 = vmul.f32 %v2351_v3, %v4700_v2  ;;  %v2366_v3 = vmul.f32 %v2365_v0, %v4702_v7  ;;  %s5010_s12 = sld [smem:[#allocation8 + $0x2c]] }
 0x2d9   :  { %v4710_v24 = vpop.permute.xlu1 %1834  ;;  %v4712_v20 = vpop.permute.xlu0 %1832 }
 0x2da   :  { %5511 = vst [vmem:[#allocation57_spill] sm:$0xff] %v4710_v24  ;;  %5512 = vst [vmem:[#allocation63_spill] sm:$0xff] %v4712_v20  ;;  %v4738_v20 = vld [vmem:[#allocation2 + $0x32] sm:$0xff]  ;;  %v2367_v24 = vmul.f32 %v2365_v0, %v4700_v2  ;;  %v1335_v0 = vadd.f32 %v4406_v22, %v4392_v46  ;;  %v1292_v22 = vadd.f32 %v4356_v33, %v4323_v4 }
 0x2db   :  { %2344 = vrot.lane.b32.xlu1 %v2339_v25, %s3103_s2  ;;  %2342 = vrot.lane.b32.xlu0 %v2338_v13, %s3103_s2  ;;  %v4734_v25 = vld [vmem:[#allocation2 + $0x3a] sm:$0xff]  ;;  %v2379_v13 = vstv %s4706_s11  ;;  %v4774_v11 = vmul.f32 %v2421_v50, %v4738_v20  ;;  %s5006_s11 = sld [smem:[#allocation8 + $0x20]] }
 0x2dc   :  { %5515 = vst [vmem:[#allocation80_spill] sm:$0xff] %v4734_v25  ;;  %v2380_v56 = vmul.f32 %v2379_v13, %v4702_v7  ;;  %v2395_v32 = vmul.f32 %v2393_v8, %v4734_v25  ;;  %v2408_v7 = vmul.f32 %v2407_v6, %v4738_v20  ;;  %v4771_v28 = vmul.f32 %v2421_v50, %v4734_v25 }
 0x2dd   :  { %v4726_v59 = vpop.permute.xlu1 %1848  ;;  %v4728_v21 = vpop.permute.xlu0 %1846  ;;  %v1391_v48 = vadd.f32 %v4442_v45, %v1335_v0  ;;  %v1348_v4 = vadd.f32 %v4416_v31, %v1292_v22  ;;  %v1307_v45 = vadd.f32 %v4381_v16, %v4347_v14  ;;  %v1405_v31 = vadd.f32 %v4450_v30, %v1349_v41  ;;  %v5523_v0 = vld [vmem:[#allocation101_spill] sm:$0xff]  ;;  %v5527_v41 = vld [vmem:[#allocation38_spill] sm:$0xff] }
 0x2de   :  { %5513 = vst [vmem:[#allocation64_spill] sm:$0xff] %v4726_v59  ;;  %5514 = vst [vmem:[#allocation79_spill] sm:$0xff] %v4728_v21 }
 0x2df   :  { %2358 = vrot.lane.b32.xlu1 %v2353_v39, %s3103_s2  ;;  %2356 = vrot.lane.b32.xlu0 %v2352_v49, %s3103_s2  ;;  %v2435_v39 = vstv %s4720_s0  ;;  %v2381_v49 = vmul.f32 %v2379_v13, %v4700_v2  ;;  %v1447_v54 = vadd.f32 %v4478_v29, %v1391_v48  ;;  %v1404_v29 = vadd.f32 %v4452_v35, %v1348_v4  ;;  %v5526_v48 = vld [vmem:[#allocation29_spill] sm:$0xff]  ;;  %s5016_s0 = sld [smem:[#allocation8 + $0x9]] }
 0x2e0   :  { %v4777_v46 = vmul.f32 %v2435_v39, %v4734_v25  ;;  %v4788_v50 = vmul.f32 %v2435_v39, %v4738_v20  ;;  %v5521_v39 = vld [vmem:[#allocation32_spill] sm:$0xff] }
 0x2e1   :  { %v4740_v59 = vpop.permute.xlu1 %1862  ;;  %v4742_v21 = vpop.permute.xlu0 %1860 }
 0x2e2   :  { %5516 = vst [vmem:[#allocation58_spill] sm:$0xff] %v4740_v59  ;;  %5517 = vst [vmem:[#allocation59_spill] sm:$0xff] %v4742_v21  ;;  %v2449_v59 = vstv %s4724_s1  ;;  %v4757_v21 = vld [vmem:[#allocation2 + $0x4a] sm:$0xff]  ;;  %s5020_s1 = sld [smem:[#allocation8 + $0x17]] }
 0x2e3   :  { %2372 = vrot.lane.b32.xlu1 %v2367_v24, %s3103_s2  ;;  %2370 = vrot.lane.b32.xlu0 %v2366_v3, %s3103_s2  ;;  %v2394_v24 = vmul.f32 %v2393_v8, %v4738_v20  ;;  %v2409_v3 = vmul.f32 %v2407_v6, %v4734_v25  ;;  %v1390_v8 = vadd.f32 %v4444_v42, %v1334_v58 }
 0x2e4   :  { %v4791_v6 = vmul.f32 %v2449_v59, %v4755_v37  ;;  %v4794_v25 = vmul.f32 %v2449_v59, %v4757_v21  ;;  %v1306_v42 = vadd.f32 %v4383_v19, %v4349_v12  ;;  %v1320_v58 = vadd.f32 %v4400_v18, %v4377_v17 }
 0x2e5   :  { %v4765_v2 = vpop.permute.xlu1 %1876  ;;  %v4767_v13 = vpop.permute.xlu0 %1874  ;;  %v1446_v33 = vadd.f32 %v4480_v57, %v1390_v8  ;;  %v1503_v57 = vadd.f32 %v4514_v5, %v1447_v54  ;;  %v1363_v12 = vadd.f32 %v4422_v44, %v1307_v45  ;;  %v1461_v17 = vadd.f32 %v4486_v1, %v1405_v31  ;;  %v5528_v54 = vld [vmem:[#allocation25_spill] sm:$0xff]  ;;  %v5529_v45 = vld [vmem:[#allocation40_spill] sm:$0xff]  ;;  %v5531_v31 = vld [vmem:[#allocation30_spill] sm:$0xff] }
 0x2e6   :  { %v1362_v16 = vadd.f32 %v4424_v27, %v1306_v42  ;;  %v1460_v19 = vadd.f32 %v4488_v60, %v1404_v29  ;;  %v1376_v30 = vadd.f32 %v4432_v15, %v1320_v58 }
 0x2e7   :  { %2386 = vrot.lane.b32.xlu1 %v2381_v49, %s3103_s2  ;;  %2384 = vrot.lane.b32.xlu0 %v2380_v56, %s3103_s2  ;;  %v1321_v56 = vadd.f32 %v4398_v43, %v4375_v53  ;;  %v1502_v14 = vadd.f32 %v4516_v38, %v1446_v33  ;;  %v1559_v43 = vadd.f32 %v4546_v62, %v1503_v57  ;;  %v5518_v62 = vld [vmem:[#allocation16_spill] sm:$0xff]  ;;  %v5522_v49 = vld [vmem:[#allocation45_spill] sm:$0xff]  ;;  %v5532_v57 = vld [vmem:[#allocation22_spill] sm:$0xff] }
 0x2e8   :  { %v1419_v44 = vadd.f32 %v4458_v36, %v1363_v12  ;;  %v1418_v27 = vadd.f32 %v4460_v34, %v1362_v16  ;;  %v1517_v1 = vadd.f32 %v4522_v61, %v1461_v17  ;;  %v1516_v60 = vadd.f32 %v4524_v40, %v1460_v19  ;;  %v5533_v12 = vld [vmem:[#allocation23_spill] sm:$0xff]  ;;  %v5535_v19 = vld [vmem:[#allocation28_spill] sm:$0xff] }
 0x2e9   :  { %v4808_v59 = vpop.permute.xlu1 %1890  ;;  %v4810_v63 = vpop.permute.xlu0 %1888  ;;  %v1377_v53 = vadd.f32 %v4430_v51, %v1321_v56  ;;  %v1558_v18 = vadd.f32 %v4548_v10, %v1502_v14  ;;  %v1615_v38 = vadd.f32 %v4578_v55, %v1559_v43  ;;  %v1432_v15 = vadd.f32 %v4468_v47, %v1376_v30  ;;  %v5520_v10 = vld [vmem:[#allocation21_spill] sm:$0xff] }
 0x2ea   :  { %v1475_v36 = vadd.f32 %v4494_v9, %v1419_v44  ;;  %v1474_v34 = vadd.f32 %v5518_v62, %v1418_v27  ;;  %v1572_v40 = vadd.f32 %v5520_v10, %v1516_v60  ;;  %v5530_v56 = vld [vmem:[#allocation53_spill] sm:$0xff]  ;;  %v5537_v44 = vld [vmem:[#allocation44_spill] sm:$0xff] }
 0x2eb   :  { %2400 = vrot.lane.b32.xlu1 %v2395_v32, %s3103_s2  ;;  %2398 = vrot.lane.b32.xlu0 %v2394_v24, %s3103_s2  ;;  %v1433_v51 = vadd.f32 %v4466_v52, %v1377_v53  ;;  %v1614_v32 = vadd.f32 %v4580_v26, %v1558_v18  ;;  %v5519_v52 = vld [vmem:[#allocation20_spill] sm:$0xff]  ;;  %v1671_v55 = vadd.f32 %v5521_v39, %v1615_v38  ;;  %v5524_v24 = vld [vmem:[#allocation17_spill] sm:$0xff]  ;;  %v5534_v53 = vld [vmem:[#allocation46_spill] sm:$0xff] }
 0x2ec   :  { %v1573_v61 = vadd.f32 %v5519_v52, %v1517_v1  ;;  %v1488_v9 = vadd.f32 %v5524_v24, %v1432_v15  ;;  %v1531_v22 = vadd.f32 %v5525_v23, %v1475_v36  ;;  %v1628_v33 = vadd.f32 %v5528_v54, %v1572_v40  ;;  %v5536_v18 = vld [vmem:[#allocation43_spill] sm:$0xff]  ;;  %v5539_v60 = vld [vmem:[#allocation24_spill] sm:$0xff]  ;;  %v5544_v40 = vld [vmem:[#allocation57_spill] sm:$0xff] }
 0x2ed   :  { %v4829_v35 = vpop.permute.xlu1 %1904  ;;  %v4831_v5 = vpop.permute.xlu0 %1902  ;;  %v1670_v26 = vadd.f32 %v5522_v49, %v1614_v32  ;;  %v1489_v47 = vadd.f32 %v5523_v0, %v1433_v51  ;;  %v1727_v42 = vadd.f32 %v5529_v45, %v1671_v55  ;;  %v5538_v51 = vld [vmem:[#allocation19_spill] sm:$0xff]  ;;  %v5540_v32 = vld [vmem:[#allocation26_spill] sm:$0xff] }
 0x2ee   :  { %v1629_v4 = vadd.f32 %v5527_v41, %v1573_v61  ;;  %v1587_v14 = vadd.f32 %v5532_v57, %v1531_v22  ;;  %v1684_v43 = vadd.f32 %v5535_v19, %v1628_v33  ;;  %v1544_v1 = vadd.f32 %v5538_v51, %v1488_v9  ;;  %v5541_v15 = vld [vmem:[#allocation27_spill] sm:$0xff]  ;;  %v5543_v61 = vld [vmem:[#allocation36_spill] sm:$0xff]  ;;  %v5548_v9 = vld [vmem:[#allocation34_spill] sm:$0xff] }
 0x2ef   :  { %2414 = vrot.lane.b32.xlu1 %v2409_v3, %s3103_s2  ;;  %2412 = vrot.lane.b32.xlu0 %v2408_v7, %s3103_s2  ;;  %v1530_v3 = vadd.f32 %v5526_v48, %v1474_v34  ;;  %v1726_v58 = vadd.f32 %v5530_v56, %v1670_v26  ;;  %v1545_v29 = vadd.f32 %v5531_v31, %v1489_v47  ;;  %v5542_v34 = vld [vmem:[#allocation54_spill] sm:$0xff]  ;;  %v5545_v55 = vld [vmem:[#allocation63_spill] sm:$0xff]  ;;  %v5546_v26 = vld [vmem:[#allocation37_spill] sm:$0xff]  ;;  %v2463_v22 = vstv %s4842_s3  ;;  %s5022_s3 = sld [smem:[#allocation8 + $0x12]] }
 0x2f0   :  { %v1685_v17 = vadd.f32 %v5534_v53, %v1629_v4  ;;  %v1783_v30 = vadd.f32 %v5536_v18, %v1727_v42  ;;  %v1740_v10 = vadd.f32 %v5543_v61, %v1684_v43  ;;  %v1600_v0 = vadd.f32 %v5546_v26, %v1544_v1  ;;  %v5547_v47 = vld [vmem:[#allocation33_spill] sm:$0xff]  ;;  %v5550_v41 = vld [vmem:[#allocation50_spill] sm:$0xff]  ;;  %v5552_v56 = vld [vmem:[#allocation31_spill] sm:$0xff] }
 0x2f1   :  { %v4852_v8 = vpop.permute.xlu1 %1918  ;;  %v4854_v7 = vpop.permute.xlu0 %1916  ;;  %v1586_v16 = vadd.f32 %v5533_v12, %v1530_v3  ;;  %v1782_v27 = vadd.f32 %v5537_v44, %v1726_v58  ;;  %v1601_v38 = vadd.f32 %v5539_v60, %v1545_v29  ;;  %v5549_v48 = vld [vmem:[#allocation49_spill] sm:$0xff]  ;;  %v5551_v45 = vld [vmem:[#allocation102_spill] sm:$0xff]  ;;  %v5555_v12 = vld [vmem:[#allocation64_spill] sm:$0xff]  ;;  %v2477_v44 = vstv %s4867_s15  ;;  %s5029_s15 = sld [smem:[#allocation8 + $0x15]] }
 0x2f2   :  { %v1741_v52 = vadd.f32 %v5542_v34, %v1685_v17  ;;  %v1839_v39 = vadd.f32 %v5544_v40, %v1783_v30  ;;  %v1796_v4 = vadd.f32 %v5550_v41, %v1740_v10  ;;  %v1656_v58 = vadd.f32 %v5552_v56, %v1600_v0  ;;  %v5553_v31 = vld [vmem:[#allocation41_spill] sm:$0xff]  ;;  %v5556_v53 = vld [vmem:[#allocation79_spill] sm:$0xff]  ;;  %v5560_v1 = vld [vmem:[#allocation56_spill] sm:$0xff] }
 0x2f3   :  { %2428 = vrot.lane.b32.xlu1 %v4771_v28, %s3103_s2  ;;  %2426 = vrot.lane.b32.xlu0 %v4774_v11, %s3103_s2  ;;  %v1643_v28 = vadd.f32 %v5540_v32, %v1587_v14  ;;  %v1642_v36 = vadd.f32 %v5541_v15, %v1586_v16  ;;  %v1838_v49 = vadd.f32 %v5545_v55, %v1782_v27  ;;  %v5558_v18 = vld [vmem:[#allocation39_spill] sm:$0xff]  ;;  %v2491_v41 = vstv %s4901_s16  ;;  %s5034_s16 = sld [smem:[#allocation8 + $0x23]] }
 0x2f4   :  { %v1797_v3 = vadd.f32 %v5549_v48, %v1741_v52  ;;  %v1895_v54 = vadd.f32 %v4808_v59, %v1839_v39  ;;  %v1657_v42 = vadd.f32 %v5551_v45, %v1601_v38  ;;  %v1852_v17 = vadd.f32 %v5556_v53, %v1796_v4  ;;  %v5559_v27 = vld [vmem:[#allocation55_spill] sm:$0xff] }
 0x2f5   :  { %v4877_v11 = vpop.permute.xlu1 %1932  ;;  %v4879_v62 = vpop.permute.xlu0 %1930  ;;  %v1699_v24 = vadd.f32 %v5547_v47, %v1643_v28  ;;  %v1698_v23 = vadd.f32 %v5548_v9, %v1642_v36  ;;  %v1894_v33 = vadd.f32 %v4810_v63, %v1838_v49  ;;  %v5557_v63 = vld [vmem:[#allocation35_spill] sm:$0xff]  ;;  %v1712_v30 = vadd.f32 %v5558_v18, %v1656_v58  ;;  %v5562_v36 = vld [vmem:[#allocation48_spill] sm:$0xff] }
 0x2f6   :  { %v1853_v16 = vadd.f32 %v5555_v12, %v1797_v3  ;;  %v1713_v43 = vadd.f32 %v5557_v63, %v1657_v42  ;;  %v1908_v32 = vadd.f32 %v4831_v5, %v1852_v17  ;;  %v5561_v28 = vld [vmem:[#allocation47_spill] sm:$0xff]  ;;  %v2464_v10 = vmul.f32 %v2463_v22, %v4757_v21 }
 0x2f7   :  { %2442 = vrot.lane.b32.xlu1 %v4777_v46, %s3103_s2  ;;  %2440 = vrot.lane.b32.xlu0 %v4788_v50, %s3103_s2  ;;  %v1755_v29 = vadd.f32 %v5553_v31, %v1699_v24  ;;  %v5554_v46 = vld [vmem:[#allocation42_spill] sm:$0xff]  ;;  %v1768_v34 = vadd.f32 %v5562_v36, %v1712_v30  ;;  %v5564_v39 = vld [vmem:[#allocation59_spill] sm:$0xff]  ;;  %v2479_v48 = vmul.f32 %v2477_v44, %v4755_v37  ;;  %v2519_v53 = vstv %s2966_s18  ;;  %s5080_s18 = sld [smem:[#allocation8 + $0x21]] }
 0x2f8   :  { %v1754_v57 = vadd.f32 %v5554_v46, %v1698_v23  ;;  %v1909_v38 = vadd.f32 %v4829_v35, %v1853_v16  ;;  %v1769_v15 = vadd.f32 %v5561_v28, %v1713_v43  ;;  %v5565_v35 = vld [vmem:[#allocation70_spill] sm:$0xff]  ;;  %v5566_v0 = vld [vmem:[#allocation71_spill] sm:$0xff]  ;;  %v2478_v3 = vmul.f32 %v2477_v44, %v4757_v21 }
 0x2f9   :  { %v1947_v14 = vpop.permute.xlu1 %1946  ;;  %v1945_v50 = vpop.permute.xlu0 %1944  ;;  %v1811_v51 = vadd.f32 %v5559_v27, %v1755_v29  ;;  %v1824_v47 = vadd.f32 %v5566_v0, %v1768_v34  ;;  %v2493_v58 = vmul.f32 %v2491_v41, %v4755_v37  ;;  %v2492_v31 = vmul.f32 %v2491_v41, %v4757_v21 }
 0x2fa   :  { %v1951_v59 = vadd.f32 %v1947_v14, %v1895_v54  ;;  %v1950_v19 = vadd.f32 %v1945_v50, %v1894_v33  ;;  %v1810_v60 = vadd.f32 %v5560_v1, %v1754_v57  ;;  %v1825_v5 = vadd.f32 %v5565_v35, %v1769_v15  ;;  %v5567_v14 = vld [vmem:[#allocation61_spill] sm:$0xff]  ;;  %v5568_v50 = vld [vmem:[#allocation62_spill] sm:$0xff] }
 0x2fb   :  { %2456 = vrot.lane.b32.xlu1 %v4791_v6, %s3103_s2  ;;  %2454 = vrot.lane.b32.xlu0 %v4794_v25, %s3103_s2  ;;  %v2465_v6 = vmul.f32 %v2463_v22, %v4755_v37  ;;  %v5563_v25 = vld [vmem:[#allocation58_spill] sm:$0xff]  ;;  %v1880_v54 = vadd.f32 %v4767_v13, %v1824_v47  ;;  %v2505_v13 = vstv %s4922_s17  ;;  %v2521_v43 = vmul.f32 %v2519_v53, %v5567_v14  ;;  %s5056_s17 = sld [smem:[#allocation8 + $0x1e]] }
 0x2fc   :  { %v1867_v40 = vadd.f32 %v5563_v25, %v1811_v51  ;;  %v1866_v55 = vadd.f32 %v5564_v39, %v1810_v60  ;;  %v1881_v4 = vadd.f32 %v4765_v2, %v1825_v5  ;;  %v2520_v18 = vmul.f32 %v2519_v53, %v5568_v50 }
 0x2fd   :  { %v1961_v52 = vpop.permute.xlu1 %1960  ;;  %v1959_v61 = vpop.permute.xlu0 %1958  ;;  %v2533_v27 = vstv %s2967_s19  ;;  %v2575_v5 = vstv %s4954_s21  ;;  %v2223_v53 = vstv %s4997_s8  ;;  %s5100_s19 = sld [smem:[#allocation8 + $0x2a]]  ;;  %s5194_s21 = sld [smem:[#allocation10 + $0x1]] }
 0x2fe   :  { %v1965_v49 = vadd.f32 %v1961_v52, %v1909_v38  ;;  %v1964_v26 = vadd.f32 %v1959_v61, %v1908_v32  ;;  %v1923_v24 = vadd.f32 %v4852_v8, %v1867_v40  ;;  %v1922_v9 = vadd.f32 %v4854_v7, %v1866_v55  ;;  %v5569_v40 = vld [vmem:[#allocation51_spill] sm:$0xff]  ;;  %v5570_v55 = vld [vmem:[#allocation52_spill] sm:$0xff] }
 0x2ff   :  { %2470 = vrot.lane.b32.xlu1 %v2465_v6, %s3103_s2  ;;  %2468 = vrot.lane.b32.xlu0 %v2464_v10, %s3103_s2  ;;  %v1937_v8 = vadd.f32 %v4877_v11, %v1881_v4  ;;  %v1936_v7 = vadd.f32 %v4879_v62, %v1880_v54  ;;  %v2507_v11 = vmul.f32 %v2505_v13, %v5567_v14  ;;  %v2547_v32 = vstv %s2968_s20  ;;  %s5126_s20 = sld [smem:[#allocation8 + $0x2d]] }
 0x300   :  { %v2506_v62 = vmul.f32 %v2505_v13, %v5568_v50  ;;  %v2535_v51 = vmul.f32 %v2533_v27, %v5567_v14  ;;  %v2534_v1 = vmul.f32 %v2533_v27, %v5568_v50  ;;  %v2549_v36 = vmul.f32 %v2547_v32, %v5567_v14 }
 0x301   :  { %v1975_v23 = vpop.permute.xlu1 %1974  ;;  %v1973_v22 = vpop.permute.xlu0 %1972  ;;  %v2548_v34 = vmul.f32 %v2547_v32, %v5568_v50 }
 0x302   :  { %v1979_v33 = vadd.f32 %v1975_v23, %v1923_v24  ;;  %v1978_v45 = vadd.f32 %v1973_v22, %v1922_v9  ;;  %v2577_v24 = vmul.f32 %v2575_v5, %v5569_v40  ;;  %v2576_v9 = vmul.f32 %v2575_v5, %v5570_v55 }
 0x303   :  { %2484 = vrot.lane.b32.xlu1 %v2479_v48, %s3103_s2  ;;  %2482 = vrot.lane.b32.xlu0 %v2478_v3, %s3103_s2  ;;  %v2589_v48 = vstv %s4964_s22  ;;  %s5197_s22 = sld [smem:[#allocation10 + $0x2]] }
 0x304   :  { %v2591_v4 = vmul.f32 %v2589_v48, %v5569_v40  ;;  %v2590_v54 = vmul.f32 %v2589_v48, %v5570_v55 }
 0x305   :  { %v1989_v42 = vpop.permute.xlu1 %1988  ;;  %v1987_v56 = vpop.permute.xlu0 %1986 }
 0x306   :  { %v1993_v2 = vadd.f32 %v1989_v42, %v1937_v8  ;;  %v1992_v29 = vadd.f32 %v1987_v56, %v1936_v7  ;;  %v2603_v8 = vstv %s4979_s26  ;;  %v2179_v7 = vstv %s4970_s23  ;;  %s5202_s23 = sld [smem:[#allocation10 + $0x3]] }
 0x307   :  { %2498 = vrot.lane.b32.xlu1 %v2493_v58, %s3103_s2  ;;  %2496 = vrot.lane.b32.xlu0 %v2492_v31, %s3103_s2  ;;  %s2969_s2 = sld [smem:[#allocation8 + $0x5]]  ;;  %v2205_v42 = vstv %s4985_s28  ;;  %v2185_v56 = vstv %s4972_s24  ;;  %v2605_v13 = vmul.f32 %v2603_v8, %v5569_v40  ;;  %s3107_s24 = smov [#allocation11]  }
 0x308   :  { %v2191_v58 = vstv %s4981_s27  ;;  %v2197_v31 = vstv %s4987_s5  ;;  %v2186_v5 = vmul.f32 %v2185_v56, %v5568_v50  ;;  %s2761_s26 = sshll.u32 %s3107_s24, 4  ;;  %s2762_s26 = int_to_ptr.vmem [resolvable:$true] %s2761_s26 }
 0x309   :  { %v2003_v46 = vpop.permute.xlu1 %2002  ;;  %v2001_v57 = vpop.permute.xlu0 %2000  ;;  %s3064_s27 = scalar_lea.vmem %s2762_s26, 1024  ;;  %p3069_p10 = scmp.lt.s32.totalorder %s2762_s26, %s2762_s26 }
 0x30a   :  { %v2007_v12 = vadd.f32 %v2003_v46, %v1951_v59  ;;  %v2006_v16 = vadd.f32 %v2001_v57, %v1950_v19  ;;  %v2604_v46 = vmul.f32 %v2603_v8, %v5570_v55  ;;  %v2211_v57 = vstv %s4989_s6  ;;  %p3065_p9 = scmp.ne.s32.totalorder %s2762_s26, %s3064_s27  ;;  %p3070_p11 = scmp.lt.s32.totalorder %s3064_s27, %s3064_s27 }
 0x30b   :  { %2512 = vrot.lane.b32.xlu1 %v2507_v11, %s3104_s25  ;;  %2510 = vrot.lane.b32.xlu0 %v2506_v62, %s3104_s25  ;;  %v2217_v11 = vstv %s4991_s7 }
 0x30c   :  { %p3071_p12 = por %p3070_p11, %p3069_p10 }
 0x30d   :  { %v2017_v17 = vpop.permute.xlu1 %2016  ;;  %v2015_v63 = vpop.permute.xlu0 %2014  ;;  %v2561_v6 = vstv %s2969_s2  ;;  %s5156_s2 = sld [smem:[#allocation8 + $0x2f]] }
 0x30e   :  { %v2021_v30 = vadd.f32 %v2017_v17, %v1965_v49  ;;  %v2020_v44 = vadd.f32 %v2015_v63, %v1964_v26  ;;  %v2563_v39 = vmul.f32 %v2561_v6, %v5569_v40  ;;  %v2562_v49 = vmul.f32 %v2561_v6, %v5570_v55  ;;  %p3072_p13 = pnand %p3071_p12, %p3065_p9 }
 0x30f   :  { %2526 = vrot.lane.b32.xlu1 %v2521_v43, %s3104_s25  ;;  %2524 = vrot.lane.b32.xlu0 %v2520_v18, %s3104_s25  ;;  %v2631_v17 = vstv %s5004_s10  ;;  %v2645_v63 = vstv %s5006_s11 }
 0x310   :  { %v2659_v43 = vstv %s5010_s12  ;;  %v2673_v18 = vstv %s5014_s14  ;;  %v2701_v6 = vstv %s5034_s16 }
 0x311   :  { %v2031_v59 = vpop.permute.xlu1 %2030  ;;  %v2029_v19 = vpop.permute.xlu0 %2028 }
 0x312   :  { %v2035_v60 = vadd.f32 %v2031_v59, %v1979_v33  ;;  %v2034_v38 = vadd.f32 %v2029_v19, %v1978_v45  ;;  %v5571_v19 = vld [vmem:[#allocation80_spill] sm:$0xff] }
 0x313   :  { %2540 = vrot.lane.b32.xlu1 %v2535_v51, %s3104_s25  ;;  %2538 = vrot.lane.b32.xlu0 %v2534_v1, %s3104_s25  ;;  %v2661_v8 = vmul.f32 %v2659_v43, %v5571_v19 }
 0x315   :  { %v2045_v28 = vpop.permute.xlu1 %2044  ;;  %v2043_v15 = vpop.permute.xlu0 %2042 }
 0x316   :  { %v4960_v52 = vadd.f32 %v2045_v28, %v1993_v2  ;;  %v4962_v61 = vadd.f32 %v2043_v15, %v1992_v29  ;;  %v2181_v15 = vmul.f32 %v2179_v7, %v5567_v14 }
 0x317   :  { %2554 = vrot.lane.b32.xlu1 %v2549_v36, %s3104_s25  ;;  %2552 = vrot.lane.b32.xlu0 %v2548_v34, %s3104_s25  ;;  %v2263_v36 = vstv %s5029_s15  ;;  %v2207_v34 = vmul.f32 %v2205_v42, %v5569_v40 }
 0x319   :  { %v2059_v10 = vpop.permute.xlu1 %2058  ;;  %v2057_v25 = vpop.permute.xlu0 %2056 }
 0x31a   :  { %v4974_v26 = vadd.f32 %v2059_v10, %v2007_v12  ;;  %v4976_v35 = vadd.f32 %v2057_v25, %v2006_v16  ;;  %v2617_v16 = vstv %s4995_s9  ;;  %v2633_v10 = vmul.f32 %v2631_v17, %v5571_v19 }
 0x31b   :  { %2568 = vrot.lane.b32.xlu1 %v2563_v39, %s3104_s25  ;;  %2566 = vrot.lane.b32.xlu0 %v2562_v49, %s3104_s25  ;;  %v2619_v51 = vmul.f32 %v2617_v16, %v5571_v19  ;;  %v2618_v1 = vmul.f32 %v2617_v16, %v4738_v20  ;;  %v2632_v25 = vmul.f32 %v2631_v17, %v4738_v20 }
 0x31c   :  { %v2187_v39 = vmul.f32 %v2185_v56, %v5567_v14  ;;  %v2213_v49 = vmul.f32 %v2211_v57, %v5569_v40  ;;  %v2199_v56 = vmul.f32 %v2197_v31, %v5567_v14 }
 0x31d   :  { %v2073_v0 = vpop.permute.xlu1 %2072  ;;  %v2071_v47 = vpop.permute.xlu0 %2070 }
 0x31e   :  { %v4999_v23 = vadd.f32 %v2073_v0, %v2021_v30  ;;  %v5001_v22 = vadd.f32 %v2071_v47, %v2020_v44  ;;  %v2231_v30 = vstv %s5012_s13  ;;  %v2257_v44 = vstv %s5016_s0 }
 0x31f   :  { %2582 = vrot.lane.b32.xlu1 %v2577_v24, %s3104_s25  ;;  %2580 = vrot.lane.b32.xlu0 %v2576_v9, %s3104_s25  ;;  %v2212_v0 = vmul.f32 %v2211_v57, %v5570_v55  ;;  %v2647_v47 = vmul.f32 %v2645_v63, %v5571_v19  ;;  %v2646_v24 = vmul.f32 %v2645_v63, %v4738_v20  ;;  %v2269_v63 = vstv %s5080_s18 }
 0x320   :  { %v2232_v57 = vmul.f32 %v2231_v30, %v4738_v20 }
 0x321   :  { %v2087_v3 = vpop.permute.xlu1 %2086  ;;  %v2085_v41 = vpop.permute.xlu0 %2084 }
 0x322   :  { %v5024_v33 = vadd.f32 %v2087_v3, %v2035_v60  ;;  %v5026_v45 = vadd.f32 %v2085_v41, %v2034_v38  ;;  %v2687_v60 = vstv %s5020_s1  ;;  %v2237_v38 = vstv %s5022_s3 }
 0x323   :  { %2596 = vrot.lane.b32.xlu1 %v2591_v4, %s3104_s25  ;;  %2594 = vrot.lane.b32.xlu0 %v2590_v54, %s3104_s25  ;;  %v2193_v3 = vmul.f32 %v2191_v58, %v5567_v14  ;;  %v2219_v41 = vmul.f32 %v2217_v11, %v5569_v40  ;;  %v2192_v4 = vmul.f32 %v2191_v58, %v5568_v50 }
 0x324   :  { %v2218_v54 = vmul.f32 %v2217_v11, %v5570_v55  ;;  %v5109_v58 = vmul.f32 %v2223_v53, %v5569_v40  ;;  %v2675_v40 = vmul.f32 %v2673_v18, %v4755_v37 }
 0x325   :  { %v2101_v2 = vpop.permute.xlu1 %2100  ;;  %v2099_v29 = vpop.permute.xlu0 %2098 }
 0x326   :  { %v5045_v62 = vadd.f32 %v2101_v2, %v4960_v52  ;;  %v5048_v12 = vadd.f32 %v2099_v29, %v4962_v61  ;;  %v2180_v52 = vmul.f32 %v2179_v7, %v5568_v50  ;;  %v2206_v61 = vmul.f32 %v2205_v42, %v5570_v55 }
 0x327   :  { %2610 = vrot.lane.b32.xlu1 %v2605_v13, %s3104_s25  ;;  %2608 = vrot.lane.b32.xlu0 %v2604_v46, %s3104_s25  ;;  %v2243_v7 = vstv %s5056_s17  ;;  %v2660_v42 = vmul.f32 %v2659_v43, %v4738_v20  ;;  %v2198_v13 = vmul.f32 %v2197_v31, %v5568_v50  ;;  %v2233_v46 = vmul.f32 %v2231_v30, %v5571_v19 }
 0x328   :  { %v2224_v50 = vmul.f32 %v2223_v53, %v5570_v55  ;;  %v2674_v31 = vmul.f32 %v2673_v18, %v4757_v21  ;;  %v2258_v55 = vmul.f32 %v2257_v44, %v4757_v21  ;;  %v2239_v53 = vmul.f32 %v2237_v38, %v5571_v19 }
 0x329   :  { %v2115_v27 = vpop.permute.xlu1 %2114  ;;  %v2113_v59 = vpop.permute.xlu0 %2112  ;;  %v2238_v18 = vmul.f32 %v2237_v38, %v4738_v20 }
 0x32a   :  { %v5067_v32 = vadd.f32 %v2115_v27, %v4974_v26  ;;  %v5070_v28 = vadd.f32 %v2113_v59, %v4976_v35 }
 0x32b   :  { %2624 = vrot.lane.b32.xlu1 %v2619_v51, %s3104_s25  ;;  %2622 = vrot.lane.b32.xlu0 %v2618_v1, %s3104_s25  ;;  %v2259_v51 = vmul.f32 %v2257_v44, %v4755_v37 }
 0x32d   :  { %v2129_v26 = vpop.permute.xlu1 %2128  ;;  %v2127_v35 = vpop.permute.xlu0 %2126 }
 0x32e   :  { %v2133_v9 = vadd.f32 %v2129_v26, %v4999_v23  ;;  %v2132_v48 = vadd.f32 %v2127_v35, %v5001_v22 }
 0x32f   :  { %2638 = vrot.lane.b32.xlu1 %v2633_v10, %s3104_s25  ;;  %2636 = vrot.lane.b32.xlu0 %v2632_v25, %s3104_s25  ;;  %v2689_v10 = vmul.f32 %v2687_v60, %v4755_v37  ;;  %v2249_v25 = vstv %s5100_s19 }
 0x330   :  { %v2183_v23 = vadd.f32 %v2181_v15, %v2133_v9  ;;  %v2182_v22 = vadd.f32 %v2180_v52, %v2132_v48 }
 0x331   :  { %v2143_v2 = vpop.permute.xlu1 %2142  ;;  %v2141_v29 = vpop.permute.xlu0 %2140 }
 0x332   :  { %v2209_v11 = vadd.f32 %v2207_v34, %v2183_v23  ;;  %v2208_v16 = vadd.f32 %v2206_v61, %v2182_v22  ;;  %v2147_v17 = vadd.f32 %v2143_v2, %v5024_v33  ;;  %v2146_v14 = vadd.f32 %v2141_v29, %v5026_v45 }
 0x333   :  { %2652 = vrot.lane.b32.xlu1 %v2647_v47, %s3104_s25  ;;  %2650 = vrot.lane.b32.xlu0 %v2646_v24, %s3104_s25  ;;  %v2244_v47 = vmul.f32 %v2243_v7, %v4738_v20  ;;  %v2275_v23 = vstv %s5126_s20  ;;  %v2251_v29 = vmul.f32 %v2249_v25, %v5571_v19 }
 0x334   :  { %v2189_v33 = vadd.f32 %v2187_v39, %v2147_v17  ;;  %v2188_v43 = vadd.f32 %v2186_v5, %v2146_v14  ;;  %v2235_v30 = vadd.f32 %v2233_v46, %v2209_v11  ;;  %v2234_v45 = vadd.f32 %v2232_v57, %v2208_v16 }
 0x335   :  { %v2157_v27 = vpop.permute.xlu1 %2156  ;;  %v2155_v59 = vpop.permute.xlu0 %2154  ;;  %v2264_v5 = vmul.f32 %v2263_v36, %v4757_v21  ;;  %v2250_v46 = vmul.f32 %v2249_v25, %v4738_v20  ;;  %v2277_v17 = vmul.f32 %v2275_v23, %v4755_v37 }
 0x336   :  { %v2215_v1 = vadd.f32 %v2213_v49, %v2189_v33  ;;  %v2214_v15 = vadd.f32 %v2212_v0, %v2188_v43  ;;  %v2161_v34 = vadd.f32 %v2157_v27, %v5045_v62  ;;  %v2160_v52 = vadd.f32 %v2155_v59, %v5048_v12 }
 0x337   :  { %2666 = vrot.lane.b32.xlu1 %v2661_v8, %s3104_s25  ;;  %2664 = vrot.lane.b32.xlu0 %v2660_v42, %s3104_s25  ;;  %v2261_v61 = vadd.f32 %v2259_v51, %v2235_v30  ;;  %v2260_v44 = vadd.f32 %v2258_v55, %v2234_v45  ;;  %v2265_v12 = vmul.f32 %v2263_v36, %v4755_v37 }
 0x338   :  { %v2195_v39 = vadd.f32 %v2193_v3, %v2161_v34  ;;  %v2194_v38 = vadd.f32 %v2192_v4, %v2160_v52  ;;  %v2241_v49 = vadd.f32 %v2239_v53, %v2215_v1  ;;  %v2240_v26 = vadd.f32 %v2238_v18, %v2214_v15 }
 0x339   :  { %v2171_v35 = vpop.permute.xlu1 %2170  ;;  %v2169_v62 = vpop.permute.xlu0 %2168  ;;  %v2245_v0 = vmul.f32 %v2243_v7, %v5571_v19  ;;  %v2688_v4 = vmul.f32 %v2687_v60, %v4757_v21  ;;  %v2276_v19 = vmul.f32 %v2275_v23, %v4757_v21 }
 0x33a   :  { %v2221_v24 = vadd.f32 %v2219_v41, %v2195_v39  ;;  %v2220_v9 = vadd.f32 %v2218_v54, %v2194_v38  ;;  %v2175_v48 = vadd.f32 %v2171_v35, %v5067_v32  ;;  %v2174_v3 = vadd.f32 %v2169_v62, %v5070_v28 }
 0x33b   :  { %2680 = vrot.lane.b32.xlu1 %v2675_v40, %s3104_s25  ;;  %2678 = vrot.lane.b32.xlu0 %v2674_v31, %s3104_s25  ;;  %v2267_v36 = vadd.f32 %v2265_v12, %v2241_v49  ;;  %v2266_v8 = vadd.f32 %v2264_v5, %v2240_v26  ;;  %v2271_v32 = vmul.f32 %v2269_v63, %v4755_v37 }
 0x33c   :  { %v2201_v22 = vadd.f32 %v2199_v56, %v2175_v48  ;;  %v2200_v7 = vadd.f32 %v2198_v13, %v2174_v3  ;;  %v2247_v42 = vadd.f32 %v2245_v0, %v2221_v24  ;;  %v2246_v2 = vadd.f32 %v2244_v47, %v2220_v9 }
 0x33d   :  { %v2289_v41 = vpop.permute.xlu1 %2288  ;;  %v2287_v54 = vpop.permute.xlu0 %2286  ;;  %v2270_v28 = vmul.f32 %v2269_v63, %v4757_v21  ;;  %v2715_v63 = vstv %s5156_s2 }
 0x33e   :  { %v2227_v60 = vadd.f32 %v5109_v58, %v2201_v22  ;;  %v2226_v57 = vadd.f32 %v2224_v50, %v2200_v7  ;;  %v2293_v56 = vadd.f32 %v2289_v41, %v2261_v61  ;;  %v2292_v13 = vadd.f32 %v2287_v54, %v2260_v44 }
 0x33f   :  { %2694 = vrot.lane.b32.xlu1 %v2689_v10, %s3104_s25  ;;  %2692 = vrot.lane.b32.xlu0 %v2688_v4, %s3104_s25  ;;  %v2273_v11 = vadd.f32 %v2271_v32, %v2247_v42  ;;  %v2272_v16 = vadd.f32 %v2270_v28, %v2246_v2  ;;  %v2703_v58 = vmul.f32 %v2701_v6, %v4755_v37 }
 0x340   :  { %v2253_v14 = vadd.f32 %v2251_v29, %v2227_v60  ;;  %v2252_v40 = vadd.f32 %v2250_v46, %v2226_v57  ;;  %v2702_v50 = vmul.f32 %v2701_v6, %v4757_v21  ;;  %v2717_v51 = vmul.f32 %v2715_v63, %v4755_v37 }
 0x341   :  { %v2303_v20 = vpop.permute.xlu1 %2302  ;;  %v2301_v31 = vpop.permute.xlu0 %2300  ;;  %v2716_v55 = vmul.f32 %v2715_v63, %v4757_v21 }
 0x342   :  { %v2307_v33 = vadd.f32 %v2303_v20, %v2267_v36  ;;  %v2306_v43 = vadd.f32 %v2301_v31, %v2266_v8  ;;  %v2279_v30 = vadd.f32 %v2277_v17, %v2253_v14  ;;  %v2278_v45 = vadd.f32 %v2276_v19, %v2252_v40 }
 0x343   :  { %2708 = vrot.lane.b32.xlu1 %v2703_v58, %s3104_s25  ;;  %2706 = vrot.lane.b32.xlu0 %v2702_v50, %s3104_s25 }
 0x345   :  { %v2317_v27 = vpop.permute.xlu1 %2316  ;;  %v2315_v59 = vpop.permute.xlu0 %2314 }
 0x346   :  { %v2321_v53 = vadd.f32 %v2317_v27, %v2273_v11  ;;  %v2320_v18 = vadd.f32 %v2315_v59, %v2272_v16 }
 0x347   :  { %2722 = vrot.lane.b32.xlu1 %v2717_v51, %s3104_s25  ;;  %2720 = vrot.lane.b32.xlu0 %v2716_v55, %s3104_s25  ;;  %s5192_s25 = sld [smem:[#allocation10]] }
 0x349   :  { %v2331_v6 = vpop.permute.xlu1 %2330  ;;  %v2329_v1 = vpop.permute.xlu0 %2328 }
 0x34a   :  { %v2335_v15 = vadd.f32 %v2331_v6, %v2279_v30  ;;  %v2334_v34 = vadd.f32 %v2329_v1, %v2278_v45 }
 0x34d   :  { %v2345_v52 = vpop.permute.xlu1 %2344  ;;  %v2343_v61 = vpop.permute.xlu0 %2342 }
 0x34e   :  { %v2349_v44 = vadd.f32 %v2345_v52, %v2293_v56  ;;  %v2348_v10 = vadd.f32 %v2343_v61, %v2292_v13 }
 0x351   :  { %v2359_v25 = vpop.permute.xlu1 %2358  ;;  %v2357_v39 = vpop.permute.xlu0 %2356 }
 0x352   :  { %v2363_v38 = vadd.f32 %v2359_v25, %v2307_v33  ;;  %v2362_v37 = vadd.f32 %v2357_v39, %v2306_v43 }
 0x355   :  { %v2373_v49 = vpop.permute.xlu1 %2372  ;;  %v2371_v21 = vpop.permute.xlu0 %2370 }
 0x356   :  { %v2377_v26 = vadd.f32 %v2373_v49, %v2321_v53  ;;  %v2376_v35 = vadd.f32 %v2371_v21, %v2320_v18 }
 0x359   :  { %v2387_v62 = vpop.permute.xlu1 %2386  ;;  %v2385_v12 = vpop.permute.xlu0 %2384 }
 0x35a   :  { %v2391_v5 = vadd.f32 %v2387_v62, %v2335_v15  ;;  %v2390_v0 = vadd.f32 %v2385_v12, %v2334_v34 }
 0x35d   :  { %v2401_v47 = vpop.permute.xlu1 %2400  ;;  %v2399_v24 = vpop.permute.xlu0 %2398 }
 0x35e   :  { %v2405_v9 = vadd.f32 %v2401_v47, %v2349_v44  ;;  %v2404_v48 = vadd.f32 %v2399_v24, %v2348_v10 }
 0x361   :  { %v2415_v3 = vpop.permute.xlu1 %2414  ;;  %v2413_v4 = vpop.permute.xlu0 %2412 }
 0x362   :  { %v2419_v36 = vadd.f32 %v2415_v3, %v2363_v38  ;;  %v2418_v8 = vadd.f32 %v2413_v4, %v2362_v37 }
 0x365   :  { %v2429_v23 = vpop.permute.xlu1 %2428  ;;  %v2427_v22 = vpop.permute.xlu0 %2426 }
 0x366   :  { %v2433_v7 = vadd.f32 %v2429_v23, %v2377_v26  ;;  %v2432_v42 = vadd.f32 %v2427_v22, %v2376_v35 }
 0x369   :  { %v2443_v2 = vpop.permute.xlu1 %2442  ;;  %v2441_v41 = vpop.permute.xlu0 %2440 }
 0x36a   :  { %v5188_v54 = vadd.f32 %v2443_v2, %v2391_v5  ;;  %v5190_v32 = vadd.f32 %v2441_v41, %v2390_v0  ;;  %v2729_v5 = vstv %s5192_s25  ;;  %v2736_v41 = vstv %s5194_s21 }
 0x36d   :  { %v2457_v28 = vpop.permute.xlu1 %2456  ;;  %v2455_v29 = vpop.permute.xlu0 %2454 }
 0x36e   :  { %v2461_v15 = vadd.f32 %v2457_v28, %v2405_v9  ;;  %v2460_v34 = vadd.f32 %v2455_v29, %v2404_v48 }
 0x371   :  { %v2471_v46 = vpop.permute.xlu1 %2470  ;;  %v2469_v60 = vpop.permute.xlu0 %2468 }
 0x372   :  { %v2475_v25 = vadd.f32 %v2471_v46, %v2419_v36  ;;  %v2474_v39 = vadd.f32 %v2469_v60, %v2418_v8 }
 0x375   :  { %v2485_v57 = vpop.permute.xlu1 %2484  ;;  %v2483_v56 = vpop.permute.xlu0 %2482 }
 0x376   :  { %v2489_v62 = vadd.f32 %v2485_v57, %v2433_v7  ;;  %v2488_v12 = vadd.f32 %v2483_v56, %v2432_v42 }
 0x379   :  { %v2499_v13 = vpop.permute.xlu1 %2498  ;;  %v2497_v11 = vpop.permute.xlu0 %2496 }
 0x37a   :  { %v2503_v7 = vadd.f32 %v2499_v13, %v5188_v54  ;;  %v2502_v42 = vadd.f32 %v2497_v11, %v5190_v32  ;;  %v2743_v11 = vstv %s5197_s22 }
 0x37d   :  { %v2513_v16 = vpop.permute.xlu1 %2512  ;;  %v2511_v17 = vpop.permute.xlu0 %2510 }
 0x37e   :  { %v2517_v52 = vadd.f32 %v2513_v16, %v2461_v15  ;;  %v2516_v61 = vadd.f32 %v2511_v17, %v2460_v34 }
 0x381   :  { %v2527_v14 = vpop.permute.xlu1 %2526  ;;  %v2525_v19 = vpop.permute.xlu0 %2524 }
 0x382   :  { %v2531_v49 = vadd.f32 %v2527_v14, %v2475_v25  ;;  %v2530_v21 = vadd.f32 %v2525_v19, %v2474_v39 }
 0x385   :  { %v2541_v40 = vpop.permute.xlu1 %2540  ;;  %v2539_v20 = vpop.permute.xlu0 %2538 }
 0x386   :  { %v2545_v4 = vadd.f32 %v2541_v40, %v2489_v62  ;;  %v2544_v36 = vadd.f32 %v2539_v20, %v2488_v12 }
 0x389   :  { %v2555_v31 = vpop.permute.xlu1 %2554  ;;  %v2553_v58 = vpop.permute.xlu0 %2552 }
 0x38a   :  { %v2559_v16 = vadd.f32 %v2555_v31, %v2503_v7  ;;  %v2558_v17 = vadd.f32 %v2553_v58, %v2502_v42 }
 0x38d   :  { %v2569_v50 = vpop.permute.xlu1 %2568  ;;  %v2567_v63 = vpop.permute.xlu0 %2566 }
 0x38e   :  { %v2573_v38 = vadd.f32 %v2569_v50, %v2517_v52  ;;  %v2572_v37 = vadd.f32 %v2567_v63, %v2516_v61 }
 0x391   :  { %v2583_v33 = vpop.permute.xlu1 %2582  ;;  %v2581_v43 = vpop.permute.xlu0 %2580 }
 0x392   :  { %v2587_v24 = vadd.f32 %v2583_v33, %v2531_v49  ;;  %v2586_v9 = vadd.f32 %v2581_v43, %v2530_v21 }
 0x395   :  { %v2597_v30 = vpop.permute.xlu1 %2596  ;;  %v2595_v45 = vpop.permute.xlu0 %2594 }
 0x396   :  { %v2601_v46 = vadd.f32 %v2597_v30, %v2545_v4  ;;  %v2600_v60 = vadd.f32 %v2595_v45, %v2544_v36  ;;  %v2750_v45 = vstv %s5202_s23 }
 0x399   :  { %v2611_v27 = vpop.permute.xlu1 %2610  ;;  %v2609_v59 = vpop.permute.xlu0 %2608 }
 0x39a   :  { %v2615_v20 = vadd.f32 %v2611_v27, %v2559_v16  ;;  %v2614_v50 = vadd.f32 %v2609_v59, %v2558_v17 }
 0x39d   :  { %v2625_v51 = vpop.permute.xlu1 %2624  ;;  %v2623_v55 = vpop.permute.xlu0 %2622 }
 0x39e   :  { %v2629_v26 = vadd.f32 %v2625_v51, %v2573_v38  ;;  %v2628_v35 = vadd.f32 %v2623_v55, %v2572_v37 }
 0x3a1   :  { %v2639_v53 = vpop.permute.xlu1 %2638  ;;  %v2637_v18 = vpop.permute.xlu0 %2636 }
 0x3a2   :  { %v2643_v8 = vadd.f32 %v2639_v53, %v2587_v24  ;;  %v2642_v23 = vadd.f32 %v2637_v18, %v2586_v9 }
 0x3a5   :  { %v2653_v6 = vpop.permute.xlu1 %2652  ;;  %v2651_v1 = vpop.permute.xlu0 %2650 }
 0x3a6   :  { %v2657_v14 = vadd.f32 %v2653_v6, %v2601_v46  ;;  %v2656_v54 = vadd.f32 %v2651_v1, %v2600_v60 }
 0x3a9   :  { %v2667_v44 = vpop.permute.xlu1 %2666  ;;  %v2665_v10 = vpop.permute.xlu0 %2664 }
 0x3aa   :  { %v2671_v43 = vadd.f32 %v2667_v44, %v2615_v20  ;;  %v2670_v30 = vadd.f32 %v2665_v10, %v2614_v50 }
 0x3ad   :  { %v2681_v0 = vpop.permute.xlu1 %2680  ;;  %v2679_v47 = vpop.permute.xlu0 %2678 }
 0x3ae   :  { %v2685_v48 = vadd.f32 %v2681_v0, %v2629_v26  ;;  %v2684_v3 = vadd.f32 %v2679_v47, %v2628_v35 }
 0x3b0   :  { %v2731_v22 = vadd.f32 %v2729_v5, %v2685_v48  ;;  %v2730_v2 = vadd.f32 %v2729_v5, %v2684_v3 }
 0x3b1   :  { %v2695_v28 = vpop.permute.xlu1 %2694  ;;  %v2693_v29 = vpop.permute.xlu0 %2692 }
 0x3b2   :  { %2734 = vst.msk [vmem:[#allocation11 + $0x8] sm:$0xff] %vm2732_vm4, %v2731_v22  ;;  %2733 = vst.msk [vmem:[#allocation11] sm:$0xff] %vm2732_vm4, %v2730_v2  ;;  %v2699_v57 = vadd.f32 %v2695_v28, %v2643_v8  ;;  %v2698_v56 = vadd.f32 %v2693_v29, %v2642_v23 }
 0x3b4   :  { %v2738_v32 = vadd.f32 %v2736_v41, %v2699_v57  ;;  %v2737_v13 = vadd.f32 %v2736_v41, %v2698_v56 }
 0x3b5   :  { %v2709_v19 = vpop.permute.xlu1 %2708  ;;  %v2707_v40 = vpop.permute.xlu0 %2706 }
 0x3b6   :  { %2741 = vst.msk [vmem:[#allocation11 + $0x18] sm:$0xff] %vm2732_vm4, %v2738_v32  ;;  %2740 = vst.msk [vmem:[#allocation11 + $0x10] sm:$0xff] %vm2732_vm4, %v2737_v13  ;;  %v2713_v63 = vadd.f32 %v2709_v19, %v2657_v14  ;;  %v2712_v33 = vadd.f32 %v2707_v40, %v2656_v54 }
 0x3b8   :  { %v2745_v31 = vadd.f32 %v2743_v11, %v2713_v63  ;;  %v2744_v58 = vadd.f32 %v2743_v11, %v2712_v33 }
 0x3b9   :  { %v2723_v51 = vpop.permute.xlu1 %2722  ;;  %v2721_v55 = vpop.permute.xlu0 %2720 }
 0x3ba   :  { %2748 = vst.msk [vmem:[#allocation11 + $0x28] sm:$0xff] %vm2732_vm4, %v2745_v31  ;;  %2747 = vst.msk [vmem:[#allocation11 + $0x20] sm:$0xff] %vm2732_vm4, %v2744_v58  ;;  %v2727_v27 = vadd.f32 %v2723_v51, %v2671_v43  ;;  %v2726_v59 = vadd.f32 %v2721_v55, %v2670_v30 }
 0x3bc   :  { %v2752_v53 = vadd.f32 %v2750_v45, %v2727_v27  ;;  %v2751_v18 = vadd.f32 %v2750_v45, %v2726_v59 }
 0x3be   :  { %2755 = vst.msk [vmem:[#allocation11 + $0x38] sm:$0xff] %vm2732_vm4, %v2752_v53  ;;  %2754 = vst.msk [vmem:[#allocation11 + $0x30] sm:$0xff] %vm2732_vm4, %v2751_v18 }
 0x3bf   :  { %3075 = shalt.err (!%p3072_p13)
}
 0x3c0   :  { %s3076_s6 = scalar_lea.hbm %s5233_s4, 1024 }
 0x3c1   :  { %p3077_p0 = scmp.ne.s32.totalorder %s5233_s4, %s3076_s6  ;;  %p3080_p1 = scmp.lt.u32.totalorder %s3076_s6, %s5233_s4 }
 0x3c3   :  { %p3082_p2 = pnand %p3080_p1, %p3077_p0 }
 0x3c5   :  { %3085 = shalt.err (!%p3082_p2)
}
 0x3c6   :  { %2767 = dma.vmem_to_hbm [thread:$0]  %s2762_s26, 1024, %s5233_s4, [#allocation5], %s3096_s29, %s3096_s29, %s3097_s30  }
 0x3c7   :  { %3092 = dma.done.wait [#allocation5], 1024  }
 0x3c8   :  { %3093 = vsyncadd [#allocation5], 4294966272 }
 0x3c9   :  { %2771 = vsyncpa [#allocation4], 1 }
 0x3ca   :  { %2772 = vsyncpa [#allocation5], 1 }
 0x3cb   :  { %2773 = vsyncpa [#allocation6], 1 }
 0x3cc   :  { %2774 = vsyncpa [#allocation9], 1 }

</bundles_post_ra>
